<compile_context>
chip_gen: v7x
topology: tpu7x:2x2x1
jax: 0.10.0
libtpu: 0.0.40
codegen_flags: <defaults>
</compile_context>

<pallas_src>
import jax
import jax.numpy as jnp
from jax.experimental import pallas as pl
from jax.experimental.pallas import tpu as pltpu  # noqa: F401  (TPU backend assumed)


# ----------------------------------------------------------------------------
# In-kernel helpers (trace-time Python, fully unrolled: T = 8)
# ----------------------------------------------------------------------------
def _lstm_recurrence(gx_steps, whh, hidden):
    """gx_steps: list of T arrays (B, 4H) holding x_t @ W_ih^T + (b_ih + b_hh).
    Runs the recurrent part only; returns the list of T hidden states (B, H)."""
    T = len(gx_steps)
    B = gx_steps[0].shape[0]
    h = jnp.zeros((B, hidden), jnp.float32)
    c = jnp.zeros((B, hidden), jnp.float32)
    hs = []
    for t in range(T):
        gates = gx_steps[t] + jnp.dot(h, whh, preferred_element_type=jnp.float32)
        sg = jax.nn.sigmoid(gates)      # one EUP pass over the full (B, 4H) block
        tg = jnp.tanh(gates)            # one EUP pass over the full (B, 4H) block
        i_g = sg[:, 0 * hidden:1 * hidden]
        f_g = sg[:, 1 * hidden:2 * hidden]
        g_g = tg[:, 2 * hidden:3 * hidden]
        o_g = sg[:, 3 * hidden:4 * hidden]
        c = f_g * c + i_g * g_g
        h = o_g * jnp.tanh(c)
        hs.append(h)
    return hs


# ----------------------------------------------------------------------------
# Fused kernel: LSTM(4->32) -> LSTM(32->64) -> LSTM(64->32) -> LSTM(32->16)
#               -> ReLU -> Linear(16->4), all in one invocation.
# ----------------------------------------------------------------------------
def _fused_only_lstm_kernel(
        x_ref,
        w1ih_ref, w1hh_ref, b1_ref,
        w2ih_ref, w2hh_ref, b2_ref,
        w3ih_ref, w3hh_ref, b3_ref,
        w4ih_ref, w4hh_ref, b4_ref,
        wfc_ref, bfc_ref,
        out_ref):
    B, T, D = x_ref.shape
    H1 = w1hh_ref.shape[0]

    # ---- layer 1: hoisted input projection for all timesteps (batch-first x) ----
    x = x_ref[...]                                            # (B, T, D)
    gx1 = (jnp.dot(x.reshape(B * T, D), w1ih_ref[...],
                   preferred_element_type=jnp.float32) + b1_ref[...])
    gx1 = gx1.reshape(B, T, 4 * H1)
    hs = _lstm_recurrence([gx1[:, t, :] for t in range(T)], w1hh_ref[...], H1)

    # ---- layers 2..4: time-major flattened sequences, never leave VMEM ----
    for wih_ref, whh_ref, b_ref in (
            (w2ih_ref, w2hh_ref, b2_ref),
            (w3ih_ref, w3hh_ref, b3_ref),
            (w4ih_ref, w4hh_ref, b4_ref)):
        hidden = whh_ref.shape[0]
        seq = jnp.concatenate(hs, axis=0)                     # (T*B, H_in), time-major
        gx = (jnp.dot(seq, wih_ref[...],
                      preferred_element_type=jnp.float32) + b_ref[...])
        hs = _lstm_recurrence([gx[t * B:(t + 1) * B, :] for t in range(T)],
                              whh_ref[...], hidden)

    # ---- head: ReLU then Linear(16 -> 4) on the last timestep only
    # (ReLU is elementwise, so relu(seq)[:, -1, :] == relu(last_h)) ----
    last = jnp.maximum(hs[-1], 0.0)                           # (B, 16)
    out_ref[...] = (jnp.dot(last, wfc_ref[...],
                            preferred_element_type=jnp.float32) + bfc_ref[...])


# ----------------------------------------------------------------------------
# Wrapper: pad batch to 8 sublanes, single pallas_call, slice real rows back.
# ----------------------------------------------------------------------------
def _round_up(n, m):
    return ((n + m - 1) // m) * m


@jax.jit
def only_lstm_forward(x_bf, params):
    """x_bf: (B, T, input_size) batch-first float32, as in the PyTorch module."""
    (p1, p2, p3, p4, (wfc_t, bfc)) = params
    B, T, D = x_bf.shape
    Bp = _round_up(max(B, 8), 8)                  # fill the 8-sublane group
    x_p = x_bf if Bp == B else jnp.pad(x_bf, ((0, Bp - B), (0, 0), (0, 0)))
    out = pl.pallas_call(
        _fused_only_lstm_kernel,
        out_shape=jax.ShapeDtypeStruct((Bp, bfc.shape[1]), jnp.float32),
    )(x_p, *p1, *p2, *p3, *p4, wfc_t, bfc)
    return out[:B]


# ----------------------------------------------------------------------------
# Parameter initialization (deterministic, PyTorch-style uniform(-1/sqrt(H), 1/sqrt(H)))
# ----------------------------------------------------------------------------
def init_lstm_params(key, in_dim, hidden):
    k1, k2, k3, k4 = jax.random.split(key, 4)
    bound = 1.0 / jnp.sqrt(hidden)
    # stored already transposed for the kernel's (x @ W) convention; gate order [i,f,g,o]
    w_ih_t = jax.random.uniform(k1, (in_dim, 4 * hidden), jnp.float32, -bound, bound)
    w_hh_t = jax.random.uniform(k2, (hidden, 4 * hidden), jnp.float32, -bound, bound)
    b_ih = jax.random.uniform(k3, (4 * hidden,), jnp.float32, -bound, bound)
    b_hh = jax.random.uniform(k4, (4 * hidden,), jnp.float32, -bound, bound)
    bias = (b_ih + b_hh).reshape(1, 4 * hidden)
    return w_ih_t, w_hh_t, bias


def init_fc_params(key, in_dim, out_dim):
    k1, k2 = jax.random.split(key)
    bound = 1.0 / jnp.sqrt(in_dim)
    w_t = jax.random.uniform(k1, (in_dim, out_dim), jnp.float32, -bound, bound)
    b = jax.random.uniform(k2, (1, out_dim), jnp.float32, -bound, bound)
    return w_t, b


if __name__ == "__main__":
    B, T, IN = 2, 8, 4
    key = jax.random.PRNGKey(0)
    kx, k1, k2, k3, k4, kfc = jax.random.split(key, 6)

    x = jax.random.normal(kx, (B, T, IN), jnp.float32)

    params = (
        init_lstm_params(k1, IN, 32),
        init_lstm_params(k2, 32, 64),
        init_lstm_params(k3, 64, 32),
        init_lstm_params(k4, 32, 16),
        init_fc_params(kfc, 16, 4),
    )

    out = only_lstm_forward(x, params)
    jax.block_until_ready(out)
    assert out.shape == (B, 4)
    print("KERNEL_OK")
</pallas_src>

<mosaic_0001>
module attributes {stable_mosaic.version = 11 : i64} {
  func.func @_fused_only_lstm_kernel(%arg0: memref<8x8x4xf32, #tpu.memory_space<vmem>>, %arg1: memref<4x128xf32, #tpu.memory_space<vmem>>, %arg2: memref<32x128xf32, #tpu.memory_space<vmem>>, %arg3: memref<1x128xf32, #tpu.memory_space<vmem>>, %arg4: memref<32x256xf32, #tpu.memory_space<vmem>>, %arg5: memref<64x256xf32, #tpu.memory_space<vmem>>, %arg6: memref<1x256xf32, #tpu.memory_space<vmem>>, %arg7: memref<64x128xf32, #tpu.memory_space<vmem>>, %arg8: memref<32x128xf32, #tpu.memory_space<vmem>>, %arg9: memref<1x128xf32, #tpu.memory_space<vmem>>, %arg10: memref<32x64xf32, #tpu.memory_space<vmem>>, %arg11: memref<16x64xf32, #tpu.memory_space<vmem>>, %arg12: memref<1x64xf32, #tpu.memory_space<vmem>>, %arg13: memref<16x4xf32, #tpu.memory_space<vmem>>, %arg14: memref<1x4xf32, #tpu.memory_space<vmem>>, %arg15: memref<8x4xf32, #tpu.memory_space<vmem>>) attributes {dimension_semantics = [], scalar_prefetch = 0 : i64, scratch_operands = 0 : i64, tpu.core_type = #tpu.core_type<tc>} {
    %c0 = arith.constant 0 : index
    %c0_0 = arith.constant 0 : index
    %c0_1 = arith.constant 0 : index
    %0 = vector.load %arg0[%c0, %c0_0, %c0_1] : memref<8x8x4xf32, #tpu.memory_space<vmem>>, vector<8x8x4xf32>
    %1 = vector.shape_cast %0 : vector<8x8x4xf32> to vector<64x4xf32>
    %c0_2 = arith.constant 0 : index
    %c0_3 = arith.constant 0 : index
    %2 = vector.load %arg1[%c0_2, %c0_3] : memref<4x128xf32, #tpu.memory_space<vmem>>, vector<4x128xf32>
    %cst = arith.constant dense<0.000000e+00> : vector<64x128xf32>
    %3 = tpu.matmul %1, %2, %cst {dimension_numbers = #tpu.dot_dimension_numbers<[1], [0], [0], [1], [0, 0, 1, 1], [], []>} : vector<64x4xf32>, vector<4x128xf32>, vector<64x128xf32> -> vector<64x128xf32>
    %c0_4 = arith.constant 0 : index
    %c0_5 = arith.constant 0 : index
    %4 = vector.load %arg3[%c0_4, %c0_5] : memref<1x128xf32, #tpu.memory_space<vmem>>, vector<1x128xf32>
    %5 = vector.broadcast %4 : vector<1x128xf32> to vector<64x128xf32>
    %6 = arith.addf %3, %5 : vector<64x128xf32>
    %7 = vector.shape_cast %6 : vector<64x128xf32> to vector<8x8x128xf32>
    %8 = vector.extract_strided_slice %7 {offsets = [0, 0, 0], sizes = [8, 1, 128], strides = [1, 1, 1]} : vector<8x8x128xf32> to vector<8x1x128xf32>
    %9 = vector.shape_cast %8 : vector<8x1x128xf32> to vector<8x128xf32>
    %10 = vector.extract_strided_slice %7 {offsets = [0, 1, 0], sizes = [8, 1, 128], strides = [1, 1, 1]} : vector<8x8x128xf32> to vector<8x1x128xf32>
    %11 = vector.shape_cast %10 : vector<8x1x128xf32> to vector<8x128xf32>
    %12 = vector.extract_strided_slice %7 {offsets = [0, 2, 0], sizes = [8, 1, 128], strides = [1, 1, 1]} : vector<8x8x128xf32> to vector<8x1x128xf32>
    %13 = vector.shape_cast %12 : vector<8x1x128xf32> to vector<8x128xf32>
    %14 = vector.extract_strided_slice %7 {offsets = [0, 3, 0], sizes = [8, 1, 128], strides = [1, 1, 1]} : vector<8x8x128xf32> to vector<8x1x128xf32>
    %15 = vector.shape_cast %14 : vector<8x1x128xf32> to vector<8x128xf32>
    %16 = vector.extract_strided_slice %7 {offsets = [0, 4, 0], sizes = [8, 1, 128], strides = [1, 1, 1]} : vector<8x8x128xf32> to vector<8x1x128xf32>
    %17 = vector.shape_cast %16 : vector<8x1x128xf32> to vector<8x128xf32>
    %18 = vector.extract_strided_slice %7 {offsets = [0, 5, 0], sizes = [8, 1, 128], strides = [1, 1, 1]} : vector<8x8x128xf32> to vector<8x1x128xf32>
    %19 = vector.shape_cast %18 : vector<8x1x128xf32> to vector<8x128xf32>
    %20 = vector.extract_strided_slice %7 {offsets = [0, 6, 0], sizes = [8, 1, 128], strides = [1, 1, 1]} : vector<8x8x128xf32> to vector<8x1x128xf32>
    %21 = vector.shape_cast %20 : vector<8x1x128xf32> to vector<8x128xf32>
    %22 = vector.extract_strided_slice %7 {offsets = [0, 7, 0], sizes = [8, 1, 128], strides = [1, 1, 1]} : vector<8x8x128xf32> to vector<8x1x128xf32>
    %23 = vector.shape_cast %22 : vector<8x1x128xf32> to vector<8x128xf32>
    %c0_6 = arith.constant 0 : index
    %c0_7 = arith.constant 0 : index
    %24 = vector.load %arg2[%c0_6, %c0_7] : memref<32x128xf32, #tpu.memory_space<vmem>>, vector<32x128xf32>
    %cst_8 = arith.constant 0.000000e+00 : f32
    %25 = vector.broadcast %cst_8 : f32 to vector<8x32xf32>
    %cst_9 = arith.constant 0.000000e+00 : f32
    %26 = vector.broadcast %cst_9 : f32 to vector<8x32xf32>
    %cst_10 = arith.constant dense<0.000000e+00> : vector<8x128xf32>
    %27 = tpu.matmul %25, %24, %cst_10 {dimension_numbers = #tpu.dot_dimension_numbers<[1], [0], [0], [1], [0, 0, 1, 1], [], []>} : vector<8x32xf32>, vector<32x128xf32>, vector<8x128xf32> -> vector<8x128xf32>
    %28 = arith.addf %9, %27 : vector<8x128xf32>
    %29 = arith.negf %28 : vector<8x128xf32>
    %30 = math.exp %29 : vector<8x128xf32>
    %cst_11 = arith.constant 1.000000e+00 : f32
    %31 = vector.broadcast %cst_11 : f32 to vector<8x128xf32>
    %32 = arith.addf %31, %30 : vector<8x128xf32>
    %33 = arith.divf %31, %32 : vector<8x128xf32>
    %34 = math.tanh %28 : vector<8x128xf32>
    %35 = vector.extract_strided_slice %33 {offsets = [0, 0], sizes = [8, 32], strides = [1, 1]} : vector<8x128xf32> to vector<8x32xf32>
    %36 = vector.extract_strided_slice %33 {offsets = [0, 32], sizes = [8, 32], strides = [1, 1]} : vector<8x128xf32> to vector<8x32xf32>
    %37 = vector.extract_strided_slice %34 {offsets = [0, 64], sizes = [8, 32], strides = [1, 1]} : vector<8x128xf32> to vector<8x32xf32>
    %38 = vector.extract_strided_slice %33 {offsets = [0, 96], sizes = [8, 32], strides = [1, 1]} : vector<8x128xf32> to vector<8x32xf32>
    %39 = arith.mulf %36, %26 : vector<8x32xf32>
    %40 = arith.mulf %35, %37 : vector<8x32xf32>
    %41 = arith.addf %39, %40 : vector<8x32xf32>
    %42 = math.tanh %41 : vector<8x32xf32>
    %43 = arith.mulf %38, %42 : vector<8x32xf32>
    %cst_12 = arith.constant dense<0.000000e+00> : vector<8x128xf32>
    %44 = tpu.matmul %43, %24, %cst_12 {dimension_numbers = #tpu.dot_dimension_numbers<[1], [0], [0], [1], [0, 0, 1, 1], [], []>} : vector<8x32xf32>, vector<32x128xf32>, vector<8x128xf32> -> vector<8x128xf32>
    %45 = arith.addf %11, %44 : vector<8x128xf32>
    %46 = arith.negf %45 : vector<8x128xf32>
    %47 = math.exp %46 : vector<8x128xf32>
    %cst_13 = arith.constant 1.000000e+00 : f32
    %48 = vector.broadcast %cst_13 : f32 to vector<8x128xf32>
    %49 = arith.addf %48, %47 : vector<8x128xf32>
    %50 = arith.divf %48, %49 : vector<8x128xf32>
    %51 = math.tanh %45 : vector<8x128xf32>
    %52 = vector.extract_strided_slice %50 {offsets = [0, 0], sizes = [8, 32], strides = [1, 1]} : vector<8x128xf32> to vector<8x32xf32>
    %53 = vector.extract_strided_slice %50 {offsets = [0, 32], sizes = [8, 32], strides = [1, 1]} : vector<8x128xf32> to vector<8x32xf32>
    %54 = vector.extract_strided_slice %51 {offsets = [0, 64], sizes = [8, 32], strides = [1, 1]} : vector<8x128xf32> to vector<8x32xf32>
    %55 = vector.extract_strided_slice %50 {offsets = [0, 96], sizes = [8, 32], strides = [1, 1]} : vector<8x128xf32> to vector<8x32xf32>
    %56 = arith.mulf %53, %41 : vector<8x32xf32>
    %57 = arith.mulf %52, %54 : vector<8x32xf32>
    %58 = arith.addf %56, %57 : vector<8x32xf32>
    %59 = math.tanh %58 : vector<8x32xf32>
    %60 = arith.mulf %55, %59 : vector<8x32xf32>
    %cst_14 = arith.constant dense<0.000000e+00> : vector<8x128xf32>
    %61 = tpu.matmul %60, %24, %cst_14 {dimension_numbers = #tpu.dot_dimension_numbers<[1], [0], [0], [1], [0, 0, 1, 1], [], []>} : vector<8x32xf32>, vector<32x128xf32>, vector<8x128xf32> -> vector<8x128xf32>
    %62 = arith.addf %13, %61 : vector<8x128xf32>
    %63 = arith.negf %62 : vector<8x128xf32>
    %64 = math.exp %63 : vector<8x128xf32>
    %cst_15 = arith.constant 1.000000e+00 : f32
    %65 = vector.broadcast %cst_15 : f32 to vector<8x128xf32>
    %66 = arith.addf %65, %64 : vector<8x128xf32>
    %67 = arith.divf %65, %66 : vector<8x128xf32>
    %68 = math.tanh %62 : vector<8x128xf32>
    %69 = vector.extract_strided_slice %67 {offsets = [0, 0], sizes = [8, 32], strides = [1, 1]} : vector<8x128xf32> to vector<8x32xf32>
    %70 = vector.extract_strided_slice %67 {offsets = [0, 32], sizes = [8, 32], strides = [1, 1]} : vector<8x128xf32> to vector<8x32xf32>
    %71 = vector.extract_strided_slice %68 {offsets = [0, 64], sizes = [8, 32], strides = [1, 1]} : vector<8x128xf32> to vector<8x32xf32>
    %72 = vector.extract_strided_slice %67 {offsets = [0, 96], sizes = [8, 32], strides = [1, 1]} : vector<8x128xf32> to vector<8x32xf32>
    %73 = arith.mulf %70, %58 : vector<8x32xf32>
    %74 = arith.mulf %69, %71 : vector<8x32xf32>
    %75 = arith.addf %73, %74 : vector<8x32xf32>
    %76 = math.tanh %75 : vector<8x32xf32>
    %77 = arith.mulf %72, %76 : vector<8x32xf32>
    %cst_16 = arith.constant dense<0.000000e+00> : vector<8x128xf32>
    %78 = tpu.matmul %77, %24, %cst_16 {dimension_numbers = #tpu.dot_dimension_numbers<[1], [0], [0], [1], [0, 0, 1, 1], [], []>} : vector<8x32xf32>, vector<32x128xf32>, vector<8x128xf32> -> vector<8x128xf32>
    %79 = arith.addf %15, %78 : vector<8x128xf32>
    %80 = arith.negf %79 : vector<8x128xf32>
    %81 = math.exp %80 : vector<8x128xf32>
    %cst_17 = arith.constant 1.000000e+00 : f32
    %82 = vector.broadcast %cst_17 : f32 to vector<8x128xf32>
    %83 = arith.addf %82, %81 : vector<8x128xf32>
    %84 = arith.divf %82, %83 : vector<8x128xf32>
    %85 = math.tanh %79 : vector<8x128xf32>
    %86 = vector.extract_strided_slice %84 {offsets = [0, 0], sizes = [8, 32], strides = [1, 1]} : vector<8x128xf32> to vector<8x32xf32>
    %87 = vector.extract_strided_slice %84 {offsets = [0, 32], sizes = [8, 32], strides = [1, 1]} : vector<8x128xf32> to vector<8x32xf32>
    %88 = vector.extract_strided_slice %85 {offsets = [0, 64], sizes = [8, 32], strides = [1, 1]} : vector<8x128xf32> to vector<8x32xf32>
    %89 = vector.extract_strided_slice %84 {offsets = [0, 96], sizes = [8, 32], strides = [1, 1]} : vector<8x128xf32> to vector<8x32xf32>
    %90 = arith.mulf %87, %75 : vector<8x32xf32>
    %91 = arith.mulf %86, %88 : vector<8x32xf32>
    %92 = arith.addf %90, %91 : vector<8x32xf32>
    %93 = math.tanh %92 : vector<8x32xf32>
    %94 = arith.mulf %89, %93 : vector<8x32xf32>
    %cst_18 = arith.constant dense<0.000000e+00> : vector<8x128xf32>
    %95 = tpu.matmul %94, %24, %cst_18 {dimension_numbers = #tpu.dot_dimension_numbers<[1], [0], [0], [1], [0, 0, 1, 1], [], []>} : vector<8x32xf32>, vector<32x128xf32>, vector<8x128xf32> -> vector<8x128xf32>
    %96 = arith.addf %17, %95 : vector<8x128xf32>
    %97 = arith.negf %96 : vector<8x128xf32>
    %98 = math.exp %97 : vector<8x128xf32>
    %cst_19 = arith.constant 1.000000e+00 : f32
    %99 = vector.broadcast %cst_19 : f32 to vector<8x128xf32>
    %100 = arith.addf %99, %98 : vector<8x128xf32>
    %101 = arith.divf %99, %100 : vector<8x128xf32>
    %102 = math.tanh %96 : vector<8x128xf32>
    %103 = vector.extract_strided_slice %101 {offsets = [0, 0], sizes = [8, 32], strides = [1, 1]} : vector<8x128xf32> to vector<8x32xf32>
    %104 = vector.extract_strided_slice %101 {offsets = [0, 32], sizes = [8, 32], strides = [1, 1]} : vector<8x128xf32> to vector<8x32xf32>
    %105 = vector.extract_strided_slice %102 {offsets = [0, 64], sizes = [8, 32], strides = [1, 1]} : vector<8x128xf32> to vector<8x32xf32>
    %106 = vector.extract_strided_slice %101 {offsets = [0, 96], sizes = [8, 32], strides = [1, 1]} : vector<8x128xf32> to vector<8x32xf32>
    %107 = arith.mulf %104, %92 : vector<8x32xf32>
    %108 = arith.mulf %103, %105 : vector<8x32xf32>
    %109 = arith.addf %107, %108 : vector<8x32xf32>
    %110 = math.tanh %109 : vector<8x32xf32>
    %111 = arith.mulf %106, %110 : vector<8x32xf32>
    %cst_20 = arith.constant dense<0.000000e+00> : vector<8x128xf32>
    %112 = tpu.matmul %111, %24, %cst_20 {dimension_numbers = #tpu.dot_dimension_numbers<[1], [0], [0], [1], [0, 0, 1, 1], [], []>} : vector<8x32xf32>, vector<32x128xf32>, vector<8x128xf32> -> vector<8x128xf32>
    %113 = arith.addf %19, %112 : vector<8x128xf32>
    %114 = arith.negf %113 : vector<8x128xf32>
    %115 = math.exp %114 : vector<8x128xf32>
    %cst_21 = arith.constant 1.000000e+00 : f32
    %116 = vector.broadcast %cst_21 : f32 to vector<8x128xf32>
    %117 = arith.addf %116, %115 : vector<8x128xf32>
    %118 = arith.divf %116, %117 : vector<8x128xf32>
    %119 = math.tanh %113 : vector<8x128xf32>
    %120 = vector.extract_strided_slice %118 {offsets = [0, 0], sizes = [8, 32], strides = [1, 1]} : vector<8x128xf32> to vector<8x32xf32>
    %121 = vector.extract_strided_slice %118 {offsets = [0, 32], sizes = [8, 32], strides = [1, 1]} : vector<8x128xf32> to vector<8x32xf32>
    %122 = vector.extract_strided_slice %119 {offsets = [0, 64], sizes = [8, 32], strides = [1, 1]} : vector<8x128xf32> to vector<8x32xf32>
    %123 = vector.extract_strided_slice %118 {offsets = [0, 96], sizes = [8, 32], strides = [1, 1]} : vector<8x128xf32> to vector<8x32xf32>
    %124 = arith.mulf %121, %109 : vector<8x32xf32>
    %125 = arith.mulf %120, %122 : vector<8x32xf32>
    %126 = arith.addf %124, %125 : vector<8x32xf32>
    %127 = math.tanh %126 : vector<8x32xf32>
    %128 = arith.mulf %123, %127 : vector<8x32xf32>
    %cst_22 = arith.constant dense<0.000000e+00> : vector<8x128xf32>
    %129 = tpu.matmul %128, %24, %cst_22 {dimension_numbers = #tpu.dot_dimension_numbers<[1], [0], [0], [1], [0, 0, 1, 1], [], []>} : vector<8x32xf32>, vector<32x128xf32>, vector<8x128xf32> -> vector<8x128xf32>
    %130 = arith.addf %21, %129 : vector<8x128xf32>
    %131 = arith.negf %130 : vector<8x128xf32>
    %132 = math.exp %131 : vector<8x128xf32>
    %cst_23 = arith.constant 1.000000e+00 : f32
    %133 = vector.broadcast %cst_23 : f32 to vector<8x128xf32>
    %134 = arith.addf %133, %132 : vector<8x128xf32>
    %135 = arith.divf %133, %134 : vector<8x128xf32>
    %136 = math.tanh %130 : vector<8x128xf32>
    %137 = vector.extract_strided_slice %135 {offsets = [0, 0], sizes = [8, 32], strides = [1, 1]} : vector<8x128xf32> to vector<8x32xf32>
    %138 = vector.extract_strided_slice %135 {offsets = [0, 32], sizes = [8, 32], strides = [1, 1]} : vector<8x128xf32> to vector<8x32xf32>
    %139 = vector.extract_strided_slice %136 {offsets = [0, 64], sizes = [8, 32], strides = [1, 1]} : vector<8x128xf32> to vector<8x32xf32>
    %140 = vector.extract_strided_slice %135 {offsets = [0, 96], sizes = [8, 32], strides = [1, 1]} : vector<8x128xf32> to vector<8x32xf32>
    %141 = arith.mulf %138, %126 : vector<8x32xf32>
    %142 = arith.mulf %137, %139 : vector<8x32xf32>
    %143 = arith.addf %141, %142 : vector<8x32xf32>
    %144 = math.tanh %143 : vector<8x32xf32>
    %145 = arith.mulf %140, %144 : vector<8x32xf32>
    %cst_24 = arith.constant dense<0.000000e+00> : vector<8x128xf32>
    %146 = tpu.matmul %145, %24, %cst_24 {dimension_numbers = #tpu.dot_dimension_numbers<[1], [0], [0], [1], [0, 0, 1, 1], [], []>} : vector<8x32xf32>, vector<32x128xf32>, vector<8x128xf32> -> vector<8x128xf32>
    %147 = arith.addf %23, %146 : vector<8x128xf32>
    %148 = arith.negf %147 : vector<8x128xf32>
    %149 = math.exp %148 : vector<8x128xf32>
    %cst_25 = arith.constant 1.000000e+00 : f32
    %150 = vector.broadcast %cst_25 : f32 to vector<8x128xf32>
    %151 = arith.addf %150, %149 : vector<8x128xf32>
    %152 = arith.divf %150, %151 : vector<8x128xf32>
    %153 = math.tanh %147 : vector<8x128xf32>
    %154 = vector.extract_strided_slice %152 {offsets = [0, 0], sizes = [8, 32], strides = [1, 1]} : vector<8x128xf32> to vector<8x32xf32>
    %155 = vector.extract_strided_slice %152 {offsets = [0, 32], sizes = [8, 32], strides = [1, 1]} : vector<8x128xf32> to vector<8x32xf32>
    %156 = vector.extract_strided_slice %153 {offsets = [0, 64], sizes = [8, 32], strides = [1, 1]} : vector<8x128xf32> to vector<8x32xf32>
    %157 = vector.extract_strided_slice %152 {offsets = [0, 96], sizes = [8, 32], strides = [1, 1]} : vector<8x128xf32> to vector<8x32xf32>
    %158 = arith.mulf %155, %143 : vector<8x32xf32>
    %159 = arith.mulf %154, %156 : vector<8x32xf32>
    %160 = arith.addf %158, %159 : vector<8x32xf32>
    %161 = math.tanh %160 : vector<8x32xf32>
    %162 = arith.mulf %157, %161 : vector<8x32xf32>
    %163 = tpu.concatenate %43, %60, %77, %94, %111, %128, %145, %162 in 0 : vector<8x32xf32>, vector<8x32xf32>, vector<8x32xf32>, vector<8x32xf32>, vector<8x32xf32>, vector<8x32xf32>, vector<8x32xf32>, vector<8x32xf32> -> vector<64x32xf32>
    %c0_26 = arith.constant 0 : index
    %c0_27 = arith.constant 0 : index
    %164 = vector.load %arg4[%c0_26, %c0_27] : memref<32x256xf32, #tpu.memory_space<vmem>>, vector<32x256xf32>
    %cst_28 = arith.constant dense<0.000000e+00> : vector<64x256xf32>
    %165 = tpu.matmul %163, %164, %cst_28 {dimension_numbers = #tpu.dot_dimension_numbers<[1], [0], [0], [1], [0, 0, 1, 1], [], []>} : vector<64x32xf32>, vector<32x256xf32>, vector<64x256xf32> -> vector<64x256xf32>
    %c0_29 = arith.constant 0 : index
    %c0_30 = arith.constant 0 : index
    %166 = vector.load %arg6[%c0_29, %c0_30] : memref<1x256xf32, #tpu.memory_space<vmem>>, vector<1x256xf32>
    %167 = vector.broadcast %166 : vector<1x256xf32> to vector<64x256xf32>
    %168 = arith.addf %165, %167 : vector<64x256xf32>
    %169 = vector.extract_strided_slice %168 {offsets = [0, 0], sizes = [8, 256], strides = [1, 1]} : vector<64x256xf32> to vector<8x256xf32>
    %170 = vector.extract_strided_slice %168 {offsets = [8, 0], sizes = [8, 256], strides = [1, 1]} : vector<64x256xf32> to vector<8x256xf32>
    %171 = vector.extract_strided_slice %168 {offsets = [16, 0], sizes = [8, 256], strides = [1, 1]} : vector<64x256xf32> to vector<8x256xf32>
    %172 = vector.extract_strided_slice %168 {offsets = [24, 0], sizes = [8, 256], strides = [1, 1]} : vector<64x256xf32> to vector<8x256xf32>
    %173 = vector.extract_strided_slice %168 {offsets = [32, 0], sizes = [8, 256], strides = [1, 1]} : vector<64x256xf32> to vector<8x256xf32>
    %174 = vector.extract_strided_slice %168 {offsets = [40, 0], sizes = [8, 256], strides = [1, 1]} : vector<64x256xf32> to vector<8x256xf32>
    %175 = vector.extract_strided_slice %168 {offsets = [48, 0], sizes = [8, 256], strides = [1, 1]} : vector<64x256xf32> to vector<8x256xf32>
    %176 = vector.extract_strided_slice %168 {offsets = [56, 0], sizes = [8, 256], strides = [1, 1]} : vector<64x256xf32> to vector<8x256xf32>
    %c0_31 = arith.constant 0 : index
    %c0_32 = arith.constant 0 : index
    %177 = vector.load %arg5[%c0_31, %c0_32] : memref<64x256xf32, #tpu.memory_space<vmem>>, vector<64x256xf32>
    %cst_33 = arith.constant 0.000000e+00 : f32
    %178 = vector.broadcast %cst_33 : f32 to vector<8x64xf32>
    %cst_34 = arith.constant 0.000000e+00 : f32
    %179 = vector.broadcast %cst_34 : f32 to vector<8x64xf32>
    %cst_35 = arith.constant dense<0.000000e+00> : vector<8x256xf32>
    %180 = tpu.matmul %178, %177, %cst_35 {dimension_numbers = #tpu.dot_dimension_numbers<[1], [0], [0], [1], [0, 0, 1, 1], [], []>} : vector<8x64xf32>, vector<64x256xf32>, vector<8x256xf32> -> vector<8x256xf32>
    %181 = arith.addf %169, %180 : vector<8x256xf32>
    %182 = arith.negf %181 : vector<8x256xf32>
    %183 = math.exp %182 : vector<8x256xf32>
    %cst_36 = arith.constant 1.000000e+00 : f32
    %184 = vector.broadcast %cst_36 : f32 to vector<8x256xf32>
    %185 = arith.addf %184, %183 : vector<8x256xf32>
    %186 = arith.divf %184, %185 : vector<8x256xf32>
    %187 = math.tanh %181 : vector<8x256xf32>
    %188 = vector.extract_strided_slice %186 {offsets = [0, 0], sizes = [8, 64], strides = [1, 1]} : vector<8x256xf32> to vector<8x64xf32>
    %189 = vector.extract_strided_slice %186 {offsets = [0, 64], sizes = [8, 64], strides = [1, 1]} : vector<8x256xf32> to vector<8x64xf32>
    %190 = vector.extract_strided_slice %187 {offsets = [0, 128], sizes = [8, 64], strides = [1, 1]} : vector<8x256xf32> to vector<8x64xf32>
    %191 = vector.extract_strided_slice %186 {offsets = [0, 192], sizes = [8, 64], strides = [1, 1]} : vector<8x256xf32> to vector<8x64xf32>
    %192 = arith.mulf %189, %179 : vector<8x64xf32>
    %193 = arith.mulf %188, %190 : vector<8x64xf32>
    %194 = arith.addf %192, %193 : vector<8x64xf32>
    %195 = math.tanh %194 : vector<8x64xf32>
    %196 = arith.mulf %191, %195 : vector<8x64xf32>
    %cst_37 = arith.constant dense<0.000000e+00> : vector<8x256xf32>
    %197 = tpu.matmul %196, %177, %cst_37 {dimension_numbers = #tpu.dot_dimension_numbers<[1], [0], [0], [1], [0, 0, 1, 1], [], []>} : vector<8x64xf32>, vector<64x256xf32>, vector<8x256xf32> -> vector<8x256xf32>
    %198 = arith.addf %170, %197 : vector<8x256xf32>
    %199 = arith.negf %198 : vector<8x256xf32>
    %200 = math.exp %199 : vector<8x256xf32>
    %cst_38 = arith.constant 1.000000e+00 : f32
    %201 = vector.broadcast %cst_38 : f32 to vector<8x256xf32>
    %202 = arith.addf %201, %200 : vector<8x256xf32>
    %203 = arith.divf %201, %202 : vector<8x256xf32>
    %204 = math.tanh %198 : vector<8x256xf32>
    %205 = vector.extract_strided_slice %203 {offsets = [0, 0], sizes = [8, 64], strides = [1, 1]} : vector<8x256xf32> to vector<8x64xf32>
    %206 = vector.extract_strided_slice %203 {offsets = [0, 64], sizes = [8, 64], strides = [1, 1]} : vector<8x256xf32> to vector<8x64xf32>
    %207 = vector.extract_strided_slice %204 {offsets = [0, 128], sizes = [8, 64], strides = [1, 1]} : vector<8x256xf32> to vector<8x64xf32>
    %208 = vector.extract_strided_slice %203 {offsets = [0, 192], sizes = [8, 64], strides = [1, 1]} : vector<8x256xf32> to vector<8x64xf32>
    %209 = arith.mulf %206, %194 : vector<8x64xf32>
    %210 = arith.mulf %205, %207 : vector<8x64xf32>
    %211 = arith.addf %209, %210 : vector<8x64xf32>
    %212 = math.tanh %211 : vector<8x64xf32>
    %213 = arith.mulf %208, %212 : vector<8x64xf32>
    %cst_39 = arith.constant dense<0.000000e+00> : vector<8x256xf32>
    %214 = tpu.matmul %213, %177, %cst_39 {dimension_numbers = #tpu.dot_dimension_numbers<[1], [0], [0], [1], [0, 0, 1, 1], [], []>} : vector<8x64xf32>, vector<64x256xf32>, vector<8x256xf32> -> vector<8x256xf32>
    %215 = arith.addf %171, %214 : vector<8x256xf32>
    %216 = arith.negf %215 : vector<8x256xf32>
    %217 = math.exp %216 : vector<8x256xf32>
    %cst_40 = arith.constant 1.000000e+00 : f32
    %218 = vector.broadcast %cst_40 : f32 to vector<8x256xf32>
    %219 = arith.addf %218, %217 : vector<8x256xf32>
    %220 = arith.divf %218, %219 : vector<8x256xf32>
    %221 = math.tanh %215 : vector<8x256xf32>
    %222 = vector.extract_strided_slice %220 {offsets = [0, 0], sizes = [8, 64], strides = [1, 1]} : vector<8x256xf32> to vector<8x64xf32>
    %223 = vector.extract_strided_slice %220 {offsets = [0, 64], sizes = [8, 64], strides = [1, 1]} : vector<8x256xf32> to vector<8x64xf32>
    %224 = vector.extract_strided_slice %221 {offsets = [0, 128], sizes = [8, 64], strides = [1, 1]} : vector<8x256xf32> to vector<8x64xf32>
    %225 = vector.extract_strided_slice %220 {offsets = [0, 192], sizes = [8, 64], strides = [1, 1]} : vector<8x256xf32> to vector<8x64xf32>
    %226 = arith.mulf %223, %211 : vector<8x64xf32>
    %227 = arith.mulf %222, %224 : vector<8x64xf32>
    %228 = arith.addf %226, %227 : vector<8x64xf32>
    %229 = math.tanh %228 : vector<8x64xf32>
    %230 = arith.mulf %225, %229 : vector<8x64xf32>
    %cst_41 = arith.constant dense<0.000000e+00> : vector<8x256xf32>
    %231 = tpu.matmul %230, %177, %cst_41 {dimension_numbers = #tpu.dot_dimension_numbers<[1], [0], [0], [1], [0, 0, 1, 1], [], []>} : vector<8x64xf32>, vector<64x256xf32>, vector<8x256xf32> -> vector<8x256xf32>
    %232 = arith.addf %172, %231 : vector<8x256xf32>
    %233 = arith.negf %232 : vector<8x256xf32>
    %234 = math.exp %233 : vector<8x256xf32>
    %cst_42 = arith.constant 1.000000e+00 : f32
    %235 = vector.broadcast %cst_42 : f32 to vector<8x256xf32>
    %236 = arith.addf %235, %234 : vector<8x256xf32>
    %237 = arith.divf %235, %236 : vector<8x256xf32>
    %238 = math.tanh %232 : vector<8x256xf32>
    %239 = vector.extract_strided_slice %237 {offsets = [0, 0], sizes = [8, 64], strides = [1, 1]} : vector<8x256xf32> to vector<8x64xf32>
    %240 = vector.extract_strided_slice %237 {offsets = [0, 64], sizes = [8, 64], strides = [1, 1]} : vector<8x256xf32> to vector<8x64xf32>
    %241 = vector.extract_strided_slice %238 {offsets = [0, 128], sizes = [8, 64], strides = [1, 1]} : vector<8x256xf32> to vector<8x64xf32>
    %242 = vector.extract_strided_slice %237 {offsets = [0, 192], sizes = [8, 64], strides = [1, 1]} : vector<8x256xf32> to vector<8x64xf32>
    %243 = arith.mulf %240, %228 : vector<8x64xf32>
    %244 = arith.mulf %239, %241 : vector<8x64xf32>
    %245 = arith.addf %243, %244 : vector<8x64xf32>
    %246 = math.tanh %245 : vector<8x64xf32>
    %247 = arith.mulf %242, %246 : vector<8x64xf32>
    %cst_43 = arith.constant dense<0.000000e+00> : vector<8x256xf32>
    %248 = tpu.matmul %247, %177, %cst_43 {dimension_numbers = #tpu.dot_dimension_numbers<[1], [0], [0], [1], [0, 0, 1, 1], [], []>} : vector<8x64xf32>, vector<64x256xf32>, vector<8x256xf32> -> vector<8x256xf32>
    %249 = arith.addf %173, %248 : vector<8x256xf32>
    %250 = arith.negf %249 : vector<8x256xf32>
    %251 = math.exp %250 : vector<8x256xf32>
    %cst_44 = arith.constant 1.000000e+00 : f32
    %252 = vector.broadcast %cst_44 : f32 to vector<8x256xf32>
    %253 = arith.addf %252, %251 : vector<8x256xf32>
    %254 = arith.divf %252, %253 : vector<8x256xf32>
    %255 = math.tanh %249 : vector<8x256xf32>
    %256 = vector.extract_strided_slice %254 {offsets = [0, 0], sizes = [8, 64], strides = [1, 1]} : vector<8x256xf32> to vector<8x64xf32>
    %257 = vector.extract_strided_slice %254 {offsets = [0, 64], sizes = [8, 64], strides = [1, 1]} : vector<8x256xf32> to vector<8x64xf32>
    %258 = vector.extract_strided_slice %255 {offsets = [0, 128], sizes = [8, 64], strides = [1, 1]} : vector<8x256xf32> to vector<8x64xf32>
    %259 = vector.extract_strided_slice %254 {offsets = [0, 192], sizes = [8, 64], strides = [1, 1]} : vector<8x256xf32> to vector<8x64xf32>
    %260 = arith.mulf %257, %245 : vector<8x64xf32>
    %261 = arith.mulf %256, %258 : vector<8x64xf32>
    %262 = arith.addf %260, %261 : vector<8x64xf32>
    %263 = math.tanh %262 : vector<8x64xf32>
    %264 = arith.mulf %259, %263 : vector<8x64xf32>
    %cst_45 = arith.constant dense<0.000000e+00> : vector<8x256xf32>
    %265 = tpu.matmul %264, %177, %cst_45 {dimension_numbers = #tpu.dot_dimension_numbers<[1], [0], [0], [1], [0, 0, 1, 1], [], []>} : vector<8x64xf32>, vector<64x256xf32>, vector<8x256xf32> -> vector<8x256xf32>
    %266 = arith.addf %174, %265 : vector<8x256xf32>
    %267 = arith.negf %266 : vector<8x256xf32>
    %268 = math.exp %267 : vector<8x256xf32>
    %cst_46 = arith.constant 1.000000e+00 : f32
    %269 = vector.broadcast %cst_46 : f32 to vector<8x256xf32>
    %270 = arith.addf %269, %268 : vector<8x256xf32>
    %271 = arith.divf %269, %270 : vector<8x256xf32>
    %272 = math.tanh %266 : vector<8x256xf32>
    %273 = vector.extract_strided_slice %271 {offsets = [0, 0], sizes = [8, 64], strides = [1, 1]} : vector<8x256xf32> to vector<8x64xf32>
    %274 = vector.extract_strided_slice %271 {offsets = [0, 64], sizes = [8, 64], strides = [1, 1]} : vector<8x256xf32> to vector<8x64xf32>
    %275 = vector.extract_strided_slice %272 {offsets = [0, 128], sizes = [8, 64], strides = [1, 1]} : vector<8x256xf32> to vector<8x64xf32>
    %276 = vector.extract_strided_slice %271 {offsets = [0, 192], sizes = [8, 64], strides = [1, 1]} : vector<8x256xf32> to vector<8x64xf32>
    %277 = arith.mulf %274, %262 : vector<8x64xf32>
    %278 = arith.mulf %273, %275 : vector<8x64xf32>
    %279 = arith.addf %277, %278 : vector<8x64xf32>
    %280 = math.tanh %279 : vector<8x64xf32>
    %281 = arith.mulf %276, %280 : vector<8x64xf32>
    %cst_47 = arith.constant dense<0.000000e+00> : vector<8x256xf32>
    %282 = tpu.matmul %281, %177, %cst_47 {dimension_numbers = #tpu.dot_dimension_numbers<[1], [0], [0], [1], [0, 0, 1, 1], [], []>} : vector<8x64xf32>, vector<64x256xf32>, vector<8x256xf32> -> vector<8x256xf32>
    %283 = arith.addf %175, %282 : vector<8x256xf32>
    %284 = arith.negf %283 : vector<8x256xf32>
    %285 = math.exp %284 : vector<8x256xf32>
    %cst_48 = arith.constant 1.000000e+00 : f32
    %286 = vector.broadcast %cst_48 : f32 to vector<8x256xf32>
    %287 = arith.addf %286, %285 : vector<8x256xf32>
    %288 = arith.divf %286, %287 : vector<8x256xf32>
    %289 = math.tanh %283 : vector<8x256xf32>
    %290 = vector.extract_strided_slice %288 {offsets = [0, 0], sizes = [8, 64], strides = [1, 1]} : vector<8x256xf32> to vector<8x64xf32>
    %291 = vector.extract_strided_slice %288 {offsets = [0, 64], sizes = [8, 64], strides = [1, 1]} : vector<8x256xf32> to vector<8x64xf32>
    %292 = vector.extract_strided_slice %289 {offsets = [0, 128], sizes = [8, 64], strides = [1, 1]} : vector<8x256xf32> to vector<8x64xf32>
    %293 = vector.extract_strided_slice %288 {offsets = [0, 192], sizes = [8, 64], strides = [1, 1]} : vector<8x256xf32> to vector<8x64xf32>
    %294 = arith.mulf %291, %279 : vector<8x64xf32>
    %295 = arith.mulf %290, %292 : vector<8x64xf32>
    %296 = arith.addf %294, %295 : vector<8x64xf32>
    %297 = math.tanh %296 : vector<8x64xf32>
    %298 = arith.mulf %293, %297 : vector<8x64xf32>
    %cst_49 = arith.constant dense<0.000000e+00> : vector<8x256xf32>
    %299 = tpu.matmul %298, %177, %cst_49 {dimension_numbers = #tpu.dot_dimension_numbers<[1], [0], [0], [1], [0, 0, 1, 1], [], []>} : vector<8x64xf32>, vector<64x256xf32>, vector<8x256xf32> -> vector<8x256xf32>
    %300 = arith.addf %176, %299 : vector<8x256xf32>
    %301 = arith.negf %300 : vector<8x256xf32>
    %302 = math.exp %301 : vector<8x256xf32>
    %cst_50 = arith.constant 1.000000e+00 : f32
    %303 = vector.broadcast %cst_50 : f32 to vector<8x256xf32>
    %304 = arith.addf %303, %302 : vector<8x256xf32>
    %305 = arith.divf %303, %304 : vector<8x256xf32>
    %306 = math.tanh %300 : vector<8x256xf32>
    %307 = vector.extract_strided_slice %305 {offsets = [0, 0], sizes = [8, 64], strides = [1, 1]} : vector<8x256xf32> to vector<8x64xf32>
    %308 = vector.extract_strided_slice %305 {offsets = [0, 64], sizes = [8, 64], strides = [1, 1]} : vector<8x256xf32> to vector<8x64xf32>
    %309 = vector.extract_strided_slice %306 {offsets = [0, 128], sizes = [8, 64], strides = [1, 1]} : vector<8x256xf32> to vector<8x64xf32>
    %310 = vector.extract_strided_slice %305 {offsets = [0, 192], sizes = [8, 64], strides = [1, 1]} : vector<8x256xf32> to vector<8x64xf32>
    %311 = arith.mulf %308, %296 : vector<8x64xf32>
    %312 = arith.mulf %307, %309 : vector<8x64xf32>
    %313 = arith.addf %311, %312 : vector<8x64xf32>
    %314 = math.tanh %313 : vector<8x64xf32>
    %315 = arith.mulf %310, %314 : vector<8x64xf32>
    %316 = tpu.concatenate %196, %213, %230, %247, %264, %281, %298, %315 in 0 : vector<8x64xf32>, vector<8x64xf32>, vector<8x64xf32>, vector<8x64xf32>, vector<8x64xf32>, vector<8x64xf32>, vector<8x64xf32>, vector<8x64xf32> -> vector<64x64xf32>
    %c0_51 = arith.constant 0 : index
    %c0_52 = arith.constant 0 : index
    %317 = vector.load %arg7[%c0_51, %c0_52] : memref<64x128xf32, #tpu.memory_space<vmem>>, vector<64x128xf32>
    %cst_53 = arith.constant dense<0.000000e+00> : vector<64x128xf32>
    %318 = tpu.matmul %316, %317, %cst_53 {dimension_numbers = #tpu.dot_dimension_numbers<[1], [0], [0], [1], [0, 0, 1, 1], [], []>} : vector<64x64xf32>, vector<64x128xf32>, vector<64x128xf32> -> vector<64x128xf32>
    %c0_54 = arith.constant 0 : index
    %c0_55 = arith.constant 0 : index
    %319 = vector.load %arg9[%c0_54, %c0_55] : memref<1x128xf32, #tpu.memory_space<vmem>>, vector<1x128xf32>
    %320 = vector.broadcast %319 : vector<1x128xf32> to vector<64x128xf32>
    %321 = arith.addf %318, %320 : vector<64x128xf32>
    %322 = vector.extract_strided_slice %321 {offsets = [0, 0], sizes = [8, 128], strides = [1, 1]} : vector<64x128xf32> to vector<8x128xf32>
    %323 = vector.extract_strided_slice %321 {offsets = [8, 0], sizes = [8, 128], strides = [1, 1]} : vector<64x128xf32> to vector<8x128xf32>
    %324 = vector.extract_strided_slice %321 {offsets = [16, 0], sizes = [8, 128], strides = [1, 1]} : vector<64x128xf32> to vector<8x128xf32>
    %325 = vector.extract_strided_slice %321 {offsets = [24, 0], sizes = [8, 128], strides = [1, 1]} : vector<64x128xf32> to vector<8x128xf32>
    %326 = vector.extract_strided_slice %321 {offsets = [32, 0], sizes = [8, 128], strides = [1, 1]} : vector<64x128xf32> to vector<8x128xf32>
    %327 = vector.extract_strided_slice %321 {offsets = [40, 0], sizes = [8, 128], strides = [1, 1]} : vector<64x128xf32> to vector<8x128xf32>
    %328 = vector.extract_strided_slice %321 {offsets = [48, 0], sizes = [8, 128], strides = [1, 1]} : vector<64x128xf32> to vector<8x128xf32>
    %329 = vector.extract_strided_slice %321 {offsets = [56, 0], sizes = [8, 128], strides = [1, 1]} : vector<64x128xf32> to vector<8x128xf32>
    %c0_56 = arith.constant 0 : index
    %c0_57 = arith.constant 0 : index
    %330 = vector.load %arg8[%c0_56, %c0_57] : memref<32x128xf32, #tpu.memory_space<vmem>>, vector<32x128xf32>
    %cst_58 = arith.constant 0.000000e+00 : f32
    %331 = vector.broadcast %cst_58 : f32 to vector<8x32xf32>
    %cst_59 = arith.constant 0.000000e+00 : f32
    %332 = vector.broadcast %cst_59 : f32 to vector<8x32xf32>
    %cst_60 = arith.constant dense<0.000000e+00> : vector<8x128xf32>
    %333 = tpu.matmul %331, %330, %cst_60 {dimension_numbers = #tpu.dot_dimension_numbers<[1], [0], [0], [1], [0, 0, 1, 1], [], []>} : vector<8x32xf32>, vector<32x128xf32>, vector<8x128xf32> -> vector<8x128xf32>
    %334 = arith.addf %322, %333 : vector<8x128xf32>
    %335 = arith.negf %334 : vector<8x128xf32>
    %336 = math.exp %335 : vector<8x128xf32>
    %cst_61 = arith.constant 1.000000e+00 : f32
    %337 = vector.broadcast %cst_61 : f32 to vector<8x128xf32>
    %338 = arith.addf %337, %336 : vector<8x128xf32>
    %339 = arith.divf %337, %338 : vector<8x128xf32>
    %340 = math.tanh %334 : vector<8x128xf32>
    %341 = vector.extract_strided_slice %339 {offsets = [0, 0], sizes = [8, 32], strides = [1, 1]} : vector<8x128xf32> to vector<8x32xf32>
    %342 = vector.extract_strided_slice %339 {offsets = [0, 32], sizes = [8, 32], strides = [1, 1]} : vector<8x128xf32> to vector<8x32xf32>
    %343 = vector.extract_strided_slice %340 {offsets = [0, 64], sizes = [8, 32], strides = [1, 1]} : vector<8x128xf32> to vector<8x32xf32>
    %344 = vector.extract_strided_slice %339 {offsets = [0, 96], sizes = [8, 32], strides = [1, 1]} : vector<8x128xf32> to vector<8x32xf32>
    %345 = arith.mulf %342, %332 : vector<8x32xf32>
    %346 = arith.mulf %341, %343 : vector<8x32xf32>
    %347 = arith.addf %345, %346 : vector<8x32xf32>
    %348 = math.tanh %347 : vector<8x32xf32>
    %349 = arith.mulf %344, %348 : vector<8x32xf32>
    %cst_62 = arith.constant dense<0.000000e+00> : vector<8x128xf32>
    %350 = tpu.matmul %349, %330, %cst_62 {dimension_numbers = #tpu.dot_dimension_numbers<[1], [0], [0], [1], [0, 0, 1, 1], [], []>} : vector<8x32xf32>, vector<32x128xf32>, vector<8x128xf32> -> vector<8x128xf32>
    %351 = arith.addf %323, %350 : vector<8x128xf32>
    %352 = arith.negf %351 : vector<8x128xf32>
    %353 = math.exp %352 : vector<8x128xf32>
    %cst_63 = arith.constant 1.000000e+00 : f32
    %354 = vector.broadcast %cst_63 : f32 to vector<8x128xf32>
    %355 = arith.addf %354, %353 : vector<8x128xf32>
    %356 = arith.divf %354, %355 : vector<8x128xf32>
    %357 = math.tanh %351 : vector<8x128xf32>
    %358 = vector.extract_strided_slice %356 {offsets = [0, 0], sizes = [8, 32], strides = [1, 1]} : vector<8x128xf32> to vector<8x32xf32>
    %359 = vector.extract_strided_slice %356 {offsets = [0, 32], sizes = [8, 32], strides = [1, 1]} : vector<8x128xf32> to vector<8x32xf32>
    %360 = vector.extract_strided_slice %357 {offsets = [0, 64], sizes = [8, 32], strides = [1, 1]} : vector<8x128xf32> to vector<8x32xf32>
    %361 = vector.extract_strided_slice %356 {offsets = [0, 96], sizes = [8, 32], strides = [1, 1]} : vector<8x128xf32> to vector<8x32xf32>
    %362 = arith.mulf %359, %347 : vector<8x32xf32>
    %363 = arith.mulf %358, %360 : vector<8x32xf32>
    %364 = arith.addf %362, %363 : vector<8x32xf32>
    %365 = math.tanh %364 : vector<8x32xf32>
    %366 = arith.mulf %361, %365 : vector<8x32xf32>
    %cst_64 = arith.constant dense<0.000000e+00> : vector<8x128xf32>
    %367 = tpu.matmul %366, %330, %cst_64 {dimension_numbers = #tpu.dot_dimension_numbers<[1], [0], [0], [1], [0, 0, 1, 1], [], []>} : vector<8x32xf32>, vector<32x128xf32>, vector<8x128xf32> -> vector<8x128xf32>
    %368 = arith.addf %324, %367 : vector<8x128xf32>
    %369 = arith.negf %368 : vector<8x128xf32>
    %370 = math.exp %369 : vector<8x128xf32>
    %cst_65 = arith.constant 1.000000e+00 : f32
    %371 = vector.broadcast %cst_65 : f32 to vector<8x128xf32>
    %372 = arith.addf %371, %370 : vector<8x128xf32>
    %373 = arith.divf %371, %372 : vector<8x128xf32>
    %374 = math.tanh %368 : vector<8x128xf32>
    %375 = vector.extract_strided_slice %373 {offsets = [0, 0], sizes = [8, 32], strides = [1, 1]} : vector<8x128xf32> to vector<8x32xf32>
    %376 = vector.extract_strided_slice %373 {offsets = [0, 32], sizes = [8, 32], strides = [1, 1]} : vector<8x128xf32> to vector<8x32xf32>
    %377 = vector.extract_strided_slice %374 {offsets = [0, 64], sizes = [8, 32], strides = [1, 1]} : vector<8x128xf32> to vector<8x32xf32>
    %378 = vector.extract_strided_slice %373 {offsets = [0, 96], sizes = [8, 32], strides = [1, 1]} : vector<8x128xf32> to vector<8x32xf32>
    %379 = arith.mulf %376, %364 : vector<8x32xf32>
    %380 = arith.mulf %375, %377 : vector<8x32xf32>
    %381 = arith.addf %379, %380 : vector<8x32xf32>
    %382 = math.tanh %381 : vector<8x32xf32>
    %383 = arith.mulf %378, %382 : vector<8x32xf32>
    %cst_66 = arith.constant dense<0.000000e+00> : vector<8x128xf32>
    %384 = tpu.matmul %383, %330, %cst_66 {dimension_numbers = #tpu.dot_dimension_numbers<[1], [0], [0], [1], [0, 0, 1, 1], [], []>} : vector<8x32xf32>, vector<32x128xf32>, vector<8x128xf32> -> vector<8x128xf32>
    %385 = arith.addf %325, %384 : vector<8x128xf32>
    %386 = arith.negf %385 : vector<8x128xf32>
    %387 = math.exp %386 : vector<8x128xf32>
    %cst_67 = arith.constant 1.000000e+00 : f32
    %388 = vector.broadcast %cst_67 : f32 to vector<8x128xf32>
    %389 = arith.addf %388, %387 : vector<8x128xf32>
    %390 = arith.divf %388, %389 : vector<8x128xf32>
    %391 = math.tanh %385 : vector<8x128xf32>
    %392 = vector.extract_strided_slice %390 {offsets = [0, 0], sizes = [8, 32], strides = [1, 1]} : vector<8x128xf32> to vector<8x32xf32>
    %393 = vector.extract_strided_slice %390 {offsets = [0, 32], sizes = [8, 32], strides = [1, 1]} : vector<8x128xf32> to vector<8x32xf32>
    %394 = vector.extract_strided_slice %391 {offsets = [0, 64], sizes = [8, 32], strides = [1, 1]} : vector<8x128xf32> to vector<8x32xf32>
    %395 = vector.extract_strided_slice %390 {offsets = [0, 96], sizes = [8, 32], strides = [1, 1]} : vector<8x128xf32> to vector<8x32xf32>
    %396 = arith.mulf %393, %381 : vector<8x32xf32>
    %397 = arith.mulf %392, %394 : vector<8x32xf32>
    %398 = arith.addf %396, %397 : vector<8x32xf32>
    %399 = math.tanh %398 : vector<8x32xf32>
    %400 = arith.mulf %395, %399 : vector<8x32xf32>
    %cst_68 = arith.constant dense<0.000000e+00> : vector<8x128xf32>
    %401 = tpu.matmul %400, %330, %cst_68 {dimension_numbers = #tpu.dot_dimension_numbers<[1], [0], [0], [1], [0, 0, 1, 1], [], []>} : vector<8x32xf32>, vector<32x128xf32>, vector<8x128xf32> -> vector<8x128xf32>
    %402 = arith.addf %326, %401 : vector<8x128xf32>
    %403 = arith.negf %402 : vector<8x128xf32>
    %404 = math.exp %403 : vector<8x128xf32>
    %cst_69 = arith.constant 1.000000e+00 : f32
    %405 = vector.broadcast %cst_69 : f32 to vector<8x128xf32>
    %406 = arith.addf %405, %404 : vector<8x128xf32>
    %407 = arith.divf %405, %406 : vector<8x128xf32>
    %408 = math.tanh %402 : vector<8x128xf32>
    %409 = vector.extract_strided_slice %407 {offsets = [0, 0], sizes = [8, 32], strides = [1, 1]} : vector<8x128xf32> to vector<8x32xf32>
    %410 = vector.extract_strided_slice %407 {offsets = [0, 32], sizes = [8, 32], strides = [1, 1]} : vector<8x128xf32> to vector<8x32xf32>
    %411 = vector.extract_strided_slice %408 {offsets = [0, 64], sizes = [8, 32], strides = [1, 1]} : vector<8x128xf32> to vector<8x32xf32>
    %412 = vector.extract_strided_slice %407 {offsets = [0, 96], sizes = [8, 32], strides = [1, 1]} : vector<8x128xf32> to vector<8x32xf32>
    %413 = arith.mulf %410, %398 : vector<8x32xf32>
    %414 = arith.mulf %409, %411 : vector<8x32xf32>
    %415 = arith.addf %413, %414 : vector<8x32xf32>
    %416 = math.tanh %415 : vector<8x32xf32>
    %417 = arith.mulf %412, %416 : vector<8x32xf32>
    %cst_70 = arith.constant dense<0.000000e+00> : vector<8x128xf32>
    %418 = tpu.matmul %417, %330, %cst_70 {dimension_numbers = #tpu.dot_dimension_numbers<[1], [0], [0], [1], [0, 0, 1, 1], [], []>} : vector<8x32xf32>, vector<32x128xf32>, vector<8x128xf32> -> vector<8x128xf32>
    %419 = arith.addf %327, %418 : vector<8x128xf32>
    %420 = arith.negf %419 : vector<8x128xf32>
    %421 = math.exp %420 : vector<8x128xf32>
    %cst_71 = arith.constant 1.000000e+00 : f32
    %422 = vector.broadcast %cst_71 : f32 to vector<8x128xf32>
    %423 = arith.addf %422, %421 : vector<8x128xf32>
    %424 = arith.divf %422, %423 : vector<8x128xf32>
    %425 = math.tanh %419 : vector<8x128xf32>
    %426 = vector.extract_strided_slice %424 {offsets = [0, 0], sizes = [8, 32], strides = [1, 1]} : vector<8x128xf32> to vector<8x32xf32>
    %427 = vector.extract_strided_slice %424 {offsets = [0, 32], sizes = [8, 32], strides = [1, 1]} : vector<8x128xf32> to vector<8x32xf32>
    %428 = vector.extract_strided_slice %425 {offsets = [0, 64], sizes = [8, 32], strides = [1, 1]} : vector<8x128xf32> to vector<8x32xf32>
    %429 = vector.extract_strided_slice %424 {offsets = [0, 96], sizes = [8, 32], strides = [1, 1]} : vector<8x128xf32> to vector<8x32xf32>
    %430 = arith.mulf %427, %415 : vector<8x32xf32>
    %431 = arith.mulf %426, %428 : vector<8x32xf32>
    %432 = arith.addf %430, %431 : vector<8x32xf32>
    %433 = math.tanh %432 : vector<8x32xf32>
    %434 = arith.mulf %429, %433 : vector<8x32xf32>
    %cst_72 = arith.constant dense<0.000000e+00> : vector<8x128xf32>
    %435 = tpu.matmul %434, %330, %cst_72 {dimension_numbers = #tpu.dot_dimension_numbers<[1], [0], [0], [1], [0, 0, 1, 1], [], []>} : vector<8x32xf32>, vector<32x128xf32>, vector<8x128xf32> -> vector<8x128xf32>
    %436 = arith.addf %328, %435 : vector<8x128xf32>
    %437 = arith.negf %436 : vector<8x128xf32>
    %438 = math.exp %437 : vector<8x128xf32>
    %cst_73 = arith.constant 1.000000e+00 : f32
    %439 = vector.broadcast %cst_73 : f32 to vector<8x128xf32>
    %440 = arith.addf %439, %438 : vector<8x128xf32>
    %441 = arith.divf %439, %440 : vector<8x128xf32>
    %442 = math.tanh %436 : vector<8x128xf32>
    %443 = vector.extract_strided_slice %441 {offsets = [0, 0], sizes = [8, 32], strides = [1, 1]} : vector<8x128xf32> to vector<8x32xf32>
    %444 = vector.extract_strided_slice %441 {offsets = [0, 32], sizes = [8, 32], strides = [1, 1]} : vector<8x128xf32> to vector<8x32xf32>
    %445 = vector.extract_strided_slice %442 {offsets = [0, 64], sizes = [8, 32], strides = [1, 1]} : vector<8x128xf32> to vector<8x32xf32>
    %446 = vector.extract_strided_slice %441 {offsets = [0, 96], sizes = [8, 32], strides = [1, 1]} : vector<8x128xf32> to vector<8x32xf32>
    %447 = arith.mulf %444, %432 : vector<8x32xf32>
    %448 = arith.mulf %443, %445 : vector<8x32xf32>
    %449 = arith.addf %447, %448 : vector<8x32xf32>
    %450 = math.tanh %449 : vector<8x32xf32>
    %451 = arith.mulf %446, %450 : vector<8x32xf32>
    %cst_74 = arith.constant dense<0.000000e+00> : vector<8x128xf32>
    %452 = tpu.matmul %451, %330, %cst_74 {dimension_numbers = #tpu.dot_dimension_numbers<[1], [0], [0], [1], [0, 0, 1, 1], [], []>} : vector<8x32xf32>, vector<32x128xf32>, vector<8x128xf32> -> vector<8x128xf32>
    %453 = arith.addf %329, %452 : vector<8x128xf32>
    %454 = arith.negf %453 : vector<8x128xf32>
    %455 = math.exp %454 : vector<8x128xf32>
    %cst_75 = arith.constant 1.000000e+00 : f32
    %456 = vector.broadcast %cst_75 : f32 to vector<8x128xf32>
    %457 = arith.addf %456, %455 : vector<8x128xf32>
    %458 = arith.divf %456, %457 : vector<8x128xf32>
    %459 = math.tanh %453 : vector<8x128xf32>
    %460 = vector.extract_strided_slice %458 {offsets = [0, 0], sizes = [8, 32], strides = [1, 1]} : vector<8x128xf32> to vector<8x32xf32>
    %461 = vector.extract_strided_slice %458 {offsets = [0, 32], sizes = [8, 32], strides = [1, 1]} : vector<8x128xf32> to vector<8x32xf32>
    %462 = vector.extract_strided_slice %459 {offsets = [0, 64], sizes = [8, 32], strides = [1, 1]} : vector<8x128xf32> to vector<8x32xf32>
    %463 = vector.extract_strided_slice %458 {offsets = [0, 96], sizes = [8, 32], strides = [1, 1]} : vector<8x128xf32> to vector<8x32xf32>
    %464 = arith.mulf %461, %449 : vector<8x32xf32>
    %465 = arith.mulf %460, %462 : vector<8x32xf32>
    %466 = arith.addf %464, %465 : vector<8x32xf32>
    %467 = math.tanh %466 : vector<8x32xf32>
    %468 = arith.mulf %463, %467 : vector<8x32xf32>
    %469 = tpu.concatenate %349, %366, %383, %400, %417, %434, %451, %468 in 0 : vector<8x32xf32>, vector<8x32xf32>, vector<8x32xf32>, vector<8x32xf32>, vector<8x32xf32>, vector<8x32xf32>, vector<8x32xf32>, vector<8x32xf32> -> vector<64x32xf32>
    %c0_76 = arith.constant 0 : index
    %c0_77 = arith.constant 0 : index
    %470 = vector.load %arg10[%c0_76, %c0_77] : memref<32x64xf32, #tpu.memory_space<vmem>>, vector<32x64xf32>
    %cst_78 = arith.constant dense<0.000000e+00> : vector<64x64xf32>
    %471 = tpu.matmul %469, %470, %cst_78 {dimension_numbers = #tpu.dot_dimension_numbers<[1], [0], [0], [1], [0, 0, 1, 1], [], []>} : vector<64x32xf32>, vector<32x64xf32>, vector<64x64xf32> -> vector<64x64xf32>
    %c0_79 = arith.constant 0 : index
    %c0_80 = arith.constant 0 : index
    %472 = vector.load %arg12[%c0_79, %c0_80] : memref<1x64xf32, #tpu.memory_space<vmem>>, vector<1x64xf32>
    %473 = vector.broadcast %472 : vector<1x64xf32> to vector<64x64xf32>
    %474 = arith.addf %471, %473 : vector<64x64xf32>
    %475 = vector.extract_strided_slice %474 {offsets = [0, 0], sizes = [8, 64], strides = [1, 1]} : vector<64x64xf32> to vector<8x64xf32>
    %476 = vector.extract_strided_slice %474 {offsets = [8, 0], sizes = [8, 64], strides = [1, 1]} : vector<64x64xf32> to vector<8x64xf32>
    %477 = vector.extract_strided_slice %474 {offsets = [16, 0], sizes = [8, 64], strides = [1, 1]} : vector<64x64xf32> to vector<8x64xf32>
    %478 = vector.extract_strided_slice %474 {offsets = [24, 0], sizes = [8, 64], strides = [1, 1]} : vector<64x64xf32> to vector<8x64xf32>
    %479 = vector.extract_strided_slice %474 {offsets = [32, 0], sizes = [8, 64], strides = [1, 1]} : vector<64x64xf32> to vector<8x64xf32>
    %480 = vector.extract_strided_slice %474 {offsets = [40, 0], sizes = [8, 64], strides = [1, 1]} : vector<64x64xf32> to vector<8x64xf32>
    %481 = vector.extract_strided_slice %474 {offsets = [48, 0], sizes = [8, 64], strides = [1, 1]} : vector<64x64xf32> to vector<8x64xf32>
    %482 = vector.extract_strided_slice %474 {offsets = [56, 0], sizes = [8, 64], strides = [1, 1]} : vector<64x64xf32> to vector<8x64xf32>
    %c0_81 = arith.constant 0 : index
    %c0_82 = arith.constant 0 : index
    %483 = vector.load %arg11[%c0_81, %c0_82] : memref<16x64xf32, #tpu.memory_space<vmem>>, vector<16x64xf32>
    %cst_83 = arith.constant 0.000000e+00 : f32
    %484 = vector.broadcast %cst_83 : f32 to vector<8x16xf32>
    %cst_84 = arith.constant 0.000000e+00 : f32
    %485 = vector.broadcast %cst_84 : f32 to vector<8x16xf32>
    %cst_85 = arith.constant dense<0.000000e+00> : vector<8x64xf32>
    %486 = tpu.matmul %484, %483, %cst_85 {dimension_numbers = #tpu.dot_dimension_numbers<[1], [0], [0], [1], [0, 0, 1, 1], [], []>} : vector<8x16xf32>, vector<16x64xf32>, vector<8x64xf32> -> vector<8x64xf32>
    %487 = arith.addf %475, %486 : vector<8x64xf32>
    %488 = arith.negf %487 : vector<8x64xf32>
    %489 = math.exp %488 : vector<8x64xf32>
    %cst_86 = arith.constant 1.000000e+00 : f32
    %490 = vector.broadcast %cst_86 : f32 to vector<8x64xf32>
    %491 = arith.addf %490, %489 : vector<8x64xf32>
    %492 = arith.divf %490, %491 : vector<8x64xf32>
    %493 = math.tanh %487 : vector<8x64xf32>
    %494 = vector.extract_strided_slice %492 {offsets = [0, 0], sizes = [8, 16], strides = [1, 1]} : vector<8x64xf32> to vector<8x16xf32>
    %495 = vector.extract_strided_slice %492 {offsets = [0, 16], sizes = [8, 16], strides = [1, 1]} : vector<8x64xf32> to vector<8x16xf32>
    %496 = vector.extract_strided_slice %493 {offsets = [0, 32], sizes = [8, 16], strides = [1, 1]} : vector<8x64xf32> to vector<8x16xf32>
    %497 = vector.extract_strided_slice %492 {offsets = [0, 48], sizes = [8, 16], strides = [1, 1]} : vector<8x64xf32> to vector<8x16xf32>
    %498 = arith.mulf %495, %485 : vector<8x16xf32>
    %499 = arith.mulf %494, %496 : vector<8x16xf32>
    %500 = arith.addf %498, %499 : vector<8x16xf32>
    %501 = math.tanh %500 : vector<8x16xf32>
    %502 = arith.mulf %497, %501 : vector<8x16xf32>
    %cst_87 = arith.constant dense<0.000000e+00> : vector<8x64xf32>
    %503 = tpu.matmul %502, %483, %cst_87 {dimension_numbers = #tpu.dot_dimension_numbers<[1], [0], [0], [1], [0, 0, 1, 1], [], []>} : vector<8x16xf32>, vector<16x64xf32>, vector<8x64xf32> -> vector<8x64xf32>
    %504 = arith.addf %476, %503 : vector<8x64xf32>
    %505 = arith.negf %504 : vector<8x64xf32>
    %506 = math.exp %505 : vector<8x64xf32>
    %cst_88 = arith.constant 1.000000e+00 : f32
    %507 = vector.broadcast %cst_88 : f32 to vector<8x64xf32>
    %508 = arith.addf %507, %506 : vector<8x64xf32>
    %509 = arith.divf %507, %508 : vector<8x64xf32>
    %510 = math.tanh %504 : vector<8x64xf32>
    %511 = vector.extract_strided_slice %509 {offsets = [0, 0], sizes = [8, 16], strides = [1, 1]} : vector<8x64xf32> to vector<8x16xf32>
    %512 = vector.extract_strided_slice %509 {offsets = [0, 16], sizes = [8, 16], strides = [1, 1]} : vector<8x64xf32> to vector<8x16xf32>
    %513 = vector.extract_strided_slice %510 {offsets = [0, 32], sizes = [8, 16], strides = [1, 1]} : vector<8x64xf32> to vector<8x16xf32>
    %514 = vector.extract_strided_slice %509 {offsets = [0, 48], sizes = [8, 16], strides = [1, 1]} : vector<8x64xf32> to vector<8x16xf32>
    %515 = arith.mulf %512, %500 : vector<8x16xf32>
    %516 = arith.mulf %511, %513 : vector<8x16xf32>
    %517 = arith.addf %515, %516 : vector<8x16xf32>
    %518 = math.tanh %517 : vector<8x16xf32>
    %519 = arith.mulf %514, %518 : vector<8x16xf32>
    %cst_89 = arith.constant dense<0.000000e+00> : vector<8x64xf32>
    %520 = tpu.matmul %519, %483, %cst_89 {dimension_numbers = #tpu.dot_dimension_numbers<[1], [0], [0], [1], [0, 0, 1, 1], [], []>} : vector<8x16xf32>, vector<16x64xf32>, vector<8x64xf32> -> vector<8x64xf32>
    %521 = arith.addf %477, %520 : vector<8x64xf32>
    %522 = arith.negf %521 : vector<8x64xf32>
    %523 = math.exp %522 : vector<8x64xf32>
    %cst_90 = arith.constant 1.000000e+00 : f32
    %524 = vector.broadcast %cst_90 : f32 to vector<8x64xf32>
    %525 = arith.addf %524, %523 : vector<8x64xf32>
    %526 = arith.divf %524, %525 : vector<8x64xf32>
    %527 = math.tanh %521 : vector<8x64xf32>
    %528 = vector.extract_strided_slice %526 {offsets = [0, 0], sizes = [8, 16], strides = [1, 1]} : vector<8x64xf32> to vector<8x16xf32>
    %529 = vector.extract_strided_slice %526 {offsets = [0, 16], sizes = [8, 16], strides = [1, 1]} : vector<8x64xf32> to vector<8x16xf32>
    %530 = vector.extract_strided_slice %527 {offsets = [0, 32], sizes = [8, 16], strides = [1, 1]} : vector<8x64xf32> to vector<8x16xf32>
    %531 = vector.extract_strided_slice %526 {offsets = [0, 48], sizes = [8, 16], strides = [1, 1]} : vector<8x64xf32> to vector<8x16xf32>
    %532 = arith.mulf %529, %517 : vector<8x16xf32>
    %533 = arith.mulf %528, %530 : vector<8x16xf32>
    %534 = arith.addf %532, %533 : vector<8x16xf32>
    %535 = math.tanh %534 : vector<8x16xf32>
    %536 = arith.mulf %531, %535 : vector<8x16xf32>
    %cst_91 = arith.constant dense<0.000000e+00> : vector<8x64xf32>
    %537 = tpu.matmul %536, %483, %cst_91 {dimension_numbers = #tpu.dot_dimension_numbers<[1], [0], [0], [1], [0, 0, 1, 1], [], []>} : vector<8x16xf32>, vector<16x64xf32>, vector<8x64xf32> -> vector<8x64xf32>
    %538 = arith.addf %478, %537 : vector<8x64xf32>
    %539 = arith.negf %538 : vector<8x64xf32>
    %540 = math.exp %539 : vector<8x64xf32>
    %cst_92 = arith.constant 1.000000e+00 : f32
    %541 = vector.broadcast %cst_92 : f32 to vector<8x64xf32>
    %542 = arith.addf %541, %540 : vector<8x64xf32>
    %543 = arith.divf %541, %542 : vector<8x64xf32>
    %544 = math.tanh %538 : vector<8x64xf32>
    %545 = vector.extract_strided_slice %543 {offsets = [0, 0], sizes = [8, 16], strides = [1, 1]} : vector<8x64xf32> to vector<8x16xf32>
    %546 = vector.extract_strided_slice %543 {offsets = [0, 16], sizes = [8, 16], strides = [1, 1]} : vector<8x64xf32> to vector<8x16xf32>
    %547 = vector.extract_strided_slice %544 {offsets = [0, 32], sizes = [8, 16], strides = [1, 1]} : vector<8x64xf32> to vector<8x16xf32>
    %548 = vector.extract_strided_slice %543 {offsets = [0, 48], sizes = [8, 16], strides = [1, 1]} : vector<8x64xf32> to vector<8x16xf32>
    %549 = arith.mulf %546, %534 : vector<8x16xf32>
    %550 = arith.mulf %545, %547 : vector<8x16xf32>
    %551 = arith.addf %549, %550 : vector<8x16xf32>
    %552 = math.tanh %551 : vector<8x16xf32>
    %553 = arith.mulf %548, %552 : vector<8x16xf32>
    %cst_93 = arith.constant dense<0.000000e+00> : vector<8x64xf32>
    %554 = tpu.matmul %553, %483, %cst_93 {dimension_numbers = #tpu.dot_dimension_numbers<[1], [0], [0], [1], [0, 0, 1, 1], [], []>} : vector<8x16xf32>, vector<16x64xf32>, vector<8x64xf32> -> vector<8x64xf32>
    %555 = arith.addf %479, %554 : vector<8x64xf32>
    %556 = arith.negf %555 : vector<8x64xf32>
    %557 = math.exp %556 : vector<8x64xf32>
    %cst_94 = arith.constant 1.000000e+00 : f32
    %558 = vector.broadcast %cst_94 : f32 to vector<8x64xf32>
    %559 = arith.addf %558, %557 : vector<8x64xf32>
    %560 = arith.divf %558, %559 : vector<8x64xf32>
    %561 = math.tanh %555 : vector<8x64xf32>
    %562 = vector.extract_strided_slice %560 {offsets = [0, 0], sizes = [8, 16], strides = [1, 1]} : vector<8x64xf32> to vector<8x16xf32>
    %563 = vector.extract_strided_slice %560 {offsets = [0, 16], sizes = [8, 16], strides = [1, 1]} : vector<8x64xf32> to vector<8x16xf32>
    %564 = vector.extract_strided_slice %561 {offsets = [0, 32], sizes = [8, 16], strides = [1, 1]} : vector<8x64xf32> to vector<8x16xf32>
    %565 = vector.extract_strided_slice %560 {offsets = [0, 48], sizes = [8, 16], strides = [1, 1]} : vector<8x64xf32> to vector<8x16xf32>
    %566 = arith.mulf %563, %551 : vector<8x16xf32>
    %567 = arith.mulf %562, %564 : vector<8x16xf32>
    %568 = arith.addf %566, %567 : vector<8x16xf32>
    %569 = math.tanh %568 : vector<8x16xf32>
    %570 = arith.mulf %565, %569 : vector<8x16xf32>
    %cst_95 = arith.constant dense<0.000000e+00> : vector<8x64xf32>
    %571 = tpu.matmul %570, %483, %cst_95 {dimension_numbers = #tpu.dot_dimension_numbers<[1], [0], [0], [1], [0, 0, 1, 1], [], []>} : vector<8x16xf32>, vector<16x64xf32>, vector<8x64xf32> -> vector<8x64xf32>
    %572 = arith.addf %480, %571 : vector<8x64xf32>
    %573 = arith.negf %572 : vector<8x64xf32>
    %574 = math.exp %573 : vector<8x64xf32>
    %cst_96 = arith.constant 1.000000e+00 : f32
    %575 = vector.broadcast %cst_96 : f32 to vector<8x64xf32>
    %576 = arith.addf %575, %574 : vector<8x64xf32>
    %577 = arith.divf %575, %576 : vector<8x64xf32>
    %578 = math.tanh %572 : vector<8x64xf32>
    %579 = vector.extract_strided_slice %577 {offsets = [0, 0], sizes = [8, 16], strides = [1, 1]} : vector<8x64xf32> to vector<8x16xf32>
    %580 = vector.extract_strided_slice %577 {offsets = [0, 16], sizes = [8, 16], strides = [1, 1]} : vector<8x64xf32> to vector<8x16xf32>
    %581 = vector.extract_strided_slice %578 {offsets = [0, 32], sizes = [8, 16], strides = [1, 1]} : vector<8x64xf32> to vector<8x16xf32>
    %582 = vector.extract_strided_slice %577 {offsets = [0, 48], sizes = [8, 16], strides = [1, 1]} : vector<8x64xf32> to vector<8x16xf32>
    %583 = arith.mulf %580, %568 : vector<8x16xf32>
    %584 = arith.mulf %579, %581 : vector<8x16xf32>
    %585 = arith.addf %583, %584 : vector<8x16xf32>
    %586 = math.tanh %585 : vector<8x16xf32>
    %587 = arith.mulf %582, %586 : vector<8x16xf32>
    %cst_97 = arith.constant dense<0.000000e+00> : vector<8x64xf32>
    %588 = tpu.matmul %587, %483, %cst_97 {dimension_numbers = #tpu.dot_dimension_numbers<[1], [0], [0], [1], [0, 0, 1, 1], [], []>} : vector<8x16xf32>, vector<16x64xf32>, vector<8x64xf32> -> vector<8x64xf32>
    %589 = arith.addf %481, %588 : vector<8x64xf32>
    %590 = arith.negf %589 : vector<8x64xf32>
    %591 = math.exp %590 : vector<8x64xf32>
    %cst_98 = arith.constant 1.000000e+00 : f32
    %592 = vector.broadcast %cst_98 : f32 to vector<8x64xf32>
    %593 = arith.addf %592, %591 : vector<8x64xf32>
    %594 = arith.divf %592, %593 : vector<8x64xf32>
    %595 = math.tanh %589 : vector<8x64xf32>
    %596 = vector.extract_strided_slice %594 {offsets = [0, 0], sizes = [8, 16], strides = [1, 1]} : vector<8x64xf32> to vector<8x16xf32>
    %597 = vector.extract_strided_slice %594 {offsets = [0, 16], sizes = [8, 16], strides = [1, 1]} : vector<8x64xf32> to vector<8x16xf32>
    %598 = vector.extract_strided_slice %595 {offsets = [0, 32], sizes = [8, 16], strides = [1, 1]} : vector<8x64xf32> to vector<8x16xf32>
    %599 = vector.extract_strided_slice %594 {offsets = [0, 48], sizes = [8, 16], strides = [1, 1]} : vector<8x64xf32> to vector<8x16xf32>
    %600 = arith.mulf %597, %585 : vector<8x16xf32>
    %601 = arith.mulf %596, %598 : vector<8x16xf32>
    %602 = arith.addf %600, %601 : vector<8x16xf32>
    %603 = math.tanh %602 : vector<8x16xf32>
    %604 = arith.mulf %599, %603 : vector<8x16xf32>
    %cst_99 = arith.constant dense<0.000000e+00> : vector<8x64xf32>
    %605 = tpu.matmul %604, %483, %cst_99 {dimension_numbers = #tpu.dot_dimension_numbers<[1], [0], [0], [1], [0, 0, 1, 1], [], []>} : vector<8x16xf32>, vector<16x64xf32>, vector<8x64xf32> -> vector<8x64xf32>
    %606 = arith.addf %482, %605 : vector<8x64xf32>
    %607 = arith.negf %606 : vector<8x64xf32>
    %608 = math.exp %607 : vector<8x64xf32>
    %cst_100 = arith.constant 1.000000e+00 : f32
    %609 = vector.broadcast %cst_100 : f32 to vector<8x64xf32>
    %610 = arith.addf %609, %608 : vector<8x64xf32>
    %611 = arith.divf %609, %610 : vector<8x64xf32>
    %612 = math.tanh %606 : vector<8x64xf32>
    %613 = vector.extract_strided_slice %611 {offsets = [0, 0], sizes = [8, 16], strides = [1, 1]} : vector<8x64xf32> to vector<8x16xf32>
    %614 = vector.extract_strided_slice %611 {offsets = [0, 16], sizes = [8, 16], strides = [1, 1]} : vector<8x64xf32> to vector<8x16xf32>
    %615 = vector.extract_strided_slice %612 {offsets = [0, 32], sizes = [8, 16], strides = [1, 1]} : vector<8x64xf32> to vector<8x16xf32>
    %616 = vector.extract_strided_slice %611 {offsets = [0, 48], sizes = [8, 16], strides = [1, 1]} : vector<8x64xf32> to vector<8x16xf32>
    %617 = arith.mulf %614, %602 : vector<8x16xf32>
    %618 = arith.mulf %613, %615 : vector<8x16xf32>
    %619 = arith.addf %617, %618 : vector<8x16xf32>
    %620 = math.tanh %619 : vector<8x16xf32>
    %621 = arith.mulf %616, %620 : vector<8x16xf32>
    %cst_101 = arith.constant 0.000000e+00 : f32
    %622 = vector.broadcast %cst_101 : f32 to vector<8x16xf32>
    %623 = arith.maximumf %621, %622 : vector<8x16xf32>
    %c0_102 = arith.constant 0 : index
    %c0_103 = arith.constant 0 : index
    %624 = vector.load %arg13[%c0_102, %c0_103] : memref<16x4xf32, #tpu.memory_space<vmem>>, vector<16x4xf32>
    %cst_104 = arith.constant dense<0.000000e+00> : vector<8x4xf32>
    %625 = tpu.matmul %623, %624, %cst_104 {dimension_numbers = #tpu.dot_dimension_numbers<[1], [0], [0], [1], [0, 0, 1, 1], [], []>} : vector<8x16xf32>, vector<16x4xf32>, vector<8x4xf32> -> vector<8x4xf32>
    %c0_105 = arith.constant 0 : index
    %c0_106 = arith.constant 0 : index
    %626 = vector.load %arg14[%c0_105, %c0_106] : memref<1x4xf32, #tpu.memory_space<vmem>>, vector<1x4xf32>
    %627 = vector.broadcast %626 : vector<1x4xf32> to vector<8x4xf32>
    %628 = arith.addf %625, %627 : vector<8x4xf32>
    %c0_107 = arith.constant 0 : index
    %c0_108 = arith.constant 0 : index
    %629 = vector.load %arg15[%c0_107, %c0_108] : memref<8x4xf32, #tpu.memory_space<vmem>>, vector<8x4xf32>
    tpu.vector_store %arg15[%c0_107, %c0_108], %628 {strides = array<i32>} : memref<8x4xf32, #tpu.memory_space<vmem>>, vector<8x4xf32>,
    return
  }
}

</mosaic_0001>

<bundles_post_ra>
// kernel: only_lstm_forward.1
= control target key start
LH: loop header
LB: loop body
LE: loop exit
PB: predicated region body
PF: predicated region fallthrough
CT: control target
= control target key end

     0   :  { %20 = vsyncpa [#allocation3], 0  ;;  %s9550_s0 = inlined_call_operand.vmem [shape: f32[8,8,4], index: 0, kind: input, shape index: {}]   ;;  %s9551_s1 = inlined_call_operand.hbm [shape: f32[4,128], index: 1, kind: input, shape index: {}]   ;;  %s9552_s2 = inlined_call_operand.vmem [shape: f32[32,128], index: 2, kind: input, shape index: {}]   ;;  %s9553_s3 = inlined_call_operand.hbm [shape: f32[1,128], index: 3, kind: input, shape index: {}]   ;;  %s9554_s4 = inlined_call_operand.hbm [shape: f32[32,256], index: 4, kind: input, shape index: {}]   ;;  %s9555_s5 = inlined_call_operand.vmem [shape: f32[64,256], index: 5, kind: input, shape index: {}]   ;;  %s9556_s6 = inlined_call_operand.vmem [shape: f32[1,256], index: 6, kind: input, shape index: {}]   ;;  %s9557_s7 = inlined_call_operand.hbm [shape: f32[64,128], index: 7, kind: input, shape index: {}]   ;;  %s9558_s8 = inlined_call_operand.hbm [shape: f32[32,128], index: 8, kind: input, shape index: {}]   ;;  %s9559_s9 = inlined_call_operand.hbm [shape: f32[1,128], index: 9, kind: input, shape index: {}]   ;;  %s9560_s10 = inlined_call_operand.hbm [shape: f32[32,64], index: 10, kind: input, shape index: {}]   ;;  %s9561_s11 = inlined_call_operand.hbm [shape: f32[16,64], index: 11, kind: input, shape index: {}]   ;;  %s9562_s12 = inlined_call_operand.hbm [shape: f32[1,64], index: 12, kind: input, shape index: {}]   ;;  %s9563_s13 = inlined_call_operand.vmem [shape: f32[16,4], index: 13, kind: input, shape index: {}]   ;;  %s9564_s14 = inlined_call_operand.hbm [shape: f32[1,4], index: 14, kind: input, shape index: {}]   ;;  %s9565_s15 = inlined_call_operand.vmem [shape: f32[8,4], index: 15, kind: output, shape index: {}]  }
   0x1   :  { %21 = vsyncpa [#allocation5], 0 }
   0x2   :  { %22 = vsyncpa [#allocation8], 0 }
   0x3   :  { %23 = vsyncpa [#allocation11], 0 }
   0x4   :  { %24 = vsyncpa [#allocation14], 0 }
   0x5   :  { %25 = vsyncpa [#allocation17], 0  ;;  %s7804_s18 = smov [#allocation4]   ;;  %s7805_s20 = smov [#allocation7]  }
   0x6   :  { %s46_s19 = sshll.u32 %s7804_s18, 4  ;;  %s71_s21 = sshll.u32 %s7805_s20, 4  ;;  %s47_s19 = int_to_ptr.vmem [resolvable:$true] %s46_s19  ;;  %s7905_s21 = int_to_ptr.vmem [resolvable:$true] %s71_s21 }
   0x7   :  { %s7572_s24 = scalar_lea.hbm %s9553_s3, 16 }
   0x8   :  { %p7573_p0 = scmp.ne.s32.totalorder %s9553_s3, %s7572_s24  ;;  %p7576_p1 = scmp.lt.u32.totalorder %s7572_s24, %s9553_s3 }
   0xa   :  { %p7578_p2 = pnand %p7576_p1, %p7573_p0 }
   0xc   :  { %7581 = shalt.err (!%p7578_p2)
}
   0xd   :  { %s7582_s29 = scalar_lea.vmem %s47_s19, 16  ;;  %s7586_s30 = scalar_lea.vmem %s47_s19, 32 }
   0xe   :  { %p7583_p3 = scmp.ne.s32.totalorder %s47_s19, %s7582_s29  ;;  %p7587_p4 = scmp.lt.s32.totalorder %s47_s19, %s47_s19 }
   0xf   :  { %p7588_p5 = scmp.lt.s32.totalorder %s7586_s30, %s7582_s29 }
  0x11   :  { %p7589_p6 = por %p7588_p5, %p7587_p4 }
  0x13   :  { %p7590_p7 = pnand %p7589_p6, %p7583_p3 }
  0x15   :  { %7593 = shalt.err (!%p7590_p7)
}
  0x16   :  { %49 = dma.hbm_to_vmem [thread:$0]  %s9553_s3, 16, %s47_s19, [#allocation5]  }
  0x17   :  { %s7594_s22 = scalar_lea.hbm %s9557_s7, 1024 }
  0x18   :  { %p7595_p8 = scmp.ne.s32.totalorder %s9557_s7, %s7594_s22  ;;  %p7598_p9 = scmp.lt.u32.totalorder %s7594_s22, %s9557_s7 }
  0x1a   :  { %p7600_p10 = pnand %p7598_p9, %p7595_p8 }
  0x1c   :  { %7603 = shalt.err (!%p7600_p10)
}
  0x1d   :  { %s7604_s27 = scalar_lea.vmem %s7905_s21, 1024  ;;  %p7609_p12 = scmp.lt.s32.totalorder %s7905_s21, %s7905_s21 }
  0x1e   :  { %p7605_p11 = scmp.ne.s32.totalorder %s7905_s21, %s7604_s27  ;;  %p7610_p13 = scmp.lt.s32.totalorder %s7604_s27, %s7604_s27 }
  0x20   :  { %p7611_p0 = por %p7610_p13, %p7609_p12 }
  0x22   :  { %p7612_p1 = pnand %p7611_p0, %p7605_p11 }
  0x24   :  { %7615 = shalt.err (!%p7612_p1)
}
  0x25   :  { %s7806_s3 = smov 128   ;;  %s7807_s19 = smov 8  }
  0x26   :  { %77 = dma.hbm_to_vmem [thread:$0]  %s9557_s7, 1024, %s7905_s21, [#allocation8], %s7806_s3, %s7806_s3, %s7807_s19  }
  0x27   :  { %s7808_s30 = smov [#allocation10]   ;;  %s7809_s17 = smov [#allocation13]  }
  0x28   :  { %s96_s16 = sshll.u32 %s7808_s30, 4  ;;  %s117_s18 = sshll.u32 %s7809_s17, 4  ;;  %s97_s16 = int_to_ptr.vmem [resolvable:$true] %s96_s16  ;;  %s7939_s18 = int_to_ptr.vmem [resolvable:$true] %s117_s18 }
  0x29   :  { %s7616_s23 = scalar_lea.hbm %s9559_s9, 16 }
  0x2a   :  { %p7617_p2 = scmp.ne.s32.totalorder %s9559_s9, %s7616_s23  ;;  %p7620_p3 = scmp.lt.u32.totalorder %s7616_s23, %s9559_s9 }
  0x2c   :  { %p7622_p4 = pnand %p7620_p3, %p7617_p2 }
  0x2e   :  { %7625 = shalt.err (!%p7622_p4)
}
  0x2f   :  { %s7626_s7 = scalar_lea.vmem %s97_s16, 16  ;;  %s7630_s21 = scalar_lea.vmem %s97_s16, 32 }
  0x30   :  { %p7627_p5 = scmp.ne.s32.totalorder %s97_s16, %s7626_s7  ;;  %p7631_p6 = scmp.lt.s32.totalorder %s97_s16, %s97_s16 }
  0x31   :  { %p7632_p7 = scmp.lt.s32.totalorder %s7630_s21, %s7626_s7 }
  0x33   :  { %p7633_p8 = por %p7632_p7, %p7631_p6 }
  0x35   :  { %p7634_p9 = pnand %p7633_p8, %p7627_p5 }
  0x37   :  { %7637 = shalt.err (!%p7634_p9)
}
  0x38   :  { %99 = dma.hbm_to_vmem [thread:$0]  %s9559_s9, 16, %s97_s16, [#allocation11]  }
  0x39   :  { %s7638_s20 = scalar_lea.hbm %s9561_s11, 256 }
  0x3a   :  { %p7639_p10 = scmp.ne.s32.totalorder %s9561_s11, %s7638_s20  ;;  %p7642_p11 = scmp.lt.u32.totalorder %s7638_s20, %s9561_s11 }
  0x3c   :  { %p7644_p12 = pnand %p7642_p11, %p7639_p10 }
  0x3e   :  { %7647 = shalt.err (!%p7644_p12)
}
  0x3f   :  { %s7648_s26 = scalar_lea.vmem %s7939_s18, 256  ;;  %p7653_p0 = scmp.lt.s32.totalorder %s7939_s18, %s7939_s18 }
  0x40   :  { %p7649_p13 = scmp.ne.s32.totalorder %s7939_s18, %s7648_s26  ;;  %p7654_p1 = scmp.lt.s32.totalorder %s7648_s26, %s7648_s26 }
  0x42   :  { %p7655_p2 = por %p7654_p1, %p7653_p0 }
  0x44   :  { %p7656_p3 = pnand %p7655_p2, %p7649_p13 }
  0x46   :  { %7659 = shalt.err (!%p7656_p3)
}
  0x47   :  { %123 = dma.hbm_to_vmem [thread:$0]  %s9561_s11, 256, %s7939_s18, [#allocation14], %s7806_s3, %s7806_s3, %s7807_s19  }
  0x48   :  { %s7810_s27 = smov [#allocation2]   ;;  %s7811_s21 = smov [#allocation6]  }
  0x49   :  { %s34_s7 = sshll.u32 %s7810_s27, 4  ;;  %s55_s28 = sshll.u32 %s7811_s21, 4  ;;  %s35_s7 = int_to_ptr.vmem [resolvable:$true] %s34_s7  ;;  %s7973_s28 = int_to_ptr.vmem [resolvable:$true] %s55_s28 }
  0x4a   :  { %s7660_s17 = scalar_lea.hbm %s9551_s1, 64 }
  0x4b   :  { %p7661_p4 = scmp.ne.s32.totalorder %s9551_s1, %s7660_s17  ;;  %p7664_p5 = scmp.lt.u32.totalorder %s7660_s17, %s9551_s1 }
  0x4d   :  { %p7666_p6 = pnand %p7664_p5, %p7661_p4 }
  0x4f   :  { %7669 = shalt.err (!%p7666_p6)
}
  0x50   :  { %s7670_s11 = scalar_lea.vmem %s35_s7, 64  ;;  %p7675_p8 = scmp.lt.s32.totalorder %s35_s7, %s35_s7 }
  0x51   :  { %p7671_p7 = scmp.ne.s32.totalorder %s35_s7, %s7670_s11  ;;  %p7676_p9 = scmp.lt.s32.totalorder %s7670_s11, %s7670_s11 }
  0x53   :  { %p7677_p10 = por %p7676_p9, %p7675_p8 }
  0x55   :  { %p7678_p11 = pnand %p7677_p10, %p7671_p7 }
  0x57   :  { %7681 = shalt.err (!%p7678_p11)
}
  0x58   :  { %37 = dma.hbm_to_vmem [thread:$0]  %s9551_s1, 64, %s35_s7, [#allocation3]  }
  0x59   :  { %s7682_s16 = scalar_lea.hbm %s9554_s4, 1024 }
  0x5a   :  { %p7683_p12 = scmp.ne.s32.totalorder %s9554_s4, %s7682_s16  ;;  %p7686_p13 = scmp.lt.u32.totalorder %s7682_s16, %s9554_s4 }
  0x5c   :  { %p7688_p0 = pnand %p7686_p13, %p7683_p12 }
  0x5e   :  { %7691 = shalt.err (!%p7688_p0)
}
  0x5f   :  { %s7692_s17 = scalar_lea.vmem %s7973_s28, 1024  ;;  %p7697_p2 = scmp.lt.s32.totalorder %s7973_s28, %s7973_s28 }
  0x60   :  { %p7693_p1 = scmp.ne.s32.totalorder %s7973_s28, %s7692_s17  ;;  %p7698_p3 = scmp.lt.s32.totalorder %s7692_s17, %s7692_s17 }
  0x62   :  { %p7699_p4 = por %p7698_p3, %p7697_p2 }
  0x64   :  { %p7700_p5 = pnand %p7699_p4, %p7693_p1 }
  0x66   :  { %7703 = shalt.err (!%p7700_p5)
}
  0x67   :  { %s7812_s1 = smov 256   ;;  %s7813_s7 = smov 16  }
  0x68   :  { %61 = dma.hbm_to_vmem [thread:$0]  %s9554_s4, 1024, %s7973_s28, [#allocation5], %s7812_s1, %s7812_s1, %s7813_s7  }
  0x69   :  { %s7814_s23 = smov [#allocation9]   ;;  %s7815_s11 = smov [#allocation12]  }
  0x6a   :  { %s83_s24 = sshll.u32 %s7814_s23, 4  ;;  %s105_s18 = sshll.u32 %s7815_s11, 4  ;;  %s84_s24 = int_to_ptr.vmem [resolvable:$true] %s83_s24  ;;  %s8005_s18 = int_to_ptr.vmem [resolvable:$true] %s105_s18 }
  0x6b   :  { %s7704_s9 = scalar_lea.hbm %s9558_s8, 512 }
  0x6c   :  { %p7705_p6 = scmp.ne.s32.totalorder %s9558_s8, %s7704_s9  ;;  %p7708_p7 = scmp.lt.u32.totalorder %s7704_s9, %s9558_s8 }
  0x6e   :  { %p7710_p8 = pnand %p7708_p7, %p7705_p6 }
  0x70   :  { %7713 = shalt.err (!%p7710_p8)
}
  0x71   :  { %s7714_s4 = scalar_lea.vmem %s84_s24, 512  ;;  %p7719_p10 = scmp.lt.s32.totalorder %s84_s24, %s84_s24 }
  0x72   :  { %p7715_p9 = scmp.ne.s32.totalorder %s84_s24, %s7714_s4  ;;  %p7720_p11 = scmp.lt.s32.totalorder %s7714_s4, %s7714_s4 }
  0x74   :  { %p7721_p12 = por %p7720_p11, %p7719_p10 }
  0x76   :  { %p7722_p13 = pnand %p7721_p12, %p7715_p9 }
  0x78   :  { %7725 = shalt.err (!%p7722_p13)
}
  0x79   :  { %89 = dma.hbm_to_vmem [thread:$0]  %s9558_s8, 512, %s84_s24, [#allocation8], %s7806_s3, %s7806_s3, %s7807_s19  }
  0x7a   :  { %s7726_s20 = scalar_lea.hbm %s9560_s10, 512 }
  0x7b   :  { %p7727_p0 = scmp.ne.s32.totalorder %s9560_s10, %s7726_s20  ;;  %p7730_p1 = scmp.lt.u32.totalorder %s7726_s20, %s9560_s10 }
  0x7d   :  { %p7732_p2 = pnand %p7730_p1, %p7727_p0 }
  0x7f   :  { %7735 = shalt.err (!%p7732_p2)
}
  0x80   :  { %s7736_s26 = scalar_lea.vmem %s8005_s18, 512  ;;  %p7741_p4 = scmp.lt.s32.totalorder %s8005_s18, %s8005_s18 }
  0x81   :  { %p7737_p3 = scmp.ne.s32.totalorder %s8005_s18, %s7736_s26  ;;  %p7742_p5 = scmp.lt.s32.totalorder %s7736_s26, %s7736_s26 }
  0x83   :  { %p7743_p6 = por %p7742_p5, %p7741_p4 }
  0x85   :  { %p7744_p7 = pnand %p7743_p6, %p7737_p3 }
  0x87   :  { %7747 = shalt.err (!%p7744_p7)
}
  0x88   :  { %111 = dma.hbm_to_vmem [thread:$0]  %s9560_s10, 512, %s8005_s18, [#allocation11], %s7806_s3, %s7806_s3, %s7807_s19  }
  0x89   :  { %s7816_s9 = smov [#allocation15]   ;;  %s7817_s27 = smov [#allocation16]  }
  0x8a   :  { %s130_s16 = sshll.u32 %s7816_s9, 4  ;;  %s142_s21 = sshll.u32 %s7817_s27, 4  ;;  %s131_s16 = int_to_ptr.vmem [resolvable:$true] %s130_s16  ;;  %s143_s21 = int_to_ptr.vmem [resolvable:$true] %s142_s21 }
  0x8b   :  { %s7748_s28 = scalar_lea.hbm %s9562_s12, 16 }
  0x8c   :  { %p7749_p8 = scmp.ne.s32.totalorder %s9562_s12, %s7748_s28  ;;  %p7752_p9 = scmp.lt.u32.totalorder %s7748_s28, %s9562_s12 }
  0x8e   :  { %p7754_p10 = pnand %p7752_p9, %p7749_p8 }
  0x90   :  { %7757 = shalt.err (!%p7754_p10)
}
  0x91   :  { %s7758_s10 = scalar_lea.vmem %s131_s16, 16  ;;  %s7762_s3 = scalar_lea.vmem %s131_s16, 32 }
  0x92   :  { %p7759_p11 = scmp.ne.s32.totalorder %s131_s16, %s7758_s10  ;;  %p7763_p12 = scmp.lt.s32.totalorder %s131_s16, %s131_s16 }
  0x93   :  { %p7764_p13 = scmp.lt.s32.totalorder %s7762_s3, %s7758_s10 }
  0x95   :  { %p7765_p0 = por %p7764_p13, %p7763_p12 }
  0x97   :  { %p7766_p1 = pnand %p7765_p0, %p7759_p11 }
  0x99   :  { %7769 = shalt.err (!%p7766_p1)
}
  0x9a   :  { %133 = dma.hbm_to_vmem [thread:$0]  %s9562_s12, 16, %s131_s16, [#allocation14]  }
  0x9b   :  { %s7770_s11 = scalar_lea.hbm %s9564_s14, 16 }
  0x9c   :  { %p7771_p2 = scmp.ne.s32.totalorder %s9564_s14, %s7770_s11  ;;  %p7774_p3 = scmp.lt.u32.totalorder %s7770_s11, %s9564_s14 }
  0x9e   :  { %p7776_p4 = pnand %p7774_p3, %p7771_p2 }
  0xa0   :  { %7779 = shalt.err (!%p7776_p4)
}
  0xa1   :  { %s7780_s9 = scalar_lea.vmem %s143_s21, 16  ;;  %s7784_s27 = scalar_lea.vmem %s143_s21, 32 }
  0xa2   :  { %p7781_p5 = scmp.ne.s32.totalorder %s143_s21, %s7780_s9  ;;  %p7785_p6 = scmp.lt.s32.totalorder %s143_s21, %s143_s21 }
  0xa3   :  { %p7786_p7 = scmp.lt.s32.totalorder %s7784_s27, %s7780_s9 }
  0xa5   :  { %p7787_p8 = por %p7786_p7, %p7785_p6 }
  0xa7   :  { %p7788_p9 = pnand %p7787_p8, %p7781_p5 }
  0xa9   :  { %7791 = shalt.err (!%p7788_p9)
}
  0xaa   :  { %145 = dma.hbm_to_vmem [thread:$0]  %s9564_s14, 16, %s143_s21, [#allocation17]  }
  0xab   :  { %7792 = dma.done.wait [#allocation3], 64  }
  0xac   :  { %7793 = vsyncadd [#allocation3], 4294967232 }
  0xad   :  { %7794 = dma.done.wait [#allocation5], 1040  }
  0xae   :  { %7795 = vsyncadd [#allocation5], 4294966256 }
  0xaf   :  { %7796 = dma.done.wait [#allocation8], 1536  }
  0xb0   :  { %7797 = vsyncadd [#allocation8], 4294965760 }
  0xb1   :  { %7798 = dma.done.wait [#allocation11], 528  }
  0xb2   :  { %7799 = vsyncadd [#allocation11], 4294966768 }
  0xb3   :  { %7800 = dma.done.wait [#allocation14], 272  }
  0xb4   :  { %7801 = vsyncadd [#allocation14], 4294967024 }
  0xb5   :  { %7802 = dma.done.wait [#allocation17], 16  }
  0xb6   :  { %7803 = vsyncadd [#allocation17], 4294967280  ;;  %v7818_v0 = vmov 0.0|0.0   ;;  %vm7819_vm0 = vmmov 0   ;;  %v7820_v1 = vmov 0.0   ;;  %vm217_vm1 = vcmask 1043456  }
  0xb7   :  { %6500 = vmatprep.subr.bf16.mxu1 %v7818_v0  ;;  %6221 = vmatprep.mubr.msk.f32.mxu1 %vm7819_vm0, %v7820_v1  ;;  %vm192_vm2 = vcmask 31744   ;;  %v184_v2 = vld [vmem:[#allocation2] sm:$0xf]  ;;  %v177_v4 = vld [vmem:[%s9550_s0 + $0x8] sm:$0xff]  ;;  %v178_v7 = vld [vmem:[%s9550_s0 + $0x10] sm:$0xff]  ;;  %s7822_s16 = smov 32  }
  0xb8   :  { %v176_v3 = vld [vmem:[%s9550_s0] sm:$0xff]  ;;  %6199 = vmatprep.subr.msk.mxu0 %vm217_vm1, %v184_v2  ;;  %v327_v6 = vld [vmem:[%s9552_s2 + $0x8] sm:$0xff]  ;;  %v328_v9 = vld [vmem:[%s9552_s2 + $0x10] sm:$0xff]  ;;  %vm629_vm3 = vcmask 1041409   ;;  %vm632_vm4 = vcmask 1042434   ;;  %vm635_vm5 = vcmask 1043459  }
  0xb9   :  { %6201 = vmatprep.mubr.msk.f32.mxu0 %vm192_vm2, %v176_v3  ;;  %v326_v5 = vld [vmem:[%s9552_s2] sm:$0xff]  ;;  %6200 = vmatpush3.msk.msra.mxu0 %vm217_vm1, %v184_v2  ;;  %v329_v10 = vld [vmem:[%s9552_s2 + $0x18] sm:$0xff]  ;;  %v181_v14 = vld [vmem:[%s9550_s0 + $0x28] sm:$0xff]  ;;  %vm638_vm6 = vcmask 1044484   ;;  %vm641_vm7 = vcmask 1045509   ;;  %vm644_vm8 = vcmask 1046534  }
  0xba   :  { %v8085_v8 = vpack.c.bf16 %v327_v6, %v326_v5  ;;  %6202 = vmatmul.mubr.msk.f32.vlgmr.msra.gmra.mrb[0].mxu0 %vm192_vm2, %v177_v4  ;;  %6512 = vmatprep.subr.bf16.mxu0 %v7818_v0  ;;  %v179_v11 = vld [vmem:[%s9550_s0 + $0x18] sm:$0xff]  ;;  %v8100_v12 = vpack.c.bf16 %v329_v10, %v328_v9  ;;  %v180_v13 = vld [vmem:[%s9550_s0 + $0x20] sm:$0xff]  ;;  %v182_v15 = vld [vmem:[%s9550_s0 + $0x30] sm:$0xff]  ;;  %vm647_vm9 = vcmask 1047559   ;;  %vm330_vm10 = vcmask 261120  }
  0xbb   :  { %6204 = vmatprep.mubr.msk.f32.mxu0 %vm192_vm2, %v178_v7  ;;  %v183_v16 = vld [vmem:[%s9550_s0 + $0x38] sm:$0xff]  ;;  %v5893_v21 = vld [vmem:[#allocation4] ss:$0 sm:$0xff]  ;;  %s7821_s0 = smov 64   ;;  %vm3154_vm11 = vcmask 523264   ;;  %vm4999_vm12 = vcmask 130048  }
  0xbc   :  { %6502 = vmatpush3.bf16.msra.mxu1 %v8085_v8  ;;  %6514 = vmatpush3.bf16.msra.mxu0 %v8085_v8 }
  0xbd   :  { %6503 = vmatprep.subr.bf16.mxu1 %v7818_v0  ;;  %6515 = vmatprep.subr.bf16.mxu0 %v7818_v0 }
  0xbe   :  { %6205 = vmatmul.mubr.msk.f32.gmra.mrb[2].mxu0 %vm192_vm2, %v179_v11 }
  0xbf   :  { %6207 = vmatprep.mubr.msk.f32.mxu0 %vm192_vm2, %v180_v13 }
  0xc0   :  { %6505 = vmatpush3.bf16.msra.mxu1 %v8100_v12  ;;  %6517 = vmatpush3.bf16.msra.mxu0 %v8100_v12 }
  0xc1   :  { %6506 = vmatprep.subr.bf16.mxu1 %v7818_v0  ;;  %6524 = vmatprep.subr.bf16.mxu0 %v7818_v0 }
  0xc2   :  { %6208 = vmatmul.mubr.msk.f32.gmra.mrb[4].mxu0 %vm192_vm2, %v181_v14 }
  0xc3   :  { %6222 = vmatmul.mubr.f32.vlgmr.msra.gmra.mrb[0].mxu1 %v7820_v1  ;;  %6210 = vmatprep.mubr.msk.f32.mxu0 %vm192_vm2, %v182_v15 }
  0xc4   :  { %6508 = vmatpush3.bf16.msra.mxu1 %v8085_v8  ;;  %6232 = vmatprep.mubr.msk.f32.mxu1 %vm7819_vm0, %v7820_v1 }
  0xc5   :  { %6509 = vmatprep.subr.bf16.mxu1 %v7818_v0 }
  0xc6   :  { %6211 = vmatmul.mubr.msk.f32.gmra.mrb[6].mxu0 %vm192_vm2, %v183_v16 }
  0xc7   :  { %6243 = vmatprep.mubr.msk.f32.mxu0 %vm7819_vm0, %v7820_v1 }
  0xc8   :  { %6511 = vmatpush3.bf16.msra.mxu1 %v8100_v12 }
  0xc9   :  { %6518 = vmatprep.subr.bf16.mxu1 %v7818_v0 }
 0x18d   :  { %v6203_v17 = vpop.f32.mrb[0].mxu0 }
 0x18e   :  { %v287_v18 = vpop.f32.mrb[1].mxu0  ;;  %v8137_v27 = vadd.f32 %v6203_v17, %v5893_v21 }
 0x18f   :  { %v8135_v24 = vadd.f32 %v5893_v21, %v287_v18 }
 0x191   :  { %v6206_v19 = vpop.f32.mrb[2].mxu0 }
 0x192   :  { %v297_v20 = vpop.f32.mrb[3].mxu0  ;;  %v8139_v30 = vadd.f32 %v6206_v19, %v5893_v21 }
 0x193   :  { %v8142_v34 = vadd.f32 %v5893_v21, %v297_v20 }
 0x195   :  { %v6209_v23 = vpop.f32.mrb[4].mxu0 }
 0x196   :  { %v400_v22 = vpop.f32.mrb[0].mxu1  ;;  %v307_v26 = vpop.f32.mrb[5].mxu0  ;;  %v8146_v39 = vadd.f32 %v6209_v23, %v5893_v21 }
 0x197   :  { %v6223_v25 = vpop.f32.mrb[1].mxu1  ;;  %v405_v28 = vrot.slane %v400_v22, 1  ;;  %v407_v31 = vrot.slane %v400_v22, 3  ;;  %v420_v33 = vadd.f32 %v400_v22, %v8135_v24  ;;  %v406_v35 = vrot.slane %v400_v22, 2 }
 0x198   :  { %v409_v37 = vrot.slane %v400_v22, 5  ;;  %v8149_v41 = vadd.f32 %v5893_v21, %v307_v26  ;;  %v408_v42 = vrot.slane %v400_v22, 4  ;;  %v411_v45 = vrot.slane %v400_v22, 7 }
 0x199   :  { %v6212_v29 = vpop.f32.mrb[6].mxu0  ;;  %v421_v36 = vadd.f32 %v405_v28, %v8137_v27  ;;  %v423_v38 = vadd.f32 %v407_v31, %v8139_v30  ;;  %6836 = vtanh.f32 %v420_v33  ;;  %v422_v40 = vadd.f32 %v406_v35, %v8142_v34 }
 0x19a   :  { %v317_v32 = vpop.f32.mrb[7].mxu0  ;;  %v8151_v43 = vadd.f32 %v6212_v29, %v5893_v21  ;;  %v425_v44 = vadd.f32 %v409_v37, %v8146_v39  ;;  %v424_v47 = vadd.f32 %v408_v42, %v8149_v41  ;;  %v410_v48 = vrot.slane %v400_v22, 6 }
 0x19b   :  { %6838 = vtanh.f32 %v421_v36  ;;  %v8154_v46 = vadd.f32 %v5893_v21, %v317_v32  ;;  %v5903_v59 = vmul.f32 -1.442695, %v420_v33  ;;  %v5904_v60 = vmul.f32 -1.442695, %v421_v36 }
 0x19c   :  { %6840 = vtanh.f32 %v423_v38  ;;  %v427_v49 = vadd.f32 %v411_v45, %v8151_v43  ;;  %v5905_v61 = vmul.f32 -1.442695, %v422_v40  ;;  %v5906_v62 = vmul.f32 -1.442695, %v423_v38 }
 0x19d   :  { %6842 = vtanh.f32 %v422_v40  ;;  %v426_v51 = vadd.f32 %v410_v48, %v8154_v46  ;;  %v5907_v63 = vmul.f32 -1.442695, %v424_v47  ;;  %v5908_v2 = vmul.f32 -1.442695, %v425_v44 }
 0x19e   :  { %6844 = vtanh.f32 %v425_v44  ;;  %v5910_v7 = vmul.f32 -1.442695, %v427_v49 }
 0x19f   :  { %6846 = vtanh.f32 %v424_v47  ;;  %v5909_v4 = vmul.f32 -1.442695, %v426_v51 }
 0x1a0   :  { %6848 = vtanh.f32 %v427_v49 }
 0x1a1   :  { %6850 = vtanh.f32 %v426_v51 }
 0x1a2   :  { %6852 = vpow2.f32 %v5903_v59 }
 0x1a3   :  { %v6837_v50 = vpop.eup %6836  ;;  %6854 = vpow2.f32 %v5904_v60 }
 0x1a4   :  { %500 = vrot.lane.b32.xlu1 %v6837_v50, %s7821_s0  ;;  %6856 = vpow2.f32 %v5905_v61 }
 0x1a5   :  { %v6839_v52 = vpop.eup %6838  ;;  %6858 = vpow2.f32 %v5906_v62 }
 0x1a6   :  { %502 = vrot.lane.b32.xlu0 %v6839_v52, %s7821_s0  ;;  %v6841_v53 = vpop.eup %6840  ;;  %6860 = vpow2.f32 %v5907_v63 }
 0x1a7   :  { %v6843_v54 = vpop.eup %6842  ;;  %6862 = vpow2.f32 %v5908_v2 }
 0x1a8   :  { %506 = vrot.lane.b32.xlu1 %v6841_v53, %s7821_s0  ;;  %v6845_v55 = vpop.eup %6844  ;;  %6864 = vpow2.f32 %v5909_v4 }
 0x1a9   :  { %v6847_v56 = vpop.eup %6846 }
 0x1aa   :  { %504 = vrot.lane.b32.xlu0 %v6843_v54, %s7821_s0  ;;  %v6849_v57 = vpop.eup %6848 }
 0x1ab   :  { %v6851_v58 = vpop.eup %6850 }
 0x1ac   :  { %510 = vrot.lane.b32.xlu1 %v6845_v55, %s7821_s0  ;;  %v6853_v3 = vpop.eup %6852 }
 0x1ad   :  { %v452_v5 = vadd.f32 1.0, %v6853_v3  ;;  %v6855_v6 = vpop.eup %6854 }
 0x1ae   :  { %508 = vrot.lane.b32.xlu0 %v6847_v56, %s7821_s0  ;;  %v6857_v9 = vpop.eup %6856  ;;  %v453_v10 = vadd.f32 1.0, %v6855_v6 }
 0x1af   :  { %6866 = vrcp.f32 %v452_v5  ;;  %v6859_v11 = vpop.eup %6858  ;;  %v454_v13 = vadd.f32 1.0, %v6857_v9 }
 0x1b0   :  { %514 = vrot.lane.b32.xlu1 %v6849_v57, %s7821_s0  ;;  %6868 = vpow2.f32 %v5910_v7  ;;  %v6861_v14 = vpop.eup %6860  ;;  %v455_v15 = vadd.f32 1.0, %v6859_v11 }
 0x1b1   :  { %6870 = vrcp.f32 %v453_v10  ;;  %v6863_v16 = vpop.eup %6862  ;;  %v456_v17 = vadd.f32 1.0, %v6861_v14 }
 0x1b2   :  { %512 = vrot.lane.b32.xlu0 %v6851_v58, %s7821_s0  ;;  %6872 = vrcp.f32 %v454_v13  ;;  %v6865_v18 = vpop.eup %6864  ;;  %v457_v19 = vadd.f32 1.0, %v6863_v16 }
 0x1b3   :  { %6874 = vrcp.f32 %v455_v15  ;;  %v458_v22 = vadd.f32 1.0, %v6865_v18 }
 0x1b4   :  { %6876 = vrcp.f32 %v456_v17 }
 0x1b5   :  { %6878 = vrcp.f32 %v457_v19 }
 0x1b6   :  { %6880 = vrcp.f32 %v458_v22 }
 0x1b9   :  { %v8167_v20 = vpop.eup %6866 }
 0x1ba   :  { %v6869_v23 = vpop.eup %6868  ;;  %v484_v55 = vmul.f32 0.0, %v8167_v20 }
 0x1bb   :  { %v8171_v28 = vpop.eup %6870  ;;  %v459_v31 = vadd.f32 1.0, %v6869_v23 }
 0x1bc   :  { %v8174_v33 = vpop.eup %6872  ;;  %v485_v58 = vmul.f32 0.0, %v8171_v28 }
 0x1bd   :  { %6882 = vrcp.f32 %v459_v31  ;;  %v8178_v37 = vpop.eup %6874  ;;  %v486_v61 = vmul.f32 0.0, %v8174_v33 }
 0x1be   :  { %v8181_v38 = vpop.eup %6876  ;;  %v487_v2 = vmul.f32 0.0, %v8178_v37 }
 0x1bf   :  { %v8185_v47 = vpop.eup %6878  ;;  %v488_v3 = vmul.f32 0.0, %v8181_v38 }
 0x1c0   :  { %v8189_v48 = vpop.eup %6880  ;;  %v489_v10 = vmul.f32 0.0, %v8185_v47 }
 0x1c1   :  { %v490_v11 = vmul.f32 0.0, %v8189_v48 }
 0x1c7   :  { %v8195_v53 = vpop.eup %6882 }
 0x1c8   :  { %v491_v18 = vmul.f32 0.0, %v8195_v53 }
 0x216   :  { %v501_v21 = vpop.permute.xlu1 %500 }
 0x217   :  { %v524_v25 = vmul.f32 %v8167_v20, %v501_v21 }
 0x218   :  { %v503_v26 = vpop.permute.xlu0 %502 }
 0x219   :  { %540 = vrot.lane.b32.xlu0 %v524_v25, %s7822_s16  ;;  %v525_v32 = vmul.f32 %v8171_v28, %v503_v26 }
 0x21a   :  { %v507_v29 = vpop.permute.xlu1 %506 }
 0x21b   :  { %v527_v44 = vmul.f32 %v8178_v37, %v507_v29 }
 0x21c   :  { %v505_v35 = vpop.permute.xlu0 %504 }
 0x21d   :  { %v526_v36 = vmul.f32 %v8174_v33, %v505_v35  ;;  %542 = vrot.lane.b32.xlu0 %v525_v32, %s7822_s16 }
 0x21e   :  { %v511_v40 = vpop.permute.xlu1 %510 }
 0x21f   :  { %544 = vrot.lane.b32.xlu1 %v526_v36, %s7822_s16  ;;  %v529_v50 = vmul.f32 %v8185_v47, %v511_v40 }
 0x220   :  { %v509_v42 = vpop.permute.xlu0 %508 }
 0x221   :  { %v528_v45 = vmul.f32 %v8181_v38, %v509_v42 }
 0x222   :  { %v515_v52 = vpop.permute.xlu1 %514 }
 0x223   :  { %546 = vrot.lane.b32.xlu1 %v527_v44, %s7822_s16  ;;  %548 = vrot.lane.b32.xlu0 %v528_v45, %s7822_s16  ;;  %v531_v54 = vmul.f32 %v8195_v53, %v515_v52 }
 0x224   :  { %v513_v49 = vpop.permute.xlu0 %512 }
 0x225   :  { %v530_v51 = vmul.f32 %v8189_v48, %v513_v49 }
 0x227   :  { %550 = vrot.lane.b32.xlu1 %v529_v50, %s7822_s16  ;;  %552 = vrot.lane.b32.xlu0 %v530_v51, %s7822_s16 }
 0x22b   :  { %554 = vrot.lane.b32.xlu1 %v531_v54, %s7822_s16 }
 0x28b   :  { %v541_v56 = vpop.permute.xlu0 %540 }
 0x28c   :  { %v8200_v57 = vadd.f32 %v541_v56, %v484_v55 }
 0x28e   :  { %6884 = vtanh.f32 %v8200_v57 }
 0x28f   :  { %v543_v59 = vpop.permute.xlu0 %542 }
 0x290   :  { %v8204_v60 = vadd.f32 %v543_v59, %v485_v58 }
 0x291   :  { %v545_v62 = vpop.permute.xlu1 %544 }
 0x292   :  { %6886 = vtanh.f32 %v8204_v60  ;;  %v8208_v63 = vadd.f32 %v545_v62, %v486_v61 }
 0x294   :  { %6888 = vtanh.f32 %v8208_v63 }
 0x295   :  { %v547_v4 = vpop.permute.xlu1 %546  ;;  %v549_v5 = vpop.permute.xlu0 %548 }
 0x296   :  { %v8213_v6 = vadd.f32 %v547_v4, %v487_v2  ;;  %v8215_v7 = vadd.f32 %v549_v5, %v488_v3 }
 0x298   :  { %v6885_v9 = vpop.eup %6884  ;;  %6890 = vtanh.f32 %v8213_v6 }
 0x299   :  { %6892 = vtanh.f32 %v8215_v7  ;;  %v551_v13 = vpop.permute.xlu1 %550  ;;  %v553_v14 = vpop.permute.xlu0 %552  ;;  %588 = vrot.lane.b32.xlu0 %v6885_v9, %s7821_s0 }
 0x29a   :  { %v8222_v15 = vadd.f32 %v551_v13, %v489_v10  ;;  %v8224_v16 = vadd.f32 %v553_v14, %v490_v11 }
 0x29c   :  { %v6887_v17 = vpop.eup %6886  ;;  %6894 = vtanh.f32 %v8222_v15 }
 0x29d   :  { %6896 = vtanh.f32 %v8224_v16  ;;  %v555_v19 = vpop.permute.xlu1 %554  ;;  %590 = vrot.lane.b32.xlu0 %v6887_v17, %s7821_s0 }
 0x29e   :  { %v6889_v21 = vpop.eup %6888  ;;  %v8230_v22 = vadd.f32 %v555_v19, %v491_v18 }
 0x29f   :  { %592 = vrot.lane.b32.xlu1 %v6889_v21, %s7821_s0 }
 0x2a0   :  { %6898 = vtanh.f32 %v8230_v22 }
 0x2a2   :  { %v6891_v23 = vpop.eup %6890 }
 0x2a3   :  { %v6893_v25 = vpop.eup %6892  ;;  %594 = vrot.lane.b32.xlu1 %v6891_v23, %s7821_s0 }
 0x2a4   :  { %596 = vrot.lane.b32.xlu0 %v6893_v25, %s7821_s0 }
 0x2a6   :  { %v6895_v26 = vpop.eup %6894 }
 0x2a7   :  { %v6897_v29 = vpop.eup %6896  ;;  %598 = vrot.lane.b32.xlu1 %v6895_v26, %s7821_s0 }
 0x2a8   :  { %600 = vrot.lane.b32.xlu0 %v6897_v29, %s7821_s0 }
 0x2aa   :  { %v6899_v31 = vpop.eup %6898 }
 0x2ab   :  { %602 = vrot.lane.b32.xlu1 %v6899_v31, %s7821_s0 }
 0x30b   :  { %v589_v32 = vpop.permute.xlu0 %588 }
 0x30c   :  { %v612_v45 = vmul.f32 %v8167_v20, %v589_v32 }
 0x30f   :  { %v591_v35 = vpop.permute.xlu0 %590 }
 0x310   :  { %v613_v36 = vmul.f32 %v8171_v28, %v591_v35 }
 0x311   :  { %v593_v40 = vpop.permute.xlu1 %592 }
 0x312   :  { %v628_v42 = vrot.slane %v613_v36, 7  ;;  %v614_v44 = vmul.f32 %v8174_v33, %v593_v40 }
 0x314   :  { %v631_v49 = vrot.slane %v614_v44, 6  ;;  %v630_v51 = vsel %vm629_vm3, %v628_v42, %v612_v45 }
 0x315   :  { %v595_v50 = vpop.permute.xlu1 %594 }
 0x316   :  { %v615_v52 = vmul.f32 %v8178_v37, %v595_v50  ;;  %v597_v54 = vpop.permute.xlu0 %596  ;;  %v633_v28 = vsel %vm632_vm4, %v631_v49, %v630_v51 }
 0x317   :  { %v616_v55 = vmul.f32 %v8181_v38, %v597_v54 }
 0x318   :  { %v634_v56 = vrot.slane %v615_v52, 5 }
 0x319   :  { %v637_v58 = vrot.slane %v616_v55, 4  ;;  %v599_v59 = vpop.permute.xlu1 %598 }
 0x31a   :  { %v636_v33 = vsel %vm635_vm5, %v634_v56, %v633_v28  ;;  %v617_v20 = vmul.f32 %v8185_v47, %v599_v59  ;;  %v601_v61 = vpop.permute.xlu0 %600 }
 0x31b   :  { %v618_v62 = vmul.f32 %v8189_v48, %v601_v61  ;;  %v639_v37 = vsel %vm638_vm6, %v637_v58, %v636_v33 }
 0x31c   :  { %v640_v2 = vrot.slane %v617_v20, 3 }
 0x31d   :  { %v643_v3 = vrot.slane %v618_v62, 2  ;;  %v603_v4 = vpop.permute.xlu1 %602 }
 0x31e   :  { %v619_v38 = vmul.f32 %v8195_v53, %v603_v4  ;;  %v642_v5 = vsel %vm641_vm7, %v640_v2, %v639_v37 }
 0x31f   :  { %v645_v10 = vsel %vm644_vm8, %v643_v3, %v642_v5 }
 0x320   :  { %v646_v9 = vrot.slane %v619_v38, 1 }
 0x322   :  { %v648_v47 = vsel %vm647_vm9, %v646_v9, %v645_v10 }
 0x323   :  { %649 = vrot.lane.b32.xlu0 %v648_v47, %s7822_s16 }
 0x395   :  { %v8255_v48 = vpop.permute.xlu0 %649 }
 0x396   :  { %6233 = vmatmul.mubr.msk.f32.vlgmr.msra.gmra.mrb[2].mxu1 %vm330_vm10, %v8255_v48 }
 0x397   :  { %6520 = vmatpush3.bf16.msra.mxu1 %v8085_v8  ;;  %6254 = vmatprep.mubr.msk.f32.mxu1 %vm7819_vm0, %v7820_v1 }
 0x398   :  { %6521 = vmatprep.subr.bf16.mxu1 %v7818_v0 }
 0x39b   :  { %6523 = vmatpush3.bf16.msra.mxu1 %v8100_v12 }
 0x39c   :  { %6530 = vmatprep.subr.bf16.mxu1 %v7818_v0 }
 0x469   :  { %v719_v53 = vpop.f32.mrb[2].mxu1 }
 0x46a   :  { %v6234_v11 = vpop.f32.mrb[3].mxu1  ;;  %v725_v13 = vrot.slane %v719_v53, 1  ;;  %v724_v14 = vrot.slane %v719_v53, 7  ;;  %v740_v17 = vadd.f32 %v719_v53, %v8137_v27  ;;  %v726_v18 = vrot.slane %v719_v53, 2 }
 0x46b   :  { %v727_v21 = vrot.slane %v719_v53, 3  ;;  %v728_v25 = vrot.slane %v719_v53, 4  ;;  %v729_v29 = vrot.slane %v719_v53, 5  ;;  %v730_v32 = vrot.slane %v719_v53, 6 }
 0x46c   :  { %v741_v19 = vadd.f32 %v725_v13, %v8142_v34  ;;  %v739_v23 = vadd.f32 %v724_v14, %v8135_v24  ;;  %6900 = vtanh.f32 %v740_v17  ;;  %v742_v26 = vadd.f32 %v726_v18, %v8139_v30 }
 0x46d   :  { %v743_v31 = vadd.f32 %v727_v21, %v8149_v41  ;;  %v744_v35 = vadd.f32 %v728_v25, %v8146_v39  ;;  %v745_v36 = vadd.f32 %v729_v29, %v8154_v46  ;;  %v746_v40 = vadd.f32 %v730_v32, %v8151_v43 }
 0x46e   :  { %6902 = vtanh.f32 %v741_v19  ;;  %v5913_v55 = vmul.f32 -1.442695, %v740_v17  ;;  %v5914_v56 = vmul.f32 -1.442695, %v741_v19  ;;  %v5912_v28 = vmul.f32 -1.442695, %v739_v23 }
 0x46f   :  { %6904 = vtanh.f32 %v739_v23  ;;  %v5915_v58 = vmul.f32 -1.442695, %v742_v26  ;;  %v5916_v59 = vmul.f32 -1.442695, %v743_v31  ;;  %v5917_v33 = vmul.f32 -1.442695, %v744_v35 }
 0x470   :  { %6906 = vtanh.f32 %v742_v26  ;;  %v5918_v20 = vmul.f32 -1.442695, %v745_v36  ;;  %v5919_v61 = vmul.f32 -1.442695, %v746_v40 }
 0x471   :  { %6908 = vtanh.f32 %v743_v31 }
 0x472   :  { %6910 = vtanh.f32 %v744_v35 }
 0x473   :  { %6912 = vtanh.f32 %v745_v36 }
 0x474   :  { %6914 = vtanh.f32 %v746_v40 }
 0x475   :  { %6916 = vpow2.f32 %v5913_v55 }
 0x476   :  { %v6901_v42 = vpop.eup %6900  ;;  %6918 = vpow2.f32 %v5914_v56 }
 0x477   :  { %845 = vrot.lane.b32.xlu1 %v6901_v42, %s7821_s0  ;;  %6920 = vpow2.f32 %v5912_v28 }
 0x478   :  { %v6903_v44 = vpop.eup %6902  ;;  %6922 = vpow2.f32 %v5915_v58 }
 0x479   :  { %847 = vrot.lane.b32.xlu0 %v6903_v44, %s7821_s0  ;;  %v6905_v45 = vpop.eup %6904  ;;  %6924 = vpow2.f32 %v5916_v59 }
 0x47a   :  { %v6907_v49 = vpop.eup %6906  ;;  %6926 = vpow2.f32 %v5917_v33  ;;  %v812_v33 = vrot.slane %v8204_v60, 7 }
 0x47b   :  { %843 = vrot.lane.b32.xlu1 %v6905_v45, %s7821_s0  ;;  %v6909_v50 = vpop.eup %6908  ;;  %6928 = vpow2.f32 %v5918_v20  ;;  %v813_v20 = vrot.slane %v8208_v63, 7 }
 0x47c   :  { %v6911_v51 = vpop.eup %6910  ;;  %6930 = vpow2.f32 %v5919_v61 }
 0x47d   :  { %849 = vrot.lane.b32.xlu0 %v6907_v49, %s7821_s0  ;;  %v6913_v52 = vpop.eup %6912 }
 0x47e   :  { %v6915_v54 = vpop.eup %6914 }
 0x47f   :  { %851 = vrot.lane.b32.xlu1 %v6909_v50, %s7821_s0  ;;  %v6917_v62 = vpop.eup %6916 }
 0x480   :  { %v6919_v2 = vpop.eup %6918  ;;  %v772_v37 = vadd.f32 1.0, %v6917_v62 }
 0x481   :  { %853 = vrot.lane.b32.xlu0 %v6911_v51, %s7821_s0  ;;  %v6921_v3 = vpop.eup %6920  ;;  %v773_v4 = vadd.f32 1.0, %v6919_v2 }
 0x482   :  { %v6923_v38 = vpop.eup %6922  ;;  %6932 = vrcp.f32 %v772_v37  ;;  %v771_v5 = vadd.f32 1.0, %v6921_v3  ;;  %v811_v37 = vrot.slane %v8200_v57, 7 }
 0x483   :  { %855 = vrot.lane.b32.xlu1 %v6913_v52, %s7821_s0  ;;  %v6925_v9 = vpop.eup %6924  ;;  %6934 = vrcp.f32 %v773_v4  ;;  %v774_v10 = vadd.f32 1.0, %v6923_v38  ;;  %v814_v38 = vrot.slane %v8213_v6, 7 }
 0x484   :  { %v6927_v47 = vpop.eup %6926  ;;  %6936 = vrcp.f32 %v771_v5  ;;  %v775_v53 = vadd.f32 1.0, %v6925_v9 }
 0x485   :  { %857 = vrot.lane.b32.xlu0 %v6915_v54, %s7821_s0  ;;  %v6929_v11 = vpop.eup %6928  ;;  %6938 = vrcp.f32 %v774_v10  ;;  %v776_v13 = vadd.f32 1.0, %v6927_v47  ;;  %v815_v10 = vrot.slane %v8215_v7, 7 }
 0x486   :  { %v6931_v14 = vpop.eup %6930  ;;  %6940 = vrcp.f32 %v775_v53  ;;  %v777_v17 = vadd.f32 1.0, %v6929_v11  ;;  %v816_v53 = vrot.slane %v8222_v15, 7 }
 0x487   :  { %6942 = vrcp.f32 %v776_v13  ;;  %v778_v18 = vadd.f32 1.0, %v6931_v14 }
 0x488   :  { %6944 = vrcp.f32 %v777_v17  ;;  %v817_v17 = vrot.slane %v8224_v16, 7 }
 0x489   :  { %6946 = vrcp.f32 %v778_v18 }
 0x48c   :  { %v8281_v19 = vpop.eup %6932 }
 0x48d   :  { %v8283_v23 = vpop.eup %6934  ;;  %v828_v61 = vmul.f32 %v8281_v19, %v812_v33 }
 0x48e   :  { %v8288_v31 = vpop.eup %6936  ;;  %v829_v2 = vmul.f32 %v8283_v23, %v813_v20 }
 0x48f   :  { %v8291_v35 = vpop.eup %6938  ;;  %v827_v60 = vmul.f32 %v8288_v31, %v811_v37 }
 0x490   :  { %v8296_v44 = vpop.eup %6940  ;;  %v830_v9 = vmul.f32 %v8291_v35, %v814_v38 }
 0x491   :  { %v8299_v49 = vpop.eup %6942  ;;  %v831_v6 = vmul.f32 %v8296_v44, %v815_v10 }
 0x492   :  { %v8304_v54 = vpop.eup %6944  ;;  %v832_v14 = vmul.f32 %v8299_v49, %v816_v53 }
 0x493   :  { %v8307_v56 = vpop.eup %6946  ;;  %v833_v15 = vmul.f32 %v8304_v54, %v817_v17 }
 0x4e9   :  { %v846_v21 = vpop.permute.xlu1 %845 }
 0x4ea   :  { %v868_v25 = vmul.f32 %v8281_v19, %v846_v21  ;;  %v818_v21 = vrot.slane %v8230_v22, 7 }
 0x4eb   :  { %v848_v26 = vpop.permute.xlu0 %847 }
 0x4ec   :  { %v869_v29 = vmul.f32 %v8283_v23, %v848_v26  ;;  %885 = vrot.lane.b32.xlu1 %v868_v25, %s7822_s16 }
 0x4ed   :  { %v844_v32 = vpop.permute.xlu1 %843 }
 0x4ee   :  { %887 = vrot.lane.b32.xlu0 %v869_v29, %s7822_s16  ;;  %v867_v36 = vmul.f32 %v8288_v31, %v844_v32  ;;  %v834_v29 = vmul.f32 %v8307_v56, %v818_v21 }
 0x4ef   :  { %v850_v40 = vpop.permute.xlu0 %849 }
 0x4f0   :  { %v870_v42 = vmul.f32 %v8291_v35, %v850_v40  ;;  %883 = vrot.lane.b32.xlu1 %v867_v36, %s7822_s16 }
 0x4f1   :  { %v852_v45 = vpop.permute.xlu1 %851 }
 0x4f2   :  { %889 = vrot.lane.b32.xlu0 %v870_v42, %s7822_s16  ;;  %v871_v50 = vmul.f32 %v8296_v44, %v852_v45 }
 0x4f3   :  { %v854_v51 = vpop.permute.xlu0 %853 }
 0x4f4   :  { %v872_v52 = vmul.f32 %v8299_v49, %v854_v51  ;;  %891 = vrot.lane.b32.xlu1 %v871_v50, %s7822_s16 }
 0x4f5   :  { %v856_v55 = vpop.permute.xlu1 %855 }
 0x4f6   :  { %893 = vrot.lane.b32.xlu0 %v872_v52, %s7822_s16  ;;  %v873_v28 = vmul.f32 %v8304_v54, %v856_v55 }
 0x4f7   :  { %v858_v58 = vpop.permute.xlu0 %857 }
 0x4f8   :  { %v874_v59 = vmul.f32 %v8307_v56, %v858_v58  ;;  %895 = vrot.lane.b32.xlu1 %v873_v28, %s7822_s16 }
 0x4fa   :  { %897 = vrot.lane.b32.xlu0 %v874_v59, %s7822_s16 }
 0x55e   :  { %v886_v62 = vpop.permute.xlu1 %885 }
 0x55f   :  { %v8318_v3 = vadd.f32 %v886_v62, %v828_v61 }
 0x560   :  { %v888_v4 = vpop.permute.xlu0 %887 }
 0x561   :  { %v8321_v5 = vadd.f32 %v888_v4, %v829_v2  ;;  %6948 = vtanh.f32 %v8318_v3 }
 0x562   :  { %v884_v63 = vpop.permute.xlu1 %883 }
 0x563   :  { %6950 = vtanh.f32 %v8321_v5  ;;  %v8328_v47 = vadd.f32 %v884_v63, %v827_v60 }
 0x564   :  { %v890_v57 = vpop.permute.xlu0 %889 }
 0x565   :  { %v8331_v11 = vadd.f32 %v890_v57, %v830_v9  ;;  %6952 = vtanh.f32 %v8328_v47 }
 0x566   :  { %v892_v13 = vpop.permute.xlu1 %891 }
 0x567   :  { %6954 = vtanh.f32 %v8331_v11  ;;  %v8338_v18 = vadd.f32 %v892_v13, %v831_v6 }
 0x568   :  { %v894_v7 = vpop.permute.xlu0 %893 }
 0x569   :  { %v8341_v25 = vadd.f32 %v894_v7, %v832_v14  ;;  %6956 = vtanh.f32 %v8338_v18 }
 0x56a   :  { %v896_v26 = vpop.permute.xlu1 %895 }
 0x56b   :  { %6958 = vtanh.f32 %v8341_v25  ;;  %v6949_v32 = vpop.eup %6948  ;;  %v8347_v36 = vadd.f32 %v896_v26, %v833_v15 }
 0x56c   :  { %v898_v16 = vpop.permute.xlu0 %897  ;;  %933 = vrot.lane.b32.xlu1 %v6949_v32, %s7821_s0 }
 0x56d   :  { %v6951_v40 = vpop.eup %6950  ;;  %v8349_v42 = vadd.f32 %v898_v16, %v834_v29  ;;  %6960 = vtanh.f32 %v8347_v36 }
 0x56e   :  { %935 = vrot.lane.b32.xlu0 %v6951_v40, %s7821_s0 }
 0x56f   :  { %6962 = vtanh.f32 %v8349_v42  ;;  %v6953_v22 = vpop.eup %6952 }
 0x570   :  { %931 = vrot.lane.b32.xlu1 %v6953_v22, %s7821_s0 }
 0x571   :  { %v6955_v45 = vpop.eup %6954 }
 0x572   :  { %937 = vrot.lane.b32.xlu0 %v6955_v45, %s7821_s0 }
 0x573   :  { %v6957_v50 = vpop.eup %6956 }
 0x574   :  { %939 = vrot.lane.b32.xlu1 %v6957_v50, %s7821_s0 }
 0x575   :  { %v6959_v51 = vpop.eup %6958 }
 0x576   :  { %941 = vrot.lane.b32.xlu0 %v6959_v51, %s7821_s0 }
 0x577   :  { %v6961_v52 = vpop.eup %6960 }
 0x578   :  { %943 = vrot.lane.b32.xlu1 %v6961_v52, %s7821_s0 }
 0x579   :  { %v6963_v55 = vpop.eup %6962 }
 0x57a   :  { %945 = vrot.lane.b32.xlu0 %v6963_v55, %s7821_s0 }
 0x5de   :  { %v934_v28 = vpop.permute.xlu1 %933 }
 0x5df   :  { %v956_v2 = vmul.f32 %v8281_v19, %v934_v28 }
 0x5e0   :  { %v936_v58 = vpop.permute.xlu0 %935 }
 0x5e1   :  { %v957_v59 = vmul.f32 %v8283_v23, %v936_v58 }
 0x5e2   :  { %v932_v33 = vpop.permute.xlu1 %931 }
 0x5e3   :  { %v955_v20 = vmul.f32 %v8288_v31, %v932_v33  ;;  %v973_v4 = vrot.slane %v957_v59, 7 }
 0x5e4   :  { %v938_v61 = vpop.permute.xlu0 %937 }
 0x5e5   :  { %v958_v62 = vmul.f32 %v8291_v35, %v938_v61  ;;  %v971_v37 = vrot.slane %v955_v20, 1 }
 0x5e6   :  { %v940_v60 = vpop.permute.xlu1 %939 }
 0x5e7   :  { %v975_v38 = vrot.slane %v958_v62, 6  ;;  %v972_v63 = vsel %vm629_vm3, %v956_v2, %v971_v37  ;;  %v959_v9 = vmul.f32 %v8296_v44, %v940_v60 }
 0x5e8   :  { %v942_v10 = vpop.permute.xlu0 %941  ;;  %v974_v57 = vsel %vm632_vm4, %v973_v4, %v972_v63 }
 0x5e9   :  { %v960_v23 = vmul.f32 %v8299_v49, %v942_v10  ;;  %v976_v31 = vsel %vm635_vm5, %v975_v38, %v974_v57  ;;  %v977_v53 = vrot.slane %v959_v9, 5 }
 0x5ea   :  { %v944_v35 = vpop.permute.xlu1 %943 }
 0x5eb   :  { %v979_v6 = vrot.slane %v960_v23, 4  ;;  %v978_v19 = vsel %vm638_vm6, %v977_v53, %v976_v31  ;;  %v961_v13 = vmul.f32 %v8304_v54, %v944_v35 }
 0x5ec   :  { %v946_v14 = vpop.permute.xlu0 %945 }
 0x5ed   :  { %v962_v17 = vmul.f32 %v8307_v56, %v946_v14  ;;  %v980_v7 = vsel %vm641_vm7, %v979_v6, %v978_v19  ;;  %v981_v44 = vrot.slane %v961_v13, 3 }
 0x5ef   :  { %v983_v21 = vrot.slane %v962_v17, 2  ;;  %v982_v15 = vsel %vm644_vm8, %v981_v44, %v980_v7 }
 0x5f1   :  { %v984_v49 = vsel %vm647_vm9, %v983_v21, %v982_v15 }
 0x5f2   :  { %985 = vrot.lane.b32.xlu1 %v984_v49, %s7822_s16 }
 0x664   :  { %v8377_v26 = vpop.permute.xlu1 %985 }
 0x665   :  { %6244 = vmatmul.mubr.msk.f32.vlgmr.msra.gmra.mrb[8].mxu0 %vm330_vm10, %v8377_v26 }
 0x666   :  { %6526 = vmatpush3.bf16.msra.mxu0 %v8085_v8  ;;  %6265 = vmatprep.mubr.msk.f32.mxu0 %vm7819_vm0, %v7820_v1 }
 0x667   :  { %6527 = vmatprep.subr.bf16.mxu0 %v7818_v0 }
 0x66a   :  { %6529 = vmatpush3.bf16.msra.mxu0 %v8100_v12 }
 0x66b   :  { %6536 = vmatprep.subr.bf16.mxu0 %v7818_v0 }
 0x738   :  { %v1055_v54 = vpop.f32.mrb[8].mxu0 }
 0x739   :  { %v1060_v56 = vrot.slane %v1055_v54, 6  ;;  %v6245_v29 = vpop.f32.mrb[9].mxu0  ;;  %v1062_v16 = vrot.slane %v1055_v54, 1  ;;  %v1061_v40 = vrot.slane %v1055_v54, 7  ;;  %v1077_v22 = vadd.f32 %v1055_v54, %v8142_v34 }
 0x73a   :  { %v1063_v45 = vrot.slane %v1055_v54, 2  ;;  %v1064_v52 = vrot.slane %v1055_v54, 3  ;;  %v1065_v28 = vrot.slane %v1055_v54, 4  ;;  %v1066_v59 = vrot.slane %v1055_v54, 5 }
 0x73b   :  { %v1075_v32 = vadd.f32 %v1060_v56, %v8135_v24  ;;  %v1078_v50 = vadd.f32 %v1062_v16, %v8139_v30  ;;  %v1076_v55 = vadd.f32 %v1061_v40, %v8137_v27  ;;  %v5923_v10 = vmul.f32 -1.442695, %v1077_v22 }
 0x73c   :  { %v1079_v58 = vadd.f32 %v1063_v45, %v8149_v41  ;;  %v1080_v33 = vadd.f32 %v1064_v52, %v8146_v39  ;;  %v1081_v20 = vadd.f32 %v1065_v28, %v8154_v46  ;;  %v1082_v61 = vadd.f32 %v1066_v59, %v8151_v43 }
 0x73d   :  { %6964 = vtanh.f32 %v1075_v32  ;;  %v5921_v9 = vmul.f32 -1.442695, %v1075_v32  ;;  %v5924_v57 = vmul.f32 -1.442695, %v1078_v50  ;;  %v5922_v31 = vmul.f32 -1.442695, %v1076_v55 }
 0x73e   :  { %6966 = vtanh.f32 %v1077_v22  ;;  %v5925_v53 = vmul.f32 -1.442695, %v1079_v58  ;;  %v5926_v35 = vmul.f32 -1.442695, %v1080_v33  ;;  %v5927_v19 = vmul.f32 -1.442695, %v1081_v20 }
 0x73f   :  { %6968 = vtanh.f32 %v1078_v50  ;;  %v5928_v13 = vmul.f32 -1.442695, %v1082_v61 }
 0x740   :  { %6970 = vtanh.f32 %v1076_v55 }
 0x741   :  { %6972 = vtanh.f32 %v1079_v58 }
 0x742   :  { %6974 = vtanh.f32 %v1080_v33 }
 0x743   :  { %6976 = vtanh.f32 %v1081_v20 }
 0x744   :  { %6978 = vtanh.f32 %v1082_v61 }
 0x745   :  { %6980 = vpow2.f32 %v5921_v9 }
 0x746   :  { %6982 = vpow2.f32 %v5923_v10 }
 0x747   :  { %v6965_v51 = vpop.eup %6964  ;;  %6984 = vpow2.f32 %v5924_v57 }
 0x748   :  { %1179 = vrot.lane.b32.xlu0 %v6965_v51, %s7821_s0  ;;  %v6967_v62 = vpop.eup %6966  ;;  %6986 = vpow2.f32 %v5922_v31 }
 0x749   :  { %v6969_v2 = vpop.eup %6968  ;;  %1183 = vrot.lane.b32.xlu1 %v6967_v62, %s7821_s0  ;;  %6988 = vpow2.f32 %v5925_v53 }
 0x74a   :  { %v6971_v37 = vpop.eup %6970 }
 0x74b   :  { %v6973_v4 = vpop.eup %6972 }
 0x74c   :  { %1185 = vrot.lane.b32.xlu0 %v6969_v2, %s7821_s0  ;;  %v6975_v38 = vpop.eup %6974 }
 0x74d   :  { %1181 = vrot.lane.b32.xlu1 %v6971_v37, %s7821_s0  ;;  %v6977_v60 = vpop.eup %6976 }
 0x74e   :  { %v6979_v63 = vpop.eup %6978 }
 0x74f   :  { %v6981_v23 = vpop.eup %6980 }
 0x750   :  { %1187 = vrot.lane.b32.xlu0 %v6973_v4, %s7821_s0  ;;  %v1107_v6 = vadd.f32 1.0, %v6981_v23  ;;  %v6983_v14 = vpop.eup %6982 }
 0x751   :  { %1189 = vrot.lane.b32.xlu1 %v6975_v38, %s7821_s0  ;;  %v6985_v17 = vpop.eup %6984  ;;  %v1109_v7 = vadd.f32 1.0, %v6983_v14  ;;  %v1149_v14 = vrot.slane %v8321_v5, 7 }
 0x752   :  { %6990 = vrcp.f32 %v1107_v6  ;;  %v6987_v44 = vpop.eup %6986  ;;  %v1110_v21 = vadd.f32 1.0, %v6985_v17  ;;  %v1147_v6 = vrot.slane %v8328_v47, 7  ;;  %v1150_v17 = vrot.slane %v8331_v11, 7 }
 0x753   :  { %6992 = vpow2.f32 %v5926_v35  ;;  %v6989_v15 = vpop.eup %6988  ;;  %v1108_v56 = vadd.f32 1.0, %v6987_v44 }
 0x754   :  { %1191 = vrot.lane.b32.xlu0 %v6977_v60, %s7821_s0  ;;  %6994 = vpow2.f32 %v5927_v19  ;;  %v1111_v16 = vadd.f32 1.0, %v6989_v15  ;;  %v1148_v15 = vrot.slane %v8318_v3, 7  ;;  %v1152_v3 = vrot.slane %v8341_v25, 7 }
 0x755   :  { %1193 = vrot.lane.b32.xlu1 %v6979_v63, %s7821_s0  ;;  %6996 = vpow2.f32 %v5928_v13 }
 0x756   :  { %6998 = vrcp.f32 %v1109_v7 }
 0x757   :  { %7000 = vrcp.f32 %v1110_v21 }
 0x758   :  { %7002 = vrcp.f32 %v1108_v56  ;;  %v1151_v56 = vrot.slane %v8338_v18, 7  ;;  %v1153_v18 = vrot.slane %v8347_v36, 7 }
 0x759   :  { %7004 = vrcp.f32 %v1111_v16 }
 0x75c   :  { %v8403_v49 = vpop.eup %6990 }
 0x75d   :  { %v6993_v29 = vpop.eup %6992  ;;  %v1163_v35 = vmul.f32 %v8403_v49, %v1147_v6 }
 0x75e   :  { %v6995_v40 = vpop.eup %6994  ;;  %v1112_v22 = vadd.f32 1.0, %v6993_v29 }
 0x75f   :  { %v6997_v45 = vpop.eup %6996  ;;  %v1113_v50 = vadd.f32 1.0, %v6995_v40 }
 0x760   :  { %7006 = vrcp.f32 %v1112_v22  ;;  %v1114_v51 = vadd.f32 1.0, %v6997_v45  ;;  %v8407_v52 = vpop.eup %6998 }
 0x761   :  { %7008 = vrcp.f32 %v1113_v50  ;;  %v8409_v28 = vpop.eup %7000  ;;  %v1165_v7 = vmul.f32 %v8407_v52, %v1149_v14 }
 0x762   :  { %7010 = vrcp.f32 %v1114_v51  ;;  %v8414_v20 = vpop.eup %7002  ;;  %v1166_v21 = vmul.f32 %v8409_v28, %v1150_v17 }
 0x763   :  { %v8417_v62 = vpop.eup %7004  ;;  %v1164_v5 = vmul.f32 %v8414_v20, %v1148_v15 }
 0x764   :  { %v1167_v16 = vmul.f32 %v8417_v62, %v1151_v56 }
 0x76a   :  { %v8422_v38 = vpop.eup %7006 }
 0x76b   :  { %v8425_v63 = vpop.eup %7008  ;;  %v1168_v50 = vmul.f32 %v8422_v38, %v1152_v3 }
 0x76c   :  { %v8430_v23 = vpop.eup %7010 }
 0x7ba   :  { %v1180_v54 = vpop.permute.xlu0 %1179 }
 0x7bb   :  { %v1203_v32 = vmul.f32 %v8403_v49, %v1180_v54  ;;  %v1184_v55 = vpop.permute.xlu1 %1183 }
 0x7bc   :  { %v1205_v58 = vmul.f32 %v8407_v52, %v1184_v55  ;;  %v1169_v55 = vmul.f32 %v8425_v63, %v1153_v18 }
 0x7bd   :  { %1219 = vrot.lane.b32.xlu0 %v1203_v32, %s7822_s16 }
 0x7be   :  { %v1186_v59 = vpop.permute.xlu0 %1185  ;;  %1223 = vrot.lane.b32.xlu1 %v1205_v58, %s7822_s16  ;;  %v1154_v58 = vrot.slane %v8349_v42, 7 }
 0x7bf   :  { %v1206_v33 = vmul.f32 %v8409_v28, %v1186_v59  ;;  %v1182_v61 = vpop.permute.xlu1 %1181 }
 0x7c0   :  { %v1204_v2 = vmul.f32 %v8414_v20, %v1182_v61  ;;  %v1170_v36 = vmul.f32 %v8430_v23, %v1154_v58 }
 0x7c1   :  { %1225 = vrot.lane.b32.xlu0 %v1206_v33, %s7822_s16 }
 0x7c2   :  { %v1188_v37 = vpop.permute.xlu0 %1187  ;;  %1221 = vrot.lane.b32.xlu1 %v1204_v2, %s7822_s16 }
 0x7c3   :  { %v1207_v4 = vmul.f32 %v8417_v62, %v1188_v37  ;;  %v1190_v60 = vpop.permute.xlu1 %1189 }
 0x7c4   :  { %v1208_v9 = vmul.f32 %v8422_v38, %v1190_v60 }
 0x7c5   :  { %1227 = vrot.lane.b32.xlu0 %v1207_v4, %s7822_s16 }
 0x7c6   :  { %v1192_v10 = vpop.permute.xlu0 %1191  ;;  %1229 = vrot.lane.b32.xlu1 %v1208_v9, %s7822_s16 }
 0x7c7   :  { %v1209_v57 = vmul.f32 %v8425_v63, %v1192_v10  ;;  %v1194_v31 = vpop.permute.xlu1 %1193 }
 0x7c8   :  { %v1210_v53 = vmul.f32 %v8430_v23, %v1194_v31 }
 0x7c9   :  { %1231 = vrot.lane.b32.xlu0 %v1209_v57, %s7822_s16 }
 0x7ca   :  { %1233 = vrot.lane.b32.xlu1 %v1210_v53, %s7822_s16 }
 0x82f   :  { %v1220_v19 = vpop.permute.xlu0 %1219 }
 0x830   :  { %v8437_v13 = vadd.f32 %v1220_v19, %v1163_v35  ;;  %v1224_v44 = vpop.permute.xlu1 %1223 }
 0x831   :  { %v8445_v54 = vadd.f32 %v1224_v44, %v1165_v7 }
 0x832   :  { %7012 = vtanh.f32 %v8437_v13 }
 0x833   :  { %v1226_v47 = vpop.permute.xlu0 %1225  ;;  %7014 = vtanh.f32 %v8445_v54 }
 0x834   :  { %v8448_v29 = vadd.f32 %v1226_v47, %v1166_v21  ;;  %v1222_v11 = vpop.permute.xlu1 %1221 }
 0x835   :  { %v8456_v40 = vadd.f32 %v1222_v11, %v1164_v5 }
 0x836   :  { %7016 = vtanh.f32 %v8448_v29 }
 0x837   :  { %v1228_v22 = vpop.permute.xlu0 %1227  ;;  %7018 = vtanh.f32 %v8456_v40 }
 0x838   :  { %v8459_v45 = vadd.f32 %v1228_v22, %v1167_v16  ;;  %v1230_v51 = vpop.permute.xlu1 %1229 }
 0x839   :  { %v8466_v59 = vadd.f32 %v1230_v51, %v1168_v50 }
 0x83a   :  { %7020 = vtanh.f32 %v8459_v45 }
 0x83b   :  { %v1232_v25 = vpop.permute.xlu0 %1231  ;;  %7022 = vtanh.f32 %v8466_v59 }
 0x83c   :  { %v7013_v32 = vpop.eup %7012  ;;  %v8468_v33 = vadd.f32 %v1232_v25, %v1169_v55  ;;  %v1234_v61 = vpop.permute.xlu1 %1233 }
 0x83d   :  { %1267 = vrot.lane.b32.xlu0 %v7013_v32, %s7821_s0  ;;  %v7015_v2 = vpop.eup %7014  ;;  %v8473_v37 = vadd.f32 %v1234_v61, %v1170_v36 }
 0x83e   :  { %7024 = vtanh.f32 %v8468_v33  ;;  %1271 = vrot.lane.b32.xlu1 %v7015_v2, %s7821_s0 }
 0x83f   :  { %7026 = vtanh.f32 %v8473_v37 }
 0x840   :  { %v7017_v4 = vpop.eup %7016 }
 0x841   :  { %1273 = vrot.lane.b32.xlu0 %v7017_v4, %s7821_s0  ;;  %v7019_v42 = vpop.eup %7018 }
 0x842   :  { %1269 = vrot.lane.b32.xlu1 %v7019_v42, %s7821_s0 }
 0x844   :  { %v7021_v60 = vpop.eup %7020 }
 0x845   :  { %1275 = vrot.lane.b32.xlu0 %v7021_v60, %s7821_s0  ;;  %v7023_v9 = vpop.eup %7022 }
 0x846   :  { %1277 = vrot.lane.b32.xlu1 %v7023_v9, %s7821_s0 }
 0x848   :  { %v7025_v10 = vpop.eup %7024 }
 0x849   :  { %1279 = vrot.lane.b32.xlu0 %v7025_v10, %s7821_s0  ;;  %v7027_v57 = vpop.eup %7026 }
 0x84a   :  { %1281 = vrot.lane.b32.xlu1 %v7027_v57, %s7821_s0 }
 0x8af   :  { %v1268_v31 = vpop.permute.xlu0 %1267 }
 0x8b0   :  { %v1272_v53 = vpop.permute.xlu1 %1271  ;;  %v1291_v35 = vmul.f32 %v8403_v49, %v1268_v31 }
 0x8b1   :  { %v1293_v56 = vmul.f32 %v8407_v52, %v1272_v53 }
 0x8b2   :  { %v1307_v21 = vrot.slane %v1291_v35, 2 }
 0x8b3   :  { %v1274_v6 = vpop.permute.xlu0 %1273 }
 0x8b4   :  { %v1294_v19 = vmul.f32 %v8409_v28, %v1274_v6  ;;  %v1270_v14 = vpop.permute.xlu1 %1269 }
 0x8b5   :  { %v1292_v17 = vmul.f32 %v8414_v20, %v1270_v14 }
 0x8b6   :  { %v1311_v47 = vrot.slane %v1294_v19, 7 }
 0x8b7   :  { %v1276_v7 = vpop.permute.xlu0 %1275  ;;  %v1308_v15 = vrot.slane %v1292_v17, 1 }
 0x8b8   :  { %v1295_v44 = vmul.f32 %v8417_v62, %v1276_v7  ;;  %v1278_v32 = vpop.permute.xlu1 %1277 }
 0x8b9   :  { %v1309_v11 = vsel %vm629_vm3, %v1308_v15, %v1307_v21  ;;  %v1296_v16 = vmul.f32 %v8422_v38, %v1278_v32 }
 0x8ba   :  { %v1313_v5 = vrot.slane %v1295_v44, 6  ;;  %v1310_v28 = vsel %vm632_vm4, %v1293_v56, %v1309_v11 }
 0x8bb   :  { %v1280_v49 = vpop.permute.xlu0 %1279  ;;  %v1312_v20 = vsel %vm635_vm5, %v1311_v47, %v1310_v28  ;;  %v1315_v22 = vrot.slane %v1296_v16, 5 }
 0x8bc   :  { %v1297_v3 = vmul.f32 %v8425_v63, %v1280_v49  ;;  %v1314_v62 = vsel %vm638_vm6, %v1313_v5, %v1312_v20  ;;  %v1282_v18 = vpop.permute.xlu1 %1281 }
 0x8bd   :  { %v1298_v52 = vmul.f32 %v8430_v23, %v1282_v18  ;;  %v1316_v51 = vsel %vm641_vm7, %v1315_v22, %v1314_v62 }
 0x8be   :  { %v1317_v50 = vrot.slane %v1297_v3, 4 }
 0x8bf   :  { %v1319_v58 = vrot.slane %v1298_v52, 3 }
 0x8c0   :  { %v1318_v55 = vsel %vm644_vm8, %v1317_v50, %v1316_v51 }
 0x8c1   :  { %v1320_v38 = vsel %vm647_vm9, %v1319_v58, %v1318_v55 }
 0x8c2   :  { %1321 = vrot.lane.b32.xlu0 %v1320_v38, %s7822_s16 }
 0x934   :  { %v8499_v25 = vpop.permute.xlu0 %1321 }
 0x935   :  { %6255 = vmatmul.mubr.msk.f32.vlgmr.msra.gmra.mrb[4].mxu1 %vm330_vm10, %v8499_v25 }
 0x936   :  { %6532 = vmatpush3.bf16.msra.mxu1 %v8085_v8  ;;  %6276 = vmatprep.mubr.msk.f32.mxu1 %vm7819_vm0, %v7820_v1 }
 0x937   :  { %6533 = vmatprep.subr.bf16.mxu1 %v7818_v0 }
 0x93a   :  { %6535 = vmatpush3.bf16.msra.mxu1 %v8100_v12 }
 0x93b   :  { %6542 = vmatprep.subr.bf16.mxu1 %v7818_v0 }
 0xa08   :  { %v1391_v63 = vpop.f32.mrb[4].mxu1 }
 0xa09   :  { %v6256_v23 = vpop.f32.mrb[5].mxu1  ;;  %v1397_v36 = vrot.slane %v1391_v63, 6  ;;  %v1399_v61 = vrot.slane %v1391_v63, 1  ;;  %v1396_v4 = vrot.slane %v1391_v63, 5  ;;  %v1414_v42 = vadd.f32 %v1391_v63, %v8139_v30 }
 0xa0a   :  { %v1400_v60 = vrot.slane %v1391_v63, 2  ;;  %v1398_v10 = vrot.slane %v1391_v63, 7  ;;  %v1402_v31 = vrot.slane %v1391_v63, 4  ;;  %v1401_v6 = vrot.slane %v1391_v63, 3 }
 0xa0b   :  { %v1412_v2 = vadd.f32 %v1397_v36, %v8137_v27  ;;  %v1415_v9 = vadd.f32 %v1399_v61, %v8149_v41  ;;  %v1411_v57 = vadd.f32 %v1396_v4, %v8135_v24  ;;  %v5933_v11 = vmul.f32 -1.442695, %v1414_v42 }
 0xa0c   :  { %v1416_v53 = vadd.f32 %v1400_v60, %v8146_v39  ;;  %v1413_v35 = vadd.f32 %v1398_v10, %v8142_v34  ;;  %v1418_v19 = vadd.f32 %v1402_v31, %v8151_v43  ;;  %v1417_v17 = vadd.f32 %v1401_v6, %v8154_v46 }
 0xa0d   :  { %7028 = vtanh.f32 %v1412_v2  ;;  %v5931_v5 = vmul.f32 -1.442695, %v1412_v2  ;;  %v5934_v16 = vmul.f32 -1.442695, %v1415_v9  ;;  %v5930_v49 = vmul.f32 -1.442695, %v1411_v57 }
 0xa0e   :  { %7030 = vtanh.f32 %v1414_v42  ;;  %v5935_v28 = vmul.f32 -1.442695, %v1416_v53  ;;  %v5932_v3 = vmul.f32 -1.442695, %v1413_v35  ;;  %v5937_v20 = vmul.f32 -1.442695, %v1418_v19 }
 0xa0f   :  { %7032 = vtanh.f32 %v1415_v9  ;;  %v5936_v62 = vmul.f32 -1.442695, %v1417_v17 }
 0xa10   :  { %7034 = vtanh.f32 %v1411_v57 }
 0xa11   :  { %7036 = vtanh.f32 %v1416_v53 }
 0xa12   :  { %7038 = vtanh.f32 %v1413_v35 }
 0xa13   :  { %7040 = vtanh.f32 %v1418_v19 }
 0xa14   :  { %7042 = vtanh.f32 %v1417_v17 }
 0xa15   :  { %7044 = vpow2.f32 %v5931_v5 }
 0xa16   :  { %7046 = vpow2.f32 %v5933_v11 }
 0xa17   :  { %v7029_v14 = vpop.eup %7028  ;;  %7048 = vpow2.f32 %v5934_v16 }
 0xa18   :  { %1517 = vrot.lane.b32.xlu0 %v7029_v14, %s7821_s0  ;;  %v7031_v7 = vpop.eup %7030  ;;  %7050 = vpow2.f32 %v5930_v49 }
 0xa19   :  { %1521 = vrot.lane.b32.xlu1 %v7031_v7, %s7821_s0  ;;  %v7033_v44 = vpop.eup %7032  ;;  %7052 = vpow2.f32 %v5935_v28 }
 0xa1a   :  { %v7035_v21 = vpop.eup %7034  ;;  %7054 = vpow2.f32 %v5932_v3 }
 0xa1b   :  { %v7037_v15 = vpop.eup %7036  ;;  %7056 = vpow2.f32 %v5937_v20 }
 0xa1c   :  { %1523 = vrot.lane.b32.xlu0 %v7033_v44, %s7821_s0  ;;  %v7039_v47 = vpop.eup %7038  ;;  %7058 = vpow2.f32 %v5936_v62  ;;  %v1486_v62 = vrot.slane %v8448_v29, 7  ;;  %v1488_v29 = vrot.slane %v8466_v59, 7 }
 0xa1d   :  { %1515 = vrot.lane.b32.xlu1 %v7035_v21, %s7821_s0  ;;  %v7041_v56 = vpop.eup %7040 }
 0xa1e   :  { %v7043_v32 = vpop.eup %7042 }
 0xa1f   :  { %v7045_v22 = vpop.eup %7044 }
 0xa20   :  { %1525 = vrot.lane.b32.xlu0 %v7037_v15, %s7821_s0  ;;  %v7047_v18 = vpop.eup %7046  ;;  %v1444_v50 = vadd.f32 1.0, %v7045_v22  ;;  %v1484_v22 = vrot.slane %v8456_v40, 7 }
 0xa21   :  { %1519 = vrot.lane.b32.xlu1 %v7039_v47, %s7821_s0  ;;  %v7049_v52 = vpop.eup %7048  ;;  %v1446_v51 = vadd.f32 1.0, %v7047_v18 }
 0xa22   :  { %v7051_v55 = vpop.eup %7050  ;;  %7060 = vrcp.f32 %v1444_v50  ;;  %v1447_v58 = vadd.f32 1.0, %v7049_v52  ;;  %v1487_v52 = vrot.slane %v8459_v45, 7 }
 0xa23   :  { %v7053_v38 = vpop.eup %7052  ;;  %7062 = vrcp.f32 %v1446_v51  ;;  %v1443_v63 = vadd.f32 1.0, %v7051_v55 }
 0xa24   :  { %1529 = vrot.lane.b32.xlu0 %v7041_v56, %s7821_s0  ;;  %v7055_v23 = vpop.eup %7054  ;;  %7064 = vrcp.f32 %v1447_v58  ;;  %v1448_v36 = vadd.f32 1.0, %v7053_v38  ;;  %v1483_v38 = vrot.slane %v8437_v13, 7 }
 0xa25   :  { %1527 = vrot.lane.b32.xlu1 %v7043_v32, %s7821_s0  ;;  %v7057_v61 = vpop.eup %7056  ;;  %7066 = vrcp.f32 %v1443_v63  ;;  %v1445_v2 = vadd.f32 1.0, %v7055_v23 }
 0xa26   :  { %v7059_v4 = vpop.eup %7058  ;;  %7068 = vrcp.f32 %v1448_v36  ;;  %v1450_v42 = vadd.f32 1.0, %v7057_v61 }
 0xa27   :  { %7070 = vrcp.f32 %v1445_v2  ;;  %v1449_v10 = vadd.f32 1.0, %v7059_v4  ;;  %v1485_v2 = vrot.slane %v8445_v54, 7 }
 0xa28   :  { %7072 = vrcp.f32 %v1450_v42 }
 0xa29   :  { %7074 = vrcp.f32 %v1449_v10 }
 0xa2c   :  { %v8525_v60 = vpop.eup %7060 }
 0xa2d   :  { %v8528_v31 = vpop.eup %7062  ;;  %v1500_v18 = vmul.f32 %v8525_v60, %v1484_v22 }
 0xa2e   :  { %v8532_v35 = vpop.eup %7064  ;;  %v1502_v51 = vmul.f32 %v8528_v31, %v1486_v62 }
 0xa2f   :  { %v8536_v17 = vpop.eup %7066  ;;  %v1503_v40 = vmul.f32 %v8532_v35, %v1487_v52 }
 0xa30   :  { %v8540_v21 = vpop.eup %7068  ;;  %v1499_v45 = vmul.f32 %v8536_v17, %v1483_v38 }
 0xa31   :  { %v8544_v56 = vpop.eup %7070  ;;  %v1504_v13 = vmul.f32 %v8540_v21, %v1488_v29 }
 0xa32   :  { %v8548_v11 = vpop.eup %7072  ;;  %v1501_v59 = vmul.f32 %v8544_v56, %v1485_v2 }
 0xa33   :  { %v8552_v28 = vpop.eup %7074 }
 0xa8a   :  { %v1518_v9 = vpop.permute.xlu0 %1517 }
 0xa8b   :  { %v1540_v57 = vmul.f32 %v8525_v60, %v1518_v9  ;;  %v1522_v53 = vpop.permute.xlu1 %1521  ;;  %v1490_v9 = vrot.slane %v8473_v37, 7 }
 0xa8c   :  { %v1542_v6 = vmul.f32 %v8528_v31, %v1522_v53  ;;  %v1489_v53 = vrot.slane %v8468_v33, 7 }
 0xa8d   :  { %1557 = vrot.lane.b32.xlu0 %v1540_v57, %s7822_s16  ;;  %v1506_v54 = vmul.f32 %v8548_v11, %v1490_v9 }
 0xa8e   :  { %v1524_v19 = vpop.permute.xlu0 %1523  ;;  %1561 = vrot.lane.b32.xlu1 %v1542_v6, %s7822_s16  ;;  %v1505_v37 = vmul.f32 %v8552_v28, %v1489_v53 }
 0xa8f   :  { %v1543_v14 = vmul.f32 %v8532_v35, %v1524_v19  ;;  %v1516_v7 = vpop.permute.xlu1 %1515 }
 0xa90   :  { %v1539_v44 = vmul.f32 %v8536_v17, %v1516_v7 }
 0xa91   :  { %1563 = vrot.lane.b32.xlu0 %v1543_v14, %s7822_s16 }
 0xa92   :  { %v1526_v15 = vpop.permute.xlu0 %1525  ;;  %1555 = vrot.lane.b32.xlu1 %v1539_v44, %s7822_s16 }
 0xa93   :  { %v1544_v47 = vmul.f32 %v8540_v21, %v1526_v15  ;;  %v1520_v32 = vpop.permute.xlu1 %1519 }
 0xa94   :  { %v1541_v5 = vmul.f32 %v8544_v56, %v1520_v32 }
 0xa95   :  { %1565 = vrot.lane.b32.xlu0 %v1544_v47, %s7822_s16 }
 0xa96   :  { %v1530_v16 = vpop.permute.xlu0 %1529  ;;  %1559 = vrot.lane.b32.xlu1 %v1541_v5, %s7822_s16 }
 0xa97   :  { %v1546_v49 = vmul.f32 %v8548_v11, %v1530_v16  ;;  %v1528_v3 = vpop.permute.xlu1 %1527 }
 0xa98   :  { %v1545_v20 = vmul.f32 %v8552_v28, %v1528_v3 }
 0xa99   :  { %1569 = vrot.lane.b32.xlu0 %v1546_v49, %s7822_s16 }
 0xa9a   :  { %1567 = vrot.lane.b32.xlu1 %v1545_v20, %s7822_s16 }
 0xaff   :  { %v1558_v50 = vpop.permute.xlu0 %1557 }
 0xb00   :  { %v8562_v55 = vadd.f32 %v1558_v50, %v1500_v18  ;;  %v1562_v58 = vpop.permute.xlu1 %1561 }
 0xb01   :  { %v8565_v63 = vadd.f32 %v1562_v58, %v1502_v51 }
 0xb02   :  { %7076 = vtanh.f32 %v8562_v55 }
 0xb03   :  { %v1564_v23 = vpop.permute.xlu0 %1563  ;;  %7078 = vtanh.f32 %v8565_v63 }
 0xb04   :  { %v8572_v36 = vadd.f32 %v1564_v23, %v1503_v40  ;;  %v1556_v61 = vpop.permute.xlu1 %1555 }
 0xb05   :  { %v8575_v4 = vadd.f32 %v1556_v61, %v1499_v45 }
 0xb06   :  { %7080 = vtanh.f32 %v8572_v36 }
 0xb07   :  { %v1566_v42 = vpop.permute.xlu0 %1565  ;;  %7082 = vtanh.f32 %v8575_v4 }
 0xb08   :  { %v8582_v10 = vadd.f32 %v1566_v42, %v1504_v13  ;;  %v1560_v57 = vpop.permute.xlu1 %1559 }
 0xb09   :  { %v8585_v6 = vadd.f32 %v1560_v57, %v1501_v59 }
 0xb0a   :  { %7084 = vtanh.f32 %v8582_v10 }
 0xb0b   :  { %v1570_v19 = vpop.permute.xlu0 %1569  ;;  %7086 = vtanh.f32 %v8585_v6 }
 0xb0c   :  { %v7077_v14 = vpop.eup %7076  ;;  %v8591_v7 = vadd.f32 %v1570_v19, %v1506_v54  ;;  %v1568_v44 = vpop.permute.xlu1 %1567 }
 0xb0d   :  { %1605 = vrot.lane.b32.xlu0 %v7077_v14, %s7821_s0  ;;  %v7079_v15 = vpop.eup %7078  ;;  %v8594_v47 = vadd.f32 %v1568_v44, %v1505_v37 }
 0xb0e   :  { %7088 = vtanh.f32 %v8591_v7  ;;  %1609 = vrot.lane.b32.xlu1 %v7079_v15, %s7821_s0 }
 0xb0f   :  { %7090 = vtanh.f32 %v8594_v47 }
 0xb10   :  { %v7081_v33 = vpop.eup %7080 }
 0xb11   :  { %1611 = vrot.lane.b32.xlu0 %v7081_v33, %s7821_s0  ;;  %v7083_v32 = vpop.eup %7082 }
 0xb12   :  { %1603 = vrot.lane.b32.xlu1 %v7083_v32, %s7821_s0 }
 0xb14   :  { %v7085_v5 = vpop.eup %7084 }
 0xb15   :  { %1613 = vrot.lane.b32.xlu0 %v7085_v5, %s7821_s0  ;;  %v7087_v16 = vpop.eup %7086 }
 0xb16   :  { %1607 = vrot.lane.b32.xlu1 %v7087_v16, %s7821_s0 }
 0xb18   :  { %v7089_v49 = vpop.eup %7088 }
 0xb19   :  { %1617 = vrot.lane.b32.xlu0 %v7089_v49, %s7821_s0  ;;  %v7091_v3 = vpop.eup %7090 }
 0xb1a   :  { %1615 = vrot.lane.b32.xlu1 %v7091_v3, %s7821_s0 }
 0xb7f   :  { %v1606_v20 = vpop.permute.xlu0 %1605 }
 0xb80   :  { %v1610_v22 = vpop.permute.xlu1 %1609  ;;  %v1628_v52 = vmul.f32 %v8525_v60, %v1606_v20 }
 0xb81   :  { %v1630_v42 = vmul.f32 %v8528_v31, %v1610_v22 }
 0xb82   :  { %v1644_v45 = vrot.slane %v1628_v52, 2 }
 0xb83   :  { %v1612_v62 = vpop.permute.xlu0 %1611 }
 0xb84   :  { %v1604_v18 = vpop.permute.xlu1 %1603  ;;  %v1631_v23 = vmul.f32 %v8532_v35, %v1612_v62 }
 0xb85   :  { %v1627_v50 = vmul.f32 %v8536_v17, %v1604_v18 }
 0xb86   :  { %v1649_v59 = vrot.slane %v1631_v23, 7 }
 0xb87   :  { %v1614_v51 = vpop.permute.xlu0 %1613  ;;  %v1643_v58 = vrot.slane %v1627_v50, 3 }
 0xb88   :  { %v1608_v38 = vpop.permute.xlu1 %1607  ;;  %v1632_v40 = vmul.f32 %v8540_v21, %v1614_v51 }
 0xb89   :  { %v1629_v29 = vmul.f32 %v8544_v56, %v1608_v38  ;;  %v1645_v17 = vsel %vm629_vm3, %v1644_v45, %v1643_v58 }
 0xb8a   :  { %v1651_v9 = vrot.slane %v1632_v40, 6 }
 0xb8b   :  { %v1618_v61 = vpop.permute.xlu0 %1617  ;;  %v1646_v2 = vrot.slane %v1629_v29, 1 }
 0xb8c   :  { %v1634_v13 = vmul.f32 %v8548_v11, %v1618_v61  ;;  %v1616_v60 = vpop.permute.xlu1 %1615 }
 0xb8d   :  { %v1647_v57 = vsel %vm632_vm4, %v1646_v2, %v1645_v17  ;;  %v1633_v21 = vmul.f32 %v8552_v28, %v1616_v60 }
 0xb8e   :  { %v1648_v35 = vsel %vm635_vm5, %v1630_v42, %v1647_v57  ;;  %v1655_v53 = vrot.slane %v1634_v13, 4 }
 0xb8f   :  { %v1650_v56 = vsel %vm638_vm6, %v1649_v59, %v1648_v35  ;;  %v1653_v54 = vrot.slane %v1633_v21, 5 }
 0xb90   :  { %v1652_v19 = vsel %vm641_vm7, %v1651_v9, %v1650_v56 }
 0xb91   :  { %v1654_v11 = vsel %vm644_vm8, %v1653_v54, %v1652_v19 }
 0xb92   :  { %v1656_v31 = vsel %vm647_vm9, %v1655_v53, %v1654_v11 }
 0xb93   :  { %1657 = vrot.lane.b32.xlu1 %v1656_v31, %s7822_s16 }
 0xc05   :  { %v8621_v14 = vpop.permute.xlu1 %1657 }
 0xc06   :  { %6266 = vmatmul.mubr.msk.f32.vlgmr.msra.gmra.mrb[10].mxu0 %vm330_vm10, %v8621_v14 }
 0xc07   :  { %6538 = vmatpush3.bf16.msra.mxu0 %v8085_v8  ;;  %6287 = vmatprep.mubr.msk.f32.mxu0 %vm7819_vm0, %v7820_v1 }
 0xc08   :  { %6539 = vmatprep.subr.bf16.mxu0 %v7818_v0 }
 0xc0b   :  { %6541 = vmatpush3.bf16.msra.mxu0 %v8100_v12 }
 0xcd9   :  { %v1727_v28 = vpop.f32.mrb[10].mxu0 }
 0xcda   :  { %v1732_v37 = vrot.slane %v1727_v28, 4  ;;  %v6267_v44 = vpop.f32.mrb[11].mxu0  ;;  %v1734_v33 = vrot.slane %v1727_v28, 6  ;;  %v1736_v32 = vrot.slane %v1727_v28, 1  ;;  %v1733_v16 = vrot.slane %v1727_v28, 5 }
 0xcdb   :  { %v1751_v49 = vadd.f32 %v1727_v28, %v8149_v41  ;;  %v1737_v20 = vrot.slane %v1727_v28, 2  ;;  %v1735_v62 = vrot.slane %v1727_v28, 7  ;;  %v1738_v52 = vrot.slane %v1727_v28, 3 }
 0xcdc   :  { %v1747_v15 = vadd.f32 %v1732_v37, %v8135_v24  ;;  %v1749_v5 = vadd.f32 %v1734_v33, %v8142_v34  ;;  %v1752_v22 = vadd.f32 %v1736_v32, %v8146_v39  ;;  %v1748_v18 = vadd.f32 %v1733_v16, %v8137_v27 }
 0xcdd   :  { %v1753_v50 = vadd.f32 %v1737_v20, %v8154_v46  ;;  %v1750_v51 = vadd.f32 %v1735_v62, %v8139_v30  ;;  %v1754_v38 = vadd.f32 %v1738_v52, %v8151_v43  ;;  %v5943_v17 = vmul.f32 -1.442695, %v1751_v49 }
 0xcde   :  { %7092 = vtanh.f32 %v1747_v15  ;;  %v5939_v13 = vmul.f32 -1.442695, %v1747_v15  ;;  %v5941_v42 = vmul.f32 -1.442695, %v1749_v5  ;;  %v5944_v60 = vmul.f32 -1.442695, %v1752_v22 }
 0xcdf   :  { %7094 = vtanh.f32 %v1749_v5  ;;  %v5940_v59 = vmul.f32 -1.442695, %v1748_v18  ;;  %v5945_v21 = vmul.f32 -1.442695, %v1753_v50  ;;  %v5942_v35 = vmul.f32 -1.442695, %v1750_v51 }
 0xce0   :  { %7096 = vtanh.f32 %v1751_v49  ;;  %v5946_v56 = vmul.f32 -1.442695, %v1754_v38 }
 0xce1   :  { %7098 = vtanh.f32 %v1752_v22 }
 0xce2   :  { %7100 = vtanh.f32 %v1748_v18 }
 0xce3   :  { %7102 = vtanh.f32 %v1753_v50 }
 0xce4   :  { %7104 = vtanh.f32 %v1750_v51 }
 0xce5   :  { %7106 = vtanh.f32 %v1754_v38 }
 0xce6   :  { %7108 = vpow2.f32 %v5939_v13 }
 0xce7   :  { %7110 = vpow2.f32 %v5941_v42 }
 0xce8   :  { %v7093_v3 = vpop.eup %7092  ;;  %7112 = vpow2.f32 %v5943_v17 }
 0xce9   :  { %1851 = vrot.lane.b32.xlu0 %v7093_v3, %s7821_s0  ;;  %v7095_v58 = vpop.eup %7094  ;;  %7114 = vpow2.f32 %v5944_v60 }
 0xcea   :  { %v7097_v40 = vpop.eup %7096  ;;  %7116 = vpow2.f32 %v5940_v59 }
 0xceb   :  { %1859 = vrot.lane.b32.xlu1 %v7097_v40, %s7821_s0  ;;  %v7099_v23 = vpop.eup %7098 }
 0xcec   :  { %v7101_v29 = vpop.eup %7100 }
 0xced   :  { %1855 = vrot.lane.b32.xlu0 %v7095_v58, %s7821_s0  ;;  %v7103_v45 = vpop.eup %7102 }
 0xcee   :  { %v7105_v61 = vpop.eup %7104 }
 0xcef   :  { %1853 = vrot.lane.b32.xlu1 %v7101_v29, %s7821_s0  ;;  %v7107_v2 = vpop.eup %7106 }
 0xcf0   :  { %v7109_v9 = vpop.eup %7108 }
 0xcf1   :  { %1861 = vrot.lane.b32.xlu0 %v7099_v23, %s7821_s0  ;;  %v1779_v57 = vadd.f32 1.0, %v7109_v9  ;;  %v7111_v53 = vpop.eup %7110 }
 0xcf2   :  { %v7113_v54 = vpop.eup %7112  ;;  %v1781_v19 = vadd.f32 1.0, %v7111_v53 }
 0xcf3   :  { %1857 = vrot.lane.b32.xlu1 %v7105_v61, %s7821_s0  ;;  %7118 = vrcp.f32 %v1779_v57  ;;  %v7115_v11 = vpop.eup %7114  ;;  %v1783_v31 = vadd.f32 1.0, %v7113_v54 }
 0xcf4   :  { %7120 = vpow2.f32 %v5945_v21  ;;  %v7117_v28 = vpop.eup %7116  ;;  %v1784_v15 = vadd.f32 1.0, %v7115_v11  ;;  %v1823_v11 = vrot.slane %v8572_v36, 7 }
 0xcf5   :  { %1863 = vrot.lane.b32.xlu0 %v7103_v45, %s7821_s0  ;;  %7122 = vpow2.f32 %v5942_v35  ;;  %v1780_v5 = vadd.f32 1.0, %v7117_v28  ;;  %v1819_v35 = vrot.slane %v8575_v4, 7 }
 0xcf6   :  { %7124 = vpow2.f32 %v5946_v56 }
 0xcf7   :  { %1865 = vrot.lane.b32.xlu1 %v7107_v2, %s7821_s0  ;;  %7126 = vrcp.f32 %v1781_v19  ;;  %v1821_v19 = vrot.slane %v8585_v6, 7 }
 0xcf8   :  { %7128 = vrcp.f32 %v1783_v31 }
 0xcf9   :  { %7130 = vrcp.f32 %v1784_v15 }
 0xcfa   :  { %7132 = vrcp.f32 %v1780_v5  ;;  %v1820_v5 = vrot.slane %v8562_v55, 7  ;;  %v1822_v55 = vrot.slane %v8565_v63, 7 }
 0xcfd   :  { %v8646_v37 = vpop.eup %7118 }
 0xcfe   :  { %v7121_v33 = vpop.eup %7120  ;;  %v1835_v53 = vmul.f32 %v8646_v37, %v1819_v35 }
 0xcff   :  { %v7123_v16 = vpop.eup %7122  ;;  %v1785_v49 = vadd.f32 1.0, %v7121_v33 }
 0xd00   :  { %v1782_v3 = vadd.f32 1.0, %v7123_v16  ;;  %v7125_v20 = vpop.eup %7124 }
 0xd01   :  { %7134 = vrcp.f32 %v1785_v49  ;;  %v8650_v22 = vpop.eup %7126  ;;  %v1786_v18 = vadd.f32 1.0, %v7125_v20  ;;  %v1825_v49 = vrot.slane %v8594_v47, 7 }
 0xd02   :  { %7136 = vrcp.f32 %v1782_v3  ;;  %v8653_v52 = vpop.eup %7128  ;;  %v1837_v31 = vmul.f32 %v8650_v22, %v1821_v19 }
 0xd03   :  { %v8657_v38 = vpop.eup %7130  ;;  %7138 = vrcp.f32 %v1786_v18  ;;  %v1839_v15 = vmul.f32 %v8653_v52, %v1823_v11 }
 0xd04   :  { %v8661_v29 = vpop.eup %7132 }
 0xd0b   :  { %v8665_v2 = vpop.eup %7134 }
 0xd0c   :  { %v8669_v17 = vpop.eup %7136  ;;  %v1841_v18 = vmul.f32 %v8665_v2, %v1825_v49 }
 0xd0d   :  { %v8674_v59 = vpop.eup %7138  ;;  %v1838_v47 = vmul.f32 %v8669_v17, %v1822_v55 }
 0xd5b   :  { %v1852_v44 = vpop.permute.xlu0 %1851 }
 0xd5c   :  { %v1875_v32 = vmul.f32 %v8646_v37, %v1852_v44  ;;  %v1824_v44 = vrot.slane %v8582_v10, 7  ;;  %v1836_v10 = vmul.f32 %v8661_v29, %v1820_v5 }
 0xd5d   :  { %v1860_v51 = vpop.permute.xlu1 %1859 }
 0xd5e   :  { %1891 = vrot.lane.b32.xlu0 %v1875_v32, %s7822_s16  ;;  %v1879_v58 = vmul.f32 %v8653_v52, %v1860_v51  ;;  %v1840_v6 = vmul.f32 %v8657_v38, %v1824_v44 }
 0xd5f   :  { %v1856_v62 = vpop.permute.xlu0 %1855 }
 0xd60   :  { %v1877_v50 = vmul.f32 %v8650_v22, %v1856_v62  ;;  %1899 = vrot.lane.b32.xlu1 %v1879_v58, %s7822_s16 }
 0xd61   :  { %v1854_v45 = vpop.permute.xlu1 %1853 }
 0xd62   :  { %1895 = vrot.lane.b32.xlu0 %v1877_v50, %s7822_s16  ;;  %v1876_v61 = vmul.f32 %v8661_v29, %v1854_v45 }
 0xd63   :  { %v1862_v40 = vpop.permute.xlu0 %1861 }
 0xd64   :  { %v1880_v23 = vmul.f32 %v8657_v38, %v1862_v40  ;;  %1893 = vrot.lane.b32.xlu1 %v1876_v61, %s7822_s16  ;;  %v1826_v40 = vrot.slane %v8591_v7, 7 }
 0xd65   :  { %v1858_v9 = vpop.permute.xlu1 %1857 }
 0xd66   :  { %1901 = vrot.lane.b32.xlu0 %v1880_v23, %s7822_s16  ;;  %v1878_v60 = vmul.f32 %v8669_v17, %v1858_v9  ;;  %v1842_v45 = vmul.f32 %v8674_v59, %v1826_v40 }
 0xd67   :  { %v1864_v13 = vpop.permute.xlu0 %1863 }
 0xd68   :  { %v1881_v42 = vmul.f32 %v8665_v2, %v1864_v13  ;;  %1897 = vrot.lane.b32.xlu1 %v1878_v60, %s7822_s16 }
 0xd69   :  { %v1866_v57 = vpop.permute.xlu1 %1865 }
 0xd6a   :  { %1903 = vrot.lane.b32.xlu0 %v1881_v42, %s7822_s16  ;;  %v1882_v21 = vmul.f32 %v8674_v59, %v1866_v57 }
 0xd6c   :  { %1905 = vrot.lane.b32.xlu1 %v1882_v21, %s7822_s16 }
 0xdd0   :  { %v1892_v56 = vpop.permute.xlu0 %1891 }
 0xdd1   :  { %v8680_v54 = vadd.f32 %v1892_v56, %v1835_v53 }
 0xdd2   :  { %v1900_v4 = vpop.permute.xlu1 %1899 }
 0xdd3   :  { %7140 = vtanh.f32 %v8680_v54  ;;  %v8691_v16 = vadd.f32 %v1900_v4, %v1839_v15 }
 0xdd4   :  { %v1896_v28 = vpop.permute.xlu0 %1895 }
 0xdd5   :  { %v8688_v33 = vadd.f32 %v1896_v28, %v1837_v31 }
 0xdd6   :  { %v1894_v20 = vpop.permute.xlu1 %1893 }
 0xdd7   :  { %7142 = vtanh.f32 %v8688_v33  ;;  %v8702_v62 = vadd.f32 %v1894_v20, %v1836_v10 }
 0xdd8   :  { %v1902_v36 = vpop.permute.xlu0 %1901  ;;  %7144 = vtanh.f32 %v8691_v16 }
 0xdd9   :  { %v8699_v3 = vadd.f32 %v1902_v36, %v1840_v6 }
 0xdda   :  { %v1898_v58 = vpop.permute.xlu1 %1897 }
 0xddb   :  { %7146 = vtanh.f32 %v8699_v3  ;;  %v8711_v23 = vadd.f32 %v1898_v58, %v1838_v47 }
 0xddc   :  { %v1904_v50 = vpop.permute.xlu0 %1903  ;;  %7148 = vtanh.f32 %v8702_v62 }
 0xddd   :  { %v7141_v32 = vpop.eup %7140  ;;  %v8708_v51 = vadd.f32 %v1904_v50, %v1841_v18 }
 0xdde   :  { %1939 = vrot.lane.b32.xlu0 %v7141_v32, %s7821_s0  ;;  %v1906_v61 = vpop.permute.xlu1 %1905 }
 0xddf   :  { %7150 = vtanh.f32 %v8708_v51  ;;  %v8717_v42 = vadd.f32 %v1906_v61, %v1842_v45 }
 0xde0   :  { %7152 = vtanh.f32 %v8711_v23 }
 0xde1   :  { %v7143_v63 = vpop.eup %7142  ;;  %7154 = vtanh.f32 %v8717_v42 }
 0xde2   :  { %1943 = vrot.lane.b32.xlu0 %v7143_v63, %s7821_s0  ;;  %v7145_v13 = vpop.eup %7144 }
 0xde3   :  { %1947 = vrot.lane.b32.xlu1 %v7145_v13, %s7821_s0 }
 0xde5   :  { %v7147_v9 = vpop.eup %7146 }
 0xde6   :  { %1949 = vrot.lane.b32.xlu0 %v7147_v9, %s7821_s0  ;;  %v7149_v7 = vpop.eup %7148 }
 0xde7   :  { %1941 = vrot.lane.b32.xlu1 %v7149_v7, %s7821_s0 }
 0xde9   :  { %v7151_v60 = vpop.eup %7150 }
 0xdea   :  { %1951 = vrot.lane.b32.xlu0 %v7151_v60, %s7821_s0  ;;  %v7153_v57 = vpop.eup %7152 }
 0xdeb   :  { %1945 = vrot.lane.b32.xlu1 %v7153_v57, %s7821_s0  ;;  %v7155_v21 = vpop.eup %7154 }
 0xdef   :  { %1953 = vrot.lane.b32.xlu1 %v7155_v21, %s7821_s0 }
 0xe50   :  { %v1940_v35 = vpop.permute.xlu0 %1939 }
 0xe51   :  { %v1963_v31 = vmul.f32 %v8646_v37, %v1940_v35 }
 0xe53   :  { %v1979_v32 = vrot.slane %v1963_v31, 4 }
 0xe54   :  { %v1944_v53 = vpop.permute.xlu0 %1943 }
 0xe55   :  { %v1948_v56 = vpop.permute.xlu1 %1947  ;;  %v1965_v19 = vmul.f32 %v8650_v22, %v1944_v53 }
 0xe56   :  { %v1967_v18 = vmul.f32 %v8653_v52, %v1948_v56 }
 0xe57   :  { %v1982_v15 = vrot.slane %v1965_v19, 2 }
 0xe58   :  { %v1950_v11 = vpop.permute.xlu0 %1949 }
 0xe59   :  { %v1942_v28 = vpop.permute.xlu1 %1941  ;;  %v1968_v6 = vmul.f32 %v8657_v38, %v1950_v11 }
 0xe5a   :  { %v1964_v44 = vmul.f32 %v8661_v29, %v1942_v28 }
 0xe5b   :  { %v1987_v37 = vrot.slane %v1968_v6, 7 }
 0xe5c   :  { %v1952_v4 = vpop.permute.xlu0 %1951  ;;  %v1980_v5 = vrot.slane %v1964_v44, 3 }
 0xe5d   :  { %v1946_v36 = vpop.permute.xlu1 %1945  ;;  %v1969_v49 = vmul.f32 %v8665_v2, %v1952_v4 }
 0xe5e   :  { %v1981_v10 = vsel %vm629_vm3, %v1980_v5, %v1979_v32  ;;  %v1966_v20 = vmul.f32 %v8669_v17, %v1946_v36 }
 0xe5f   :  { %v1983_v22 = vsel %vm632_vm4, %v1982_v15, %v1981_v10  ;;  %v1989_v50 = vrot.slane %v1969_v49, 6 }
 0xe60   :  { %v1984_v55 = vrot.slane %v1966_v20, 1 }
 0xe61   :  { %v1954_v29 = vpop.permute.xlu1 %1953 }
 0xe62   :  { %v1985_v47 = vsel %vm635_vm5, %v1984_v55, %v1983_v22  ;;  %v1970_v58 = vmul.f32 %v8674_v59, %v1954_v29 }
 0xe63   :  { %v1986_v38 = vsel %vm638_vm6, %v1967_v18, %v1985_v47 }
 0xe64   :  { %v1988_v2 = vsel %vm641_vm7, %v1987_v37, %v1986_v38  ;;  %v1991_v40 = vrot.slane %v1970_v58, 5 }
 0xe65   :  { %v1990_v63 = vsel %vm644_vm8, %v1989_v50, %v1988_v2 }
 0xe66   :  { %v1992_v17 = vsel %vm647_vm9, %v1991_v40, %v1990_v63 }
 0xe67   :  { %1993 = vrot.lane.b32.xlu0 %v1992_v17, %s7822_s16 }
 0xed9   :  { %v8742_v45 = vpop.permute.xlu0 %1993 }
 0xeda   :  { %6277 = vmatmul.mubr.msk.f32.vlgmr.msra.gmra.mrb[6].mxu1 %vm330_vm10, %v8742_v45 }
 0xedb   :  { %6544 = vmatpush3.bf16.msra.mxu1 %v8085_v8  ;;  %6298 = vmatprep.mubr.msk.f32.mxu1 %vm7819_vm0, %v7820_v1 }
 0xedc   :  { %6545 = vmatprep.subr.bf16.mxu1 %v7818_v0 }
 0xedf   :  { %6547 = vmatpush3.bf16.msra.mxu1 %v8100_v12 }
 0xfad   :  { %v2063_v52 = vpop.f32.mrb[6].mxu1 }
 0xfae   :  { %v2068_v59 = vrot.slane %v2063_v52, 3  ;;  %v6278_v61 = vpop.f32.mrb[7].mxu1  ;;  %v2069_v9 = vrot.slane %v2063_v52, 4  ;;  %v2070_v7 = vrot.slane %v2063_v52, 5  ;;  %v2071_v60 = vrot.slane %v2063_v52, 6 }
 0xfaf   :  { %v2072_v21 = vrot.slane %v2063_v52, 7  ;;  %v2073_v35 = vrot.slane %v2063_v52, 1  ;;  %v2074_v19 = vrot.slane %v2063_v52, 2  ;;  %v2088_v31 = vadd.f32 %v2063_v52, %v8146_v39 }
 0xfb0   :  { %v2083_v13 = vadd.f32 %v2068_v59, %v8135_v24  ;;  %v2084_v57 = vadd.f32 %v2069_v9, %v8137_v27  ;;  %v2085_v8 = vadd.f32 %v2070_v7, %v8142_v34  ;;  %v2086_v53 = vadd.f32 %v2071_v60, %v8139_v30 }
 0xfb1   :  { %v2087_v12 = vadd.f32 %v2072_v21, %v8149_v41  ;;  %v2089_v11 = vadd.f32 %v2073_v35, %v8154_v46  ;;  %v2090_v28 = vadd.f32 %v2074_v19, %v8151_v43  ;;  %v5953_v50 = vmul.f32 -1.442695, %v2088_v31 }
 0xfb2   :  { %7156 = vtanh.f32 %v2083_v13  ;;  %v5948_v49 = vmul.f32 -1.442695, %v2083_v13  ;;  %v5949_v10 = vmul.f32 -1.442695, %v2084_v57  ;;  %v5950_v20 = vmul.f32 -1.442695, %v2085_v8 }
 0xfb3   :  { %7158 = vtanh.f32 %v2084_v57  ;;  %v5951_v22 = vmul.f32 -1.442695, %v2086_v53  ;;  %v5952_v37 = vmul.f32 -1.442695, %v2087_v12  ;;  %v5954_v18 = vmul.f32 -1.442695, %v2089_v11 }
 0xfb4   :  { %7160 = vtanh.f32 %v2085_v8  ;;  %v5955_v47 = vmul.f32 -1.442695, %v2090_v28 }
 0xfb5   :  { %7162 = vtanh.f32 %v2086_v53 }
 0xfb6   :  { %7164 = vtanh.f32 %v2087_v12 }
 0xfb7   :  { %7166 = vtanh.f32 %v2089_v11 }
 0xfb8   :  { %7168 = vtanh.f32 %v2088_v31 }
 0xfb9   :  { %7170 = vtanh.f32 %v2090_v28 }
 0xfba   :  { %7172 = vpow2.f32 %v5948_v49 }
 0xfbb   :  { %7174 = vpow2.f32 %v5949_v10 }
 0xfbc   :  { %v7157_v56 = vpop.eup %7156  ;;  %7176 = vpow2.f32 %v5950_v20 }
 0xfbd   :  { %2187 = vrot.lane.b32.xlu1 %v7157_v56, %s7821_s0  ;;  %v7159_v44 = vpop.eup %7158  ;;  %7178 = vpow2.f32 %v5951_v22 }
 0xfbe   :  { %v7161_v15 = vpop.eup %7160  ;;  %2189 = vrot.lane.b32.xlu0 %v7159_v44, %s7821_s0  ;;  %7180 = vpow2.f32 %v5952_v37 }
 0xfbf   :  { %v7163_v4 = vpop.eup %7162  ;;  %7182 = vpow2.f32 %v5954_v18 }
 0xfc0   :  { %v7165_v32 = vpop.eup %7164 }
 0xfc1   :  { %2191 = vrot.lane.b32.xlu1 %v7161_v15, %s7821_s0  ;;  %v7167_v5 = vpop.eup %7166 }
 0xfc2   :  { %2193 = vrot.lane.b32.xlu0 %v7163_v4, %s7821_s0  ;;  %v7169_v6 = vpop.eup %7168 }
 0xfc3   :  { %v7171_v36 = vpop.eup %7170 }
 0xfc4   :  { %v7173_v55 = vpop.eup %7172 }
 0xfc5   :  { %2195 = vrot.lane.b32.xlu1 %v7165_v32, %s7821_s0  ;;  %v2115_v29 = vadd.f32 1.0, %v7173_v55  ;;  %v7175_v58 = vpop.eup %7174 }
 0xfc6   :  { %2199 = vrot.lane.b32.xlu0 %v7167_v5, %s7821_s0  ;;  %v7177_v38 = vpop.eup %7176  ;;  %v2116_v2 = vadd.f32 1.0, %v7175_v58 }
 0xfc7   :  { %7184 = vrcp.f32 %v2115_v29  ;;  %v7179_v40 = vpop.eup %7178  ;;  %v2117_v63 = vadd.f32 1.0, %v7177_v38  ;;  %v2155_v29 = vrot.slane %v8680_v54, 7  ;;  %v2156_v38 = vrot.slane %v8702_v62, 7 }
 0xfc8   :  { %7186 = vpow2.f32 %v5953_v50  ;;  %v7181_v17 = vpop.eup %7180  ;;  %v2118_v59 = vadd.f32 1.0, %v7179_v40 }
 0xfc9   :  { %2197 = vrot.lane.b32.xlu1 %v7169_v6, %s7821_s0  ;;  %7188 = vpow2.f32 %v5955_v47  ;;  %v7183_v52 = vpop.eup %7182  ;;  %v2119_v9 = vadd.f32 1.0, %v7181_v17 }
 0xfca   :  { %2201 = vrot.lane.b32.xlu0 %v7171_v36, %s7821_s0  ;;  %7190 = vrcp.f32 %v2116_v2  ;;  %v2121_v57 = vadd.f32 1.0, %v7183_v52  ;;  %v2157_v2 = vrot.slane %v8688_v33, 7  ;;  %v2158_v52 = vrot.slane %v8711_v23, 7 }
 0xfcb   :  { %7192 = vrcp.f32 %v2117_v63 }
 0xfcc   :  { %7194 = vrcp.f32 %v2118_v59 }
 0xfcd   :  { %7196 = vrcp.f32 %v2119_v9 }
 0xfce   :  { %7198 = vrcp.f32 %v2121_v57  ;;  %v2161_v57 = vrot.slane %v8708_v51, 7  ;;  %v2162_v51 = vrot.slane %v8717_v42, 7 }
 0xfd1   :  { %v8767_v61 = vpop.eup %7184 }
 0xfd2   :  { %v7187_v7 = vpop.eup %7186  ;;  %v2171_v50 = vmul.f32 %v8767_v61, %v2155_v29 }
 0xfd3   :  { %v7189_v21 = vpop.eup %7188  ;;  %v2120_v8 = vadd.f32 1.0, %v7187_v7 }
 0xfd4   :  { %v2122_v35 = vadd.f32 1.0, %v7189_v21  ;;  %v8771_v53 = vpop.eup %7190 }
 0xfd5   :  { %7200 = vrcp.f32 %v2120_v8  ;;  %v8773_v12 = vpop.eup %7192  ;;  %v2172_v40 = vmul.f32 %v8771_v53, %v2156_v38 }
 0xfd6   :  { %7202 = vrcp.f32 %v2122_v35  ;;  %v8778_v28 = vpop.eup %7194  ;;  %v2173_v17 = vmul.f32 %v8773_v12, %v2157_v2 }
 0xfd7   :  { %v8781_v15 = vpop.eup %7196  ;;  %v2174_v62 = vmul.f32 %v8778_v28, %v2158_v52 }
 0xfd8   :  { %v8786_v6 = vpop.eup %7198 }
 0xfd9   :  { %v2177_v35 = vmul.f32 %v8786_v6, %v2161_v57 }
 0xfdf   :  { %v8789_v49 = vpop.eup %7200 }
 0xfe0   :  { %v8794_v55 = vpop.eup %7202 }
0x102f   :  { %v2188_v13 = vpop.permute.xlu1 %2187 }
0x1030   :  { %v2211_v60 = vmul.f32 %v8767_v61, %v2188_v13  ;;  %v2190_v56 = vpop.permute.xlu0 %2189  ;;  %v2159_v13 = vrot.slane %v8691_v16, 7  ;;  %v2160_v16 = vrot.slane %v8699_v3, 7  ;;  %v2178_v3 = vmul.f32 %v8794_v55, %v2162_v51 }
0x1031   :  { %v2212_v19 = vmul.f32 %v8771_v53, %v2190_v56 }
0x1032   :  { %2227 = vrot.lane.b32.xlu1 %v2211_v60, %s7822_s16  ;;  %v2175_v60 = vmul.f32 %v8781_v15, %v2159_v13 }
0x1033   :  { %v2192_v11 = vpop.permute.xlu1 %2191  ;;  %2229 = vrot.lane.b32.xlu0 %v2212_v19, %s7822_s16  ;;  %v2176_v19 = vmul.f32 %v8789_v49, %v2160_v16 }
0x1034   :  { %v2213_v31 = vmul.f32 %v8773_v12, %v2192_v11  ;;  %v2194_v44 = vpop.permute.xlu0 %2193 }
0x1035   :  { %v2214_v4 = vmul.f32 %v8778_v28, %v2194_v44 }
0x1036   :  { %2231 = vrot.lane.b32.xlu1 %v2213_v31, %s7822_s16 }
0x1037   :  { %v2196_v32 = vpop.permute.xlu1 %2195  ;;  %2233 = vrot.lane.b32.xlu0 %v2214_v4, %s7822_s16 }
0x1038   :  { %v2215_v5 = vmul.f32 %v8781_v15, %v2196_v32  ;;  %v2200_v36 = vpop.permute.xlu0 %2199 }
0x1039   :  { %v2217_v10 = vmul.f32 %v8786_v6, %v2200_v36 }
0x103a   :  { %2235 = vrot.lane.b32.xlu1 %v2215_v5, %s7822_s16 }
0x103b   :  { %v2198_v20 = vpop.permute.xlu1 %2197  ;;  %2239 = vrot.lane.b32.xlu0 %v2217_v10, %s7822_s16 }
0x103c   :  { %v2216_v22 = vmul.f32 %v8789_v49, %v2198_v20  ;;  %v2202_v37 = vpop.permute.xlu0 %2201  ;;  %v3002_v20 = vld [vmem:[#allocation6 + $0x8] sm:$0xff] }
0x103d   :  { %v2218_v18 = vmul.f32 %v8794_v55, %v2202_v37 }
0x103e   :  { %2237 = vrot.lane.b32.xlu1 %v2216_v22, %s7822_s16  ;;  %v3004_v22 = vld [vmem:[#allocation6 + $0x18] sm:$0xff] }
0x103f   :  { %2241 = vrot.lane.b32.xlu0 %v2218_v18, %s7822_s16  ;;  %v6548_v37 = vpack.c.bf16 %v3004_v22, %v3002_v20  ;;  %v3008_v20 = vld [vmem:[#allocation6 + $0x38] sm:$0xff] }
0x1041   :  { %6549 = vmatprep.subr.bf16.mxu0 %v6548_v37 }
0x10a4   :  { %v2228_v47 = vpop.permute.xlu1 %2227 }
0x10a5   :  { %v8801_v58 = vadd.f32 %v2228_v47, %v2171_v50  ;;  %v2230_v63 = vpop.permute.xlu0 %2229 }
0x10a6   :  { %v8809_v59 = vadd.f32 %v2230_v63, %v2172_v40 }
0x10a7   :  { %7204 = vtanh.f32 %v8801_v58 }
0x10a8   :  { %v2232_v54 = vpop.permute.xlu1 %2231  ;;  %7206 = vtanh.f32 %v8809_v59 }
0x10a9   :  { %v8812_v9 = vadd.f32 %v2232_v54, %v2173_v17  ;;  %v2234_v33 = vpop.permute.xlu0 %2233 }
0x10aa   :  { %v8819_v23 = vadd.f32 %v2234_v33, %v2174_v62 }
0x10ab   :  { %7208 = vtanh.f32 %v8812_v9 }
0x10ac   :  { %v2236_v21 = vpop.permute.xlu1 %2235  ;;  %7210 = vtanh.f32 %v8819_v23 }
0x10ad   :  { %v8823_v8 = vadd.f32 %v2236_v21, %v2175_v60  ;;  %v2240_v56 = vpop.permute.xlu0 %2239 }
0x10ae   :  { %v8830_v11 = vadd.f32 %v2240_v56, %v2177_v35 }
0x10af   :  { %7212 = vtanh.f32 %v8823_v8 }
0x10b0   :  { %v2238_v31 = vpop.permute.xlu1 %2237  ;;  %7214 = vtanh.f32 %v8830_v11 }
0x10b1   :  { %v7205_v7 = vpop.eup %7204  ;;  %v8832_v44 = vadd.f32 %v2238_v31, %v2176_v19  ;;  %v2242_v4 = vpop.permute.xlu0 %2241 }
0x10b2   :  { %2275 = vrot.lane.b32.xlu1 %v7205_v7, %s7821_s0  ;;  %v7207_v32 = vpop.eup %7206  ;;  %v8837_v5 = vadd.f32 %v2242_v4, %v2178_v3 }
0x10b3   :  { %7216 = vtanh.f32 %v8832_v44  ;;  %2277 = vrot.lane.b32.xlu0 %v7207_v32, %s7821_s0 }
0x10b4   :  { %7218 = vtanh.f32 %v8837_v5 }
0x10b5   :  { %v7209_v36 = vpop.eup %7208 }
0x10b6   :  { %2279 = vrot.lane.b32.xlu1 %v7209_v36, %s7821_s0  ;;  %v7211_v42 = vpop.eup %7210 }
0x10b7   :  { %2281 = vrot.lane.b32.xlu0 %v7211_v42, %s7821_s0  ;;  %v3003_v42 = vld [vmem:[#allocation6 + $0x10] sm:$0xff] }
0x10b9   :  { %v7213_v10 = vpop.eup %7212 }
0x10ba   :  { %2283 = vrot.lane.b32.xlu1 %v7213_v10, %s7821_s0  ;;  %v7215_v18 = vpop.eup %7214  ;;  %v3006_v10 = vld [vmem:[#allocation6 + $0x28] sm:$0xff] }
0x10bb   :  { %2287 = vrot.lane.b32.xlu0 %v7215_v18, %s7821_s0  ;;  %v6552_v37 = vpack.c.bf16 %v3008_v20, %v3006_v10  ;;  %v3007_v18 = vld [vmem:[#allocation6 + $0x30] sm:$0xff] }
0x10bd   :  { %v7217_v29 = vpop.eup %7216 }
0x10be   :  { %2285 = vrot.lane.b32.xlu1 %v7217_v29, %s7821_s0  ;;  %v7219_v50 = vpop.eup %7218 }
0x10bf   :  { %2289 = vrot.lane.b32.xlu0 %v7219_v50, %s7821_s0 }
0x1124   :  { %v2276_v47 = vpop.permute.xlu1 %2275 }
0x1125   :  { %v2299_v38 = vmul.f32 %v8767_v61, %v2276_v47  ;;  %v2278_v2 = vpop.permute.xlu0 %2277 }
0x1126   :  { %v2300_v40 = vmul.f32 %v8771_v53, %v2278_v2 }
0x1127   :  { %v2315_v63 = vrot.slane %v2299_v38, 5 }
0x1128   :  { %v2280_v17 = vpop.permute.xlu1 %2279  ;;  %v2316_v54 = vrot.slane %v2300_v40, 4 }
0x1129   :  { %v2301_v52 = vmul.f32 %v8773_v12, %v2280_v17  ;;  %v2282_v13 = vpop.permute.xlu0 %2281 }
0x112a   :  { %v2317_v7 = vsel %vm629_vm3, %v2316_v54, %v2315_v63  ;;  %v2302_v33 = vmul.f32 %v8778_v28, %v2282_v13 }
0x112b   :  { %v2318_v62 = vrot.slane %v2301_v52, 3 }
0x112c   :  { %v2284_v60 = vpop.permute.xlu1 %2283  ;;  %v2320_v61 = vrot.slane %v2302_v33, 2 }
0x112d   :  { %v2319_v57 = vsel %vm632_vm4, %v2318_v62, %v2317_v7  ;;  %v2303_v21 = vmul.f32 %v8781_v15, %v2284_v60  ;;  %v2288_v16 = vpop.permute.xlu0 %2287 }
0x112e   :  { %v2305_v53 = vmul.f32 %v8786_v6, %v2288_v16  ;;  %v2321_v56 = vsel %vm635_vm5, %v2320_v61, %v2319_v57  ;;  %v3001_v6 = vld [vmem:[#allocation6] sm:$0xff] }
0x112f   :  { %v2322_v35 = vrot.slane %v2303_v21, 1  ;;  %v6550_v22 = vpack.c.bf16 %v3003_v42, %v3001_v6 }
0x1130   :  { %v2286_v12 = vpop.permute.xlu1 %2285  ;;  %v2325_v31 = vrot.slane %v2305_v53, 7 }
0x1131   :  { %v2323_v19 = vsel %vm638_vm6, %v2322_v35, %v2321_v56  ;;  %v2304_v51 = vmul.f32 %v8789_v49, %v2286_v12  ;;  %v2290_v3 = vpop.permute.xlu0 %2289  ;;  %v3005_v49 = vld [vmem:[#allocation6 + $0x20] sm:$0xff] }
0x1132   :  { %v2306_v4 = vmul.f32 %v8794_v55, %v2290_v3  ;;  %v6554_v55 = vpack.c.bf16 %v3007_v18, %v3005_v49 }
0x1133   :  { %v2324_v28 = vsel %vm641_vm7, %v2304_v51, %v2323_v19 }
0x1134   :  { %v2326_v15 = vsel %vm644_vm8, %v2325_v31, %v2324_v28  ;;  %v2327_v32 = vrot.slane %v2306_v4, 6 }
0x1136   :  { %v2328_v36 = vsel %vm647_vm9, %v2327_v32, %v2326_v15 }
0x1137   :  { %2329 = vrot.lane.b32.xlu1 %v2328_v36, %s7822_s16 }
0x11a9   :  { %v2330_v29 = vpop.permute.xlu1 %2329 }
0x11aa   :  { %6288 = vmatmul.mubr.msk.f32.vlgmr.msra.gmra.mrb[12].mxu0 %vm330_vm10, %v2330_v29 }
0x11ab   :  { %6551 = vmatpush1.bf16.msra.mxu0 %v6550_v22  ;;  %3089 = vmatprep.mubr.f32.mxu0 %v7820_v1 }
0x11ac   :  { %6553 = vmatprep.subr.bf16.mxu0 %v6552_v37 }
0x11af   :  { %6555 = vmatpush1.bf16.msra.mxu0 %v6554_v55 }
0x11b2   :  { %5974 = vmatmul.mubr.msk.f32.vlgmr.msra.gmra.mrb[14].mxu0 %vm330_vm10, %v8255_v48 }
0x11b3   :  { %3095 = vmatprep.mubr.f32.mxu0 %v7820_v1 }
0x11b6   :  { %5975 = vmatmul.mubr.msk.f32.gmra.mrb[16].mxu0 %vm330_vm10, %v8377_v26 }
0x11b7   :  { %3101 = vmatprep.mubr.f32.mxu0 %v7820_v1 }
0x11ba   :  { %5976 = vmatmul.mubr.msk.f32.gmra.mrb[18].mxu0 %vm330_vm10, %v8499_v25 }
0x11bb   :  { %3107 = vmatprep.mubr.f32.mxu0 %v7820_v1 }
0x11be   :  { %5977 = vmatmul.mubr.msk.f32.gmra.mrb[20].mxu0 %vm330_vm10, %v8621_v14 }
0x11bf   :  { %3113 = vmatprep.mubr.f32.mxu0 %v7820_v1 }
0x11c2   :  { %5978 = vmatmul.mubr.msk.f32.gmra.mrb[22].mxu0 %vm330_vm10, %v8742_v45 }
0x11c3   :  { %3119 = vmatprep.mubr.f32.mxu0 %v7820_v1 }
0x11c6   :  { %5979 = vmatmul.mubr.msk.f32.gmra.mrb[24].mxu0 %vm330_vm10, %v2330_v29 }
0x11c7   :  { %3125 = vmatprep.mubr.f32.mxu0 %v7820_v1 }
0x127d   :  { %v2399_v48 = vpop.f32.mrb[12].mxu0 }
0x127e   :  { %v2404_v26 = vrot.slane %v2399_v48, 2  ;;  %v6289_v50 = vpop.f32.mrb[13].mxu0  ;;  %v2405_v47 = vrot.slane %v2399_v48, 3  ;;  %v2406_v38 = vrot.slane %v2399_v48, 4  ;;  %v2407_v14 = vrot.slane %v2399_v48, 5 }
0x127f   :  { %v2408_v40 = vrot.slane %v2399_v48, 6  ;;  %v2409_v63 = vrot.slane %v2399_v48, 7  ;;  %v2410_v54 = vrot.slane %v2399_v48, 1  ;;  %v2425_v33 = vadd.f32 %v2399_v48, %v8154_v46 }
0x1280   :  { %v2419_v25 = vadd.f32 %v2404_v26, %v8135_v24  ;;  %v2420_v2 = vadd.f32 %v2405_v47, %v8137_v27  ;;  %v2421_v45 = vadd.f32 %v2406_v38, %v8142_v34  ;;  %v2422_v17 = vadd.f32 %v2407_v14, %v8139_v30 }
0x1281   :  { %v2423_v13 = vadd.f32 %v2408_v40, %v8149_v41  ;;  %v2424_v62 = vadd.f32 %v2409_v63, %v8146_v39  ;;  %v2426_v7 = vadd.f32 %v2410_v54, %v8151_v43  ;;  %v5963_v32 = vmul.f32 -1.442695, %v2425_v33 }
0x1282   :  { %7220 = vtanh.f32 %v2419_v25  ;;  %v5957_v56 = vmul.f32 -1.442695, %v2419_v25  ;;  %v5958_v12 = vmul.f32 -1.442695, %v2420_v2  ;;  %v5959_v19 = vmul.f32 -1.442695, %v2421_v45 }
0x1283   :  { %7222 = vtanh.f32 %v2420_v2  ;;  %v5960_v51 = vmul.f32 -1.442695, %v2422_v17  ;;  %v5961_v3 = vmul.f32 -1.442695, %v2423_v13  ;;  %v5962_v28 = vmul.f32 -1.442695, %v2424_v62 }
0x1284   :  { %7224 = vtanh.f32 %v2421_v45  ;;  %v5964_v15 = vmul.f32 -1.442695, %v2426_v7 }
0x1285   :  { %7226 = vtanh.f32 %v2422_v17 }
0x1286   :  { %7228 = vtanh.f32 %v2423_v13 }
0x1287   :  { %7230 = vtanh.f32 %v2424_v62 }
0x1288   :  { %7232 = vtanh.f32 %v2426_v7 }
0x1289   :  { %7234 = vtanh.f32 %v2425_v33 }
0x128a   :  { %7236 = vpow2.f32 %v5957_v56 }
0x128b   :  { %7238 = vpow2.f32 %v5958_v12 }
0x128c   :  { %v7221_v52 = vpop.eup %7220  ;;  %7240 = vpow2.f32 %v5959_v19  ;;  %v2491_v19 = vrot.slane %v8801_v58, 7 }
0x128d   :  { %2523 = vrot.lane.b32.xlu0 %v7221_v52, %s7821_s0  ;;  %v7223_v60 = vpop.eup %7222  ;;  %7242 = vpow2.f32 %v5960_v51 }
0x128e   :  { %v7225_v57 = vpop.eup %7224  ;;  %2525 = vrot.lane.b32.xlu1 %v7223_v60, %s7821_s0  ;;  %7244 = vpow2.f32 %v5961_v3 }
0x128f   :  { %v7227_v21 = vpop.eup %7226  ;;  %7246 = vpow2.f32 %v5962_v28  ;;  %v2492_v28 = vrot.slane %v8809_v59, 7 }
0x1290   :  { %v7229_v61 = vpop.eup %7228 }
0x1291   :  { %2527 = vrot.lane.b32.xlu0 %v7225_v57, %s7821_s0  ;;  %v7231_v16 = vpop.eup %7230 }
0x1292   :  { %2529 = vrot.lane.b32.xlu1 %v7227_v21, %s7821_s0  ;;  %v7233_v35 = vpop.eup %7232 }
0x1293   :  { %v7235_v53 = vpop.eup %7234 }
0x1294   :  { %v7237_v31 = vpop.eup %7236 }
0x1295   :  { %2531 = vrot.lane.b32.xlu0 %v7229_v61, %s7821_s0  ;;  %v2451_v4 = vadd.f32 1.0, %v7237_v31  ;;  %v7239_v36 = vpop.eup %7238 }
0x1296   :  { %2533 = vrot.lane.b32.xlu1 %v7231_v16, %s7821_s0  ;;  %v7241_v6 = vpop.eup %7240  ;;  %v2452_v42 = vadd.f32 1.0, %v7239_v36 }
0x1297   :  { %7248 = vrcp.f32 %v2451_v4  ;;  %v7243_v10 = vpop.eup %7242  ;;  %v2453_v20 = vadd.f32 1.0, %v7241_v6  ;;  %v2493_v4 = vrot.slane %v8812_v9, 7  ;;  %v2494_v6 = vrot.slane %v8819_v23, 7 }
0x1298   :  { %7250 = vpow2.f32 %v5964_v15  ;;  %v7245_v22 = vpop.eup %7244  ;;  %v2454_v49 = vadd.f32 1.0, %v7243_v10  ;;  %v2495_v10 = vrot.slane %v8823_v8, 7  ;;  %v2498_v8 = vrot.slane %v8837_v5, 7 }
0x1299   :  { %2537 = vrot.lane.b32.xlu0 %v7233_v35, %s7821_s0  ;;  %7252 = vpow2.f32 %v5963_v32  ;;  %v7247_v37 = vpop.eup %7246  ;;  %v2455_v55 = vadd.f32 1.0, %v7245_v22 }
0x129a   :  { %2535 = vrot.lane.b32.xlu1 %v7235_v53, %s7821_s0  ;;  %7254 = vrcp.f32 %v2452_v42  ;;  %v2456_v50 = vadd.f32 1.0, %v7247_v37 }
0x129b   :  { %7256 = vrcp.f32 %v2453_v20 }
0x129c   :  { %7258 = vrcp.f32 %v2454_v49  ;;  %v2496_v49 = vrot.slane %v8832_v44, 7  ;;  %v2497_v44 = vrot.slane %v8830_v11, 7 }
0x129d   :  { %7260 = vrcp.f32 %v2455_v55 }
0x129e   :  { %7262 = vrcp.f32 %v2456_v50 }
0x12a1   :  { %v8898_v18 = vpop.eup %7248 }
0x12a2   :  { %v7251_v48 = vpop.eup %7250  ;;  %v2507_v51 = vmul.f32 %v8898_v18, %v2491_v19 }
0x12a3   :  { %v7253_v25 = vpop.eup %7252  ;;  %v2458_v47 = vadd.f32 1.0, %v7251_v48 }
0x12a4   :  { %v2457_v38 = vadd.f32 1.0, %v7253_v25  ;;  %v8902_v14 = vpop.eup %7254 }
0x12a5   :  { %7264 = vrcp.f32 %v2458_v47  ;;  %v8904_v40 = vpop.eup %7256  ;;  %v2508_v15 = vmul.f32 %v8902_v14, %v2492_v28 }
0x12a6   :  { %7266 = vrcp.f32 %v2457_v38  ;;  %v8909_v52 = vpop.eup %7258  ;;  %v2509_v36 = vmul.f32 %v8904_v40, %v2493_v4 }
0x12a7   :  { %v8912_v13 = vpop.eup %7260  ;;  %v2510_v59 = vmul.f32 %v8909_v52, %v2494_v6 }
0x12a8   :  { %v8917_v60 = vpop.eup %7262  ;;  %v2511_v37 = vmul.f32 %v8912_v13, %v2495_v10 }
0x12a9   :  { %v2512_v48 = vmul.f32 %v8917_v60, %v2496_v49 }
0x12af   :  { %v8920_v21 = vpop.eup %7264 }
0x12b0   :  { %v8925_v53 = vpop.eup %7266  ;;  %v2514_v50 = vmul.f32 %v8920_v21, %v2498_v8 }
0x12b1   :  { %v2513_v5 = vmul.f32 %v8925_v53, %v2497_v44 }
0x12ff   :  { %v2524_v29 = vpop.permute.xlu0 %2523 }
0x1300   :  { %v2547_v26 = vmul.f32 %v8898_v18, %v2524_v29  ;;  %v2526_v2 = vpop.permute.xlu1 %2525 }
0x1301   :  { %v2548_v45 = vmul.f32 %v8902_v14, %v2526_v2 }
0x1302   :  { %2563 = vrot.lane.b32.xlu0 %v2547_v26, %s7822_s16 }
0x1303   :  { %v2528_v63 = vpop.permute.xlu0 %2527  ;;  %2565 = vrot.lane.b32.xlu1 %v2548_v45, %s7822_s16 }
0x1304   :  { %v2549_v17 = vmul.f32 %v8904_v40, %v2528_v63  ;;  %v2530_v54 = vpop.permute.xlu1 %2529 }
0x1305   :  { %v2550_v62 = vmul.f32 %v8909_v52, %v2530_v54 }
0x1306   :  { %2567 = vrot.lane.b32.xlu0 %v2549_v17, %s7822_s16 }
0x1307   :  { %v2532_v7 = vpop.permute.xlu0 %2531  ;;  %2569 = vrot.lane.b32.xlu1 %v2550_v62, %s7822_s16 }
0x1308   :  { %v2551_v33 = vmul.f32 %v8912_v13, %v2532_v7  ;;  %v2534_v57 = vpop.permute.xlu1 %2533 }
0x1309   :  { %v2552_v61 = vmul.f32 %v8917_v60, %v2534_v57 }
0x130a   :  { %2571 = vrot.lane.b32.xlu0 %v2551_v33, %s7822_s16 }
0x130b   :  { %v2538_v16 = vpop.permute.xlu0 %2537  ;;  %2573 = vrot.lane.b32.xlu1 %v2552_v61, %s7822_s16 }
0x130c   :  { %v2554_v35 = vmul.f32 %v8920_v21, %v2538_v16  ;;  %v2536_v56 = vpop.permute.xlu1 %2535 }
0x130d   :  { %v2553_v12 = vmul.f32 %v8925_v53, %v2536_v56 }
0x130e   :  { %2577 = vrot.lane.b32.xlu0 %v2554_v35, %s7822_s16 }
0x130f   :  { %2575 = vrot.lane.b32.xlu1 %v2553_v12, %s7822_s16 }
0x1374   :  { %v2564_v31 = vpop.permute.xlu0 %2563 }
0x1375   :  { %v8932_v3 = vadd.f32 %v2564_v31, %v2507_v51  ;;  %v2566_v32 = vpop.permute.xlu1 %2565 }
0x1376   :  { %v8940_v42 = vadd.f32 %v2566_v32, %v2508_v15 }
0x1377   :  { %7268 = vtanh.f32 %v8932_v3 }
0x1378   :  { %v2568_v58 = vpop.permute.xlu0 %2567  ;;  %7270 = vtanh.f32 %v8940_v42 }
0x1379   :  { %v8943_v20 = vadd.f32 %v2568_v58, %v2509_v36  ;;  %v2570_v9 = vpop.permute.xlu1 %2569 }
0x137a   :  { %v8950_v23 = vadd.f32 %v2570_v9, %v2510_v59 }
0x137b   :  { %7272 = vtanh.f32 %v8943_v20 }
0x137c   :  { %v2572_v29 = vpop.permute.xlu0 %2571  ;;  %7274 = vtanh.f32 %v8950_v23 }
0x137d   :  { %v8954_v55 = vadd.f32 %v2572_v29, %v2511_v37  ;;  %v2574_v26 = vpop.permute.xlu1 %2573 }
0x137e   :  { %v8961_v25 = vadd.f32 %v2574_v26, %v2512_v48 }
0x137f   :  { %7276 = vtanh.f32 %v8954_v55 }
0x1380   :  { %v2578_v47 = vpop.permute.xlu0 %2577  ;;  %7278 = vtanh.f32 %v8961_v25 }
0x1381   :  { %v7269_v22 = vpop.eup %7268  ;;  %v8963_v38 = vadd.f32 %v2578_v47, %v2514_v50  ;;  %v2576_v2 = vpop.permute.xlu1 %2575 }
0x1382   :  { %2611 = vrot.lane.b32.xlu0 %v7269_v22, %s7821_s0  ;;  %v7271_v45 = vpop.eup %7270  ;;  %v8968_v63 = vadd.f32 %v2576_v2, %v2513_v5 }
0x1383   :  { %7280 = vtanh.f32 %v8963_v38  ;;  %2613 = vrot.lane.b32.xlu1 %v7271_v45, %s7821_s0 }
0x1384   :  { %7282 = vtanh.f32 %v8968_v63 }
0x1385   :  { %v7273_v17 = vpop.eup %7272 }
0x1386   :  { %2615 = vrot.lane.b32.xlu0 %v7273_v17, %s7821_s0  ;;  %v7275_v11 = vpop.eup %7274 }
0x1387   :  { %2617 = vrot.lane.b32.xlu1 %v7275_v11, %s7821_s0 }
0x1389   :  { %v7277_v54 = vpop.eup %7276 }
0x138a   :  { %2619 = vrot.lane.b32.xlu0 %v7277_v54, %s7821_s0  ;;  %v7279_v62 = vpop.eup %7278 }
0x138b   :  { %2621 = vrot.lane.b32.xlu1 %v7279_v62, %s7821_s0 }
0x138d   :  { %v7281_v7 = vpop.eup %7280 }
0x138e   :  { %2625 = vrot.lane.b32.xlu0 %v7281_v7, %s7821_s0  ;;  %v7283_v33 = vpop.eup %7282 }
0x138f   :  { %2623 = vrot.lane.b32.xlu1 %v7283_v33, %s7821_s0 }
0x13f4   :  { %v2612_v57 = vpop.permute.xlu0 %2611 }
0x13f5   :  { %v2635_v61 = vmul.f32 %v8898_v18, %v2612_v57  ;;  %v2614_v16 = vpop.permute.xlu1 %2613 }
0x13f6   :  { %v2636_v35 = vmul.f32 %v8902_v14, %v2614_v16 }
0x13f7   :  { %v2651_v56 = vrot.slane %v2635_v61, 6 }
0x13f8   :  { %v2616_v12 = vpop.permute.xlu0 %2615  ;;  %v2652_v51 = vrot.slane %v2636_v35, 5 }
0x13f9   :  { %v2637_v19 = vmul.f32 %v8904_v40, %v2616_v12  ;;  %v2618_v31 = vpop.permute.xlu1 %2617 }
0x13fa   :  { %v2653_v4 = vsel %vm629_vm3, %v2652_v51, %v2651_v56  ;;  %v2638_v15 = vmul.f32 %v8909_v52, %v2618_v31 }
0x13fb   :  { %v2654_v28 = vrot.slane %v2637_v19, 4 }
0x13fc   :  { %v2620_v32 = vpop.permute.xlu0 %2619  ;;  %v2656_v18 = vrot.slane %v2638_v15, 3 }
0x13fd   :  { %v2655_v36 = vsel %vm632_vm4, %v2654_v28, %v2653_v4  ;;  %v2639_v6 = vmul.f32 %v8912_v13, %v2620_v32  ;;  %v2622_v58 = vpop.permute.xlu1 %2621 }
0x13fe   :  { %v2640_v14 = vmul.f32 %v8917_v60, %v2622_v58  ;;  %v2657_v59 = vsel %vm635_vm5, %v2656_v18, %v2655_v36 }
0x13ff   :  { %v2658_v10 = vrot.slane %v2639_v6, 2 }
0x1400   :  { %v2626_v40 = vpop.permute.xlu0 %2625  ;;  %v2660_v37 = vrot.slane %v2640_v14, 1 }
0x1401   :  { %v2659_v22 = vsel %vm638_vm6, %v2658_v10, %v2657_v59  ;;  %v2642_v9 = vmul.f32 %v8920_v21, %v2626_v40  ;;  %v2624_v49 = vpop.permute.xlu1 %2623 }
0x1402   :  { %v2641_v29 = vmul.f32 %v8925_v53, %v2624_v49  ;;  %v2661_v8 = vsel %vm641_vm7, %v2660_v37, %v2659_v22 }
0x1403   :  { %v2663_v52 = vrot.slane %v2642_v9, 7 }
0x1404   :  { %v2662_v13 = vsel %vm644_vm8, %v2641_v29, %v2661_v8 }
0x1405   :  { %v2664_v48 = vsel %vm647_vm9, %v2663_v52, %v2662_v13 }
0x1406   :  { %2665 = vrot.lane.b32.xlu0 %v2664_v48, %s7822_s16 }
0x1478   :  { %v2666_v60 = vpop.permute.xlu0 %2665 }
0x1479   :  { %6299 = vmatmul.mubr.msk.f32.vlgmr.msra.gmra.mrb[8].mxu1 %vm330_vm10, %v2666_v60  ;;  %5980 = vmatmul.mubr.msk.f32.gmra.mrb[26].mxu0 %vm330_vm10, %v2666_v60 }
0x147a   :  { %3131 = vmatprep.mubr.f32.mxu0 %v7820_v1 }
0x154c   :  { %v2735_v21 = vpop.f32.mrb[8].mxu1 }
0x154d   :  { %v2740_v26 = vrot.slane %v2735_v21, 1  ;;  %v6300_v50 = vpop.f32.mrb[9].mxu1  ;;  %v2741_v44 = vrot.slane %v2735_v21, 2  ;;  %v2742_v47 = vrot.slane %v2735_v21, 3  ;;  %v2743_v5 = vrot.slane %v2735_v21, 4 }
0x154e   :  { %v2744_v45 = vrot.slane %v2735_v21, 5  ;;  %v2745_v11 = vrot.slane %v2735_v21, 6  ;;  %v2746_v7 = vrot.slane %v2735_v21, 7 }
0x154f   :  { %v2755_v53 = vadd.f32 %v2740_v26, %v8135_v24  ;;  %v2756_v2 = vadd.f32 %v2741_v44, %v8137_v27  ;;  %v2757_v17 = vadd.f32 %v2742_v47, %v8142_v34  ;;  %v2758_v54 = vadd.f32 %v2743_v5, %v8139_v30 }
0x1550   :  { %v2759_v33 = vadd.f32 %v2744_v45, %v8149_v41  ;;  %v2760_v24 = vadd.f32 %v2745_v11, %v8146_v39  ;;  %v2761_v57 = vadd.f32 %v2746_v7, %v8154_v46  ;;  %v2762_v27 = vadd.f32 %v2735_v21, %v8151_v43 }
0x1551   :  { %7284 = vtanh.f32 %v2755_v53  ;;  %v5966_v16 = vmul.f32 -1.442695, %v2755_v53  ;;  %v5967_v35 = vmul.f32 -1.442695, %v2756_v2  ;;  %v5968_v56 = vmul.f32 -1.442695, %v2757_v17 }
0x1552   :  { %7286 = vtanh.f32 %v2756_v2  ;;  %v5969_v12 = vmul.f32 -1.442695, %v2758_v54  ;;  %v5970_v51 = vmul.f32 -1.442695, %v2759_v33  ;;  %v5971_v31 = vmul.f32 -1.442695, %v2760_v24 }
0x1553   :  { %7288 = vtanh.f32 %v2757_v17  ;;  %v5972_v4 = vmul.f32 -1.442695, %v2761_v57  ;;  %v5973_v15 = vmul.f32 -1.442695, %v2762_v27 }
0x1554   :  { %7290 = vtanh.f32 %v2758_v54 }
0x1555   :  { %7292 = vtanh.f32 %v2759_v33 }
0x1556   :  { %7294 = vtanh.f32 %v2760_v24 }
0x1557   :  { %7296 = vtanh.f32 %v2761_v57 }
0x1558   :  { %7298 = vtanh.f32 %v2762_v27 }
0x1559   :  { %7300 = vpow2.f32 %v5966_v16 }
0x155a   :  { %7302 = vpow2.f32 %v5967_v35 }
0x155b   :  { %v7285_v62 = vpop.eup %7284  ;;  %7304 = vpow2.f32 %v5968_v56 }
0x155c   :  { %2859 = vrot.lane.b32.xlu1 %v7285_v62, %s7821_s0  ;;  %v7287_v34 = vpop.eup %7286  ;;  %7306 = vpow2.f32 %v5969_v12  ;;  %v2830_v12 = vrot.slane %v8950_v23, 7  ;;  %v2833_v23 = vrot.slane %v8968_v63, 7 }
0x155d   :  { %v7289_v30 = vpop.eup %7288  ;;  %2861 = vrot.lane.b32.xlu0 %v7287_v34, %s7821_s0  ;;  %7308 = vpow2.f32 %v5970_v51 }
0x155e   :  { %v7291_v41 = vpop.eup %7290  ;;  %7310 = vpow2.f32 %v5971_v31 }
0x155f   :  { %v7293_v61 = vpop.eup %7292 }
0x1560   :  { %2863 = vrot.lane.b32.xlu1 %v7289_v30, %s7821_s0  ;;  %v7295_v39 = vpop.eup %7294  ;;  %v2827_v30 = vrot.slane %v8932_v3, 7  ;;  %v2831_v3 = vrot.slane %v8954_v55, 7 }
0x1561   :  { %2865 = vrot.lane.b32.xlu0 %v7291_v41, %s7821_s0  ;;  %v7297_v46 = vpop.eup %7296 }
0x1562   :  { %v7299_v43 = vpop.eup %7298 }
0x1563   :  { %v7301_v19 = vpop.eup %7300 }
0x1564   :  { %2867 = vrot.lane.b32.xlu1 %v7293_v61, %s7821_s0  ;;  %v2787_v28 = vadd.f32 1.0, %v7301_v19  ;;  %v7303_v32 = vpop.eup %7302 }
0x1565   :  { %2869 = vrot.lane.b32.xlu0 %v7295_v39, %s7821_s0  ;;  %v7305_v36 = vpop.eup %7304  ;;  %v2788_v6 = vadd.f32 1.0, %v7303_v32 }
0x1566   :  { %7312 = vrcp.f32 %v2787_v28  ;;  %v7307_v18 = vpop.eup %7306  ;;  %v2789_v58 = vadd.f32 1.0, %v7305_v36 }
0x1567   :  { %7314 = vpow2.f32 %v5972_v4  ;;  %v7309_v10 = vpop.eup %7308  ;;  %v2790_v59 = vadd.f32 1.0, %v7307_v18 }
0x1568   :  { %2871 = vrot.lane.b32.xlu1 %v7297_v46, %s7821_s0  ;;  %7316 = vpow2.f32 %v5973_v15  ;;  %v7311_v14 = vpop.eup %7310  ;;  %v2791_v9 = vadd.f32 1.0, %v7309_v10  ;;  %v2828_v46 = vrot.slane %v8940_v42, 7  ;;  %v2834_v10 = vrot.slane %v8963_v38, 7  ;;  %v3139_v38 = vld [vmem:[%s9555_s5 + $0x8] sm:$0xff] }
0x1569   :  { %2873 = vrot.lane.b32.xlu0 %v7299_v43, %s7821_s0  ;;  %7318 = vrcp.f32 %v2788_v6  ;;  %v2792_v52 = vadd.f32 1.0, %v7311_v14  ;;  %v2829_v43 = vrot.slane %v8943_v20, 7  ;;  %v2832_v20 = vrot.slane %v8961_v25, 7 }
0x156a   :  { %7320 = vrcp.f32 %v2789_v58 }
0x156b   :  { %7322 = vrcp.f32 %v2790_v59 }
0x156c   :  { %7324 = vrcp.f32 %v2791_v9 }
0x156d   :  { %7326 = vrcp.f32 %v2792_v52  ;;  %v3141_v52 = vld [vmem:[%s9555_s5 + $0x18] sm:$0xff] }
0x1570   :  { %v9013_v40 = vpop.eup %7312 }
0x1571   :  { %v7315_v37 = vpop.eup %7314  ;;  %v2843_v41 = vmul.f32 %v9013_v40, %v2827_v30  ;;  %v3148_v30 = vld [vmem:[%s9555_s5 + $0x50] sm:$0xff] }
0x1572   :  { %v7317_v29 = vpop.eup %7316  ;;  %v2793_v8 = vadd.f32 1.0, %v7315_v37 }
0x1573   :  { %v2794_v13 = vadd.f32 1.0, %v7317_v29  ;;  %v9017_v48 = vpop.eup %7318  ;;  %v3138_v29 = vld [vmem:[%s9555_s5] sm:$0xff] }
0x1574   :  { %7328 = vrcp.f32 %v2793_v8  ;;  %v9019_v21 = vpop.eup %7320  ;;  %v2844_v16 = vmul.f32 %v9017_v48, %v2828_v46 }
0x1575   :  { %7330 = vrcp.f32 %v2794_v13  ;;  %v9024_v44 = vpop.eup %7322  ;;  %v2845_v56 = vmul.f32 %v9019_v21, %v2829_v43  ;;  %v9073_v13 = vpack.c.bf16 %v3141_v52, %v3139_v38  ;;  %v3009_v52 = vld [vmem:[%s9556_s6] sm:$0x3]  ;;  %s7823_s6 = smov 96  }
0x1576   :  { %v9027_v5 = vpop.eup %7324  ;;  %v2846_v28 = vmul.f32 %v9024_v44, %v2830_v12 }
0x1577   :  { %v9032_v11 = vpop.eup %7326  ;;  %v2847_v42 = vmul.f32 %v9027_v5, %v2831_v3  ;;  %6557 = vmatprep.subr.bf16.mxu0 %v9073_v13 }
0x1578   :  { %v2848_v55 = vmul.f32 %v9032_v11, %v2832_v20 }
0x157e   :  { %v9035_v62 = vpop.eup %7328 }
0x157f   :  { %v9040_v57 = vpop.eup %7330  ;;  %v2849_v58 = vmul.f32 %v9035_v62, %v2833_v23 }
0x1580   :  { %v2850_v25 = vmul.f32 %v9040_v57, %v2834_v10 }
0x15ce   :  { %v2860_v22 = vpop.permute.xlu1 %2859 }
0x15cf   :  { %v2883_v49 = vmul.f32 %v9013_v40, %v2860_v22  ;;  %v2862_v60 = vpop.permute.xlu0 %2861 }
0x15d0   :  { %v2884_v26 = vmul.f32 %v9017_v48, %v2862_v60  ;;  %v3140_v60 = vld [vmem:[%s9555_s5 + $0x10] sm:$0xff] }
0x15d1   :  { %2899 = vrot.lane.b32.xlu1 %v2883_v49, %s7822_s16 }
0x15d2   :  { %v2864_v50 = vpop.permute.xlu1 %2863  ;;  %2901 = vrot.lane.b32.xlu0 %v2884_v26, %s7822_s16  ;;  %v3143_v26 = vld [vmem:[%s9555_s5 + $0x28] sm:$0xff] }
0x15d3   :  { %v2885_v53 = vmul.f32 %v9019_v21, %v2864_v50  ;;  %v2866_v47 = vpop.permute.xlu0 %2865  ;;  %v3145_v50 = vld [vmem:[%s9555_s5 + $0x38] sm:$0xff] }
0x15d4   :  { %v2886_v2 = vmul.f32 %v9024_v44, %v2866_v47  ;;  %v9085_v47 = vpack.c.bf16 %v3140_v60, %v3138_v29 }
0x15d5   :  { %2903 = vrot.lane.b32.xlu1 %v2885_v53, %s7822_s16 }
0x15d6   :  { %v2868_v45 = vpop.permute.xlu1 %2867  ;;  %2905 = vrot.lane.b32.xlu0 %v2886_v2, %s7822_s16  ;;  %v9087_v2 = vpack.c.bf16 %v3145_v50, %v3143_v26  ;;  %6559 = vmatpush1.bf16.msra.mxu0 %v9085_v47 }
0x15d7   :  { %v2887_v17 = vmul.f32 %v9027_v5, %v2868_v45  ;;  %v2870_v54 = vpop.permute.xlu0 %2869  ;;  %v3142_v45 = vld [vmem:[%s9555_s5 + $0x20] sm:$0xff] }
0x15d8   :  { %v2888_v7 = vmul.f32 %v9032_v11, %v2870_v54  ;;  %v3147_v54 = vld [vmem:[%s9555_s5 + $0x48] sm:$0xff]  ;;  %6561 = vmatprep.subr.bf16.mxu0 %v9087_v2 }
0x15d9   :  { %2907 = vrot.lane.b32.xlu1 %v2887_v17, %s7822_s16  ;;  %v3144_v17 = vld [vmem:[%s9555_s5 + $0x30] sm:$0xff] }
0x15da   :  { %v2872_v33 = vpop.permute.xlu1 %2871  ;;  %2909 = vrot.lane.b32.xlu0 %v2888_v7, %s7822_s16  ;;  %v3149_v7 = vld [vmem:[%s9555_s5 + $0x58] sm:$0xff] }
0x15db   :  { %v2889_v24 = vmul.f32 %v9035_v62, %v2872_v33  ;;  %v2874_v27 = vpop.permute.xlu0 %2873  ;;  %v9104_v33 = vpack.c.bf16 %v3144_v17, %v3142_v45 }
0x15dc   :  { %v2890_v34 = vmul.f32 %v9040_v57, %v2874_v27  ;;  %v9107_v27 = vpack.c.bf16 %v3149_v7, %v3147_v54 }
0x15dd   :  { %2911 = vrot.lane.b32.xlu1 %v2889_v24, %s7822_s16  ;;  %6563 = vmatpush1.bf16.msra.mxu0 %v9104_v33 }
0x15de   :  { %2913 = vrot.lane.b32.xlu0 %v2890_v34, %s7822_s16  ;;  %v3146_v34 = vld [vmem:[%s9555_s5 + $0x40] sm:$0xff]  ;;  %6565 = vmatprep.subr.bf16.mxu0 %v9107_v27 }
0x15df   :  { %v9124_v46 = vpack.c.bf16 %v3148_v30, %v3146_v34 }
0x15e1   :  { %6567 = vmatpush1.bf16.msra.mxu0 %v9124_v46 }
0x1643   :  { %v2900_v61 = vpop.permute.xlu1 %2899 }
0x1644   :  { %v2923_v39 = vadd.f32 %v2900_v61, %v2843_v41  ;;  %v2902_v35 = vpop.permute.xlu0 %2901  ;;  %v3151_v61 = vld [vmem:[%s9555_s5 + $0x68] sm:$0xff] }
0x1645   :  { %v2924_v19 = vadd.f32 %v2902_v35, %v2844_v16  ;;  %v3150_v35 = vld [vmem:[%s9555_s5 + $0x60] sm:$0xff] }
0x1646   :  { %7332 = vtanh.f32 %v2923_v39  ;;  %v3153_v39 = vld [vmem:[%s9555_s5 + $0x78] sm:$0xff] }
0x1647   :  { %v2904_v51 = vpop.permute.xlu1 %2903  ;;  %7334 = vtanh.f32 %v2924_v19  ;;  %v9127_v16 = vpack.c.bf16 %v3153_v39, %v3151_v61 }
0x1648   :  { %v2925_v31 = vadd.f32 %v2904_v51, %v2845_v56  ;;  %v2906_v15 = vpop.permute.xlu0 %2905  ;;  %v3152_v56 = vld [vmem:[%s9555_s5 + $0x70] sm:$0xff] }
0x1649   :  { %v2926_v32 = vadd.f32 %v2906_v15, %v2846_v28  ;;  %v9137_v12 = vpack.c.bf16 %v3152_v56, %v3150_v35  ;;  %6569 = vmatprep.subr.bf16.mxu0 %v9127_v16 }
0x164a   :  { %7336 = vtanh.f32 %v2925_v31 }
0x164b   :  { %v2908_v36 = vpop.permute.xlu1 %2907  ;;  %7338 = vtanh.f32 %v2926_v32  ;;  %6571 = vmatpush1.bf16.msra.mxu0 %v9137_v12 }
0x164c   :  { %v2927_v6 = vadd.f32 %v2908_v36, %v2847_v42  ;;  %v2910_v18 = vpop.permute.xlu0 %2909  ;;  %6573 = vmatprep.subr.bf16.mxu0 %v9073_v13 }
0x164d   :  { %v2928_v14 = vadd.f32 %v2910_v18, %v2848_v55 }
0x164e   :  { %7340 = vtanh.f32 %v2927_v6 }
0x164f   :  { %v2912_v59 = vpop.permute.xlu1 %2911  ;;  %7342 = vtanh.f32 %v2928_v14 }
0x1650   :  { %v7333_v4 = vpop.eup %7332  ;;  %v2929_v22 = vadd.f32 %v2912_v59, %v2849_v58  ;;  %v2914_v9 = vpop.permute.xlu0 %2913 }
0x1651   :  { %2947 = vrot.lane.b32.xlu1 %v7333_v4, %s7821_s0  ;;  %v7335_v37 = vpop.eup %7334  ;;  %v2930_v63 = vadd.f32 %v2914_v9, %v2850_v25 }
0x1652   :  { %7344 = vtanh.f32 %v2929_v22  ;;  %2949 = vrot.lane.b32.xlu0 %v7335_v37, %s7821_s0 }
0x1653   :  { %7346 = vtanh.f32 %v2930_v63 }
0x1654   :  { %v7337_v49 = vpop.eup %7336 }
0x1655   :  { %2951 = vrot.lane.b32.xlu1 %v7337_v49, %s7821_s0  ;;  %v7339_v8 = vpop.eup %7338 }
0x1656   :  { %2953 = vrot.lane.b32.xlu0 %v7339_v8, %s7821_s0 }
0x1658   :  { %v7341_v53 = vpop.eup %7340 }
0x1659   :  { %2955 = vrot.lane.b32.xlu1 %v7341_v53, %s7821_s0  ;;  %v7343_v24 = vpop.eup %7342 }
0x165a   :  { %2957 = vrot.lane.b32.xlu0 %v7343_v24, %s7821_s0 }
0x165c   :  { %v7345_v41 = vpop.eup %7344 }
0x165d   :  { %2959 = vrot.lane.b32.xlu1 %v7345_v41, %s7821_s0  ;;  %v7347_v43 = vpop.eup %7346 }
0x165e   :  { %2961 = vrot.lane.b32.xlu0 %v7347_v43, %s7821_s0 }
0x16c3   :  { %v2948_v19 = vpop.permute.xlu1 %2947 }
0x16c4   :  { %v2971_v51 = vmul.f32 %v9013_v40, %v2948_v19  ;;  %v2950_v3 = vpop.permute.xlu0 %2949 }
0x16c5   :  { %v2972_v31 = vmul.f32 %v9017_v48, %v2950_v3 }
0x16c6   :  { %v2987_v28 = vrot.slane %v2971_v51, 7 }
0x16c7   :  { %v2952_v4 = vpop.permute.xlu1 %2951  ;;  %v2988_v42 = vrot.slane %v2972_v31, 6 }
0x16c8   :  { %v2973_v15 = vmul.f32 %v9019_v21, %v2952_v4  ;;  %v2954_v20 = vpop.permute.xlu0 %2953 }
0x16c9   :  { %v2989_v36 = vsel %vm629_vm3, %v2988_v42, %v2987_v28  ;;  %v2974_v23 = vmul.f32 %v9024_v44, %v2954_v20 }
0x16ca   :  { %v2990_v32 = vrot.slane %v2973_v15, 5 }
0x16cb   :  { %v2956_v6 = vpop.permute.xlu1 %2955  ;;  %v2992_v40 = vrot.slane %v2974_v23, 4 }
0x16cc   :  { %v2991_v55 = vsel %vm632_vm4, %v2990_v32, %v2989_v36  ;;  %v2975_v18 = vmul.f32 %v9027_v5, %v2956_v6  ;;  %v2958_v58 = vpop.permute.xlu0 %2957 }
0x16cd   :  { %v2976_v48 = vmul.f32 %v9032_v11, %v2958_v58  ;;  %v2993_v14 = vsel %vm635_vm5, %v2992_v40, %v2991_v55  ;;  %v3953_v40 = vld [vmem:[#allocation7 + $0x8] sm:$0xff]  ;;  %v3954_v58 = vld [vmem:[#allocation7 + $0x10] sm:$0xff] }
0x16ce   :  { %v2994_v10 = vrot.slane %v2975_v18, 3  ;;  %v3952_v18 = vld [vmem:[#allocation7] sm:$0xff] }
0x16cf   :  { %v2960_v21 = vpop.permute.xlu1 %2959  ;;  %v2996_v25 = vrot.slane %v2976_v48, 2  ;;  %v3955_v48 = vld [vmem:[#allocation7 + $0x18] sm:$0xff] }
0x16d0   :  { %v2995_v59 = vsel %vm638_vm6, %v2994_v10, %v2993_v14  ;;  %v2977_v22 = vmul.f32 %v9035_v62, %v2960_v21  ;;  %v2962_v9 = vpop.permute.xlu0 %2961  ;;  %v3011_v62 = vlaneseq  ;;  %v6684_v10 = vpack.c.bf16 %v3953_v40, %v3952_v18  ;;  %v3956_v21 = vld [vmem:[#allocation7 + $0x20] sm:$0xff] }
0x16d1   :  { %v2978_v37 = vmul.f32 %v9040_v57, %v2962_v9  ;;  %v2997_v63 = vsel %vm641_vm7, %v2996_v25, %v2995_v59  ;;  %v6688_v14 = vpack.c.bf16 %v3955_v48, %v3954_v58  ;;  %v3957_v59 = vld [vmem:[#allocation7 + $0x28] sm:$0xff]  ;;  %v3958_v25 = vld [vmem:[#allocation7 + $0x30] sm:$0xff]  ;;  %v3959_v9 = vld [vmem:[#allocation7 + $0x38] sm:$0xff] }
0x16d2   :  { %v2998_v44 = vrot.slane %v2977_v22, 1  ;;  %v3012_v57 = vshrl.u32 %v3011_v62, 7  ;;  %6685 = vmatprep.subr.bf16.mxu1 %v6684_v10  ;;  %v6692_v22 = vpack.c.bf16 %v3957_v59, %v3956_v21 }
0x16d3   :  { %6687 = vmatpush3.bf16.msra.mxu1 %v6684_v10 }
0x16d4   :  { %v2999_v5 = vsel %vm644_vm8, %v2998_v44, %v2997_v63  ;;  %v3013_v38 = vsub.s32 0, %v3012_v57  ;;  %v3017_v53 = vsub.s32 1, %v3012_v57  ;;  %6689 = vmatprep.subr.bf16.mxu1 %v6688_v14  ;;  %v6696_v44 = vpack.c.bf16 %v3959_v9, %v3958_v25 }
0x16d5   :  { %v3000_v49 = vsel %vm647_vm9, %v2978_v37, %v2999_v5 }
0x16d6   :  { %3021 = vrot.lane.b32.xlu1 %v3000_v49, %s7822_s16  ;;  %v9173_v29 = vrot.slane %v3009_v52, %v3013_v38  ;;  %v9176_v45 = vrot.slane %v3009_v52, %v3017_v53 }
0x16d7   :  { %6691 = vmatpush3.bf16.msra.mxu1 %v6688_v14 }
0x16d8   :  { %6693 = vmatprep.subr.bf16.mxu1 %v6692_v22 }
0x16db   :  { %6695 = vmatpush3.bf16.msra.mxu1 %v6692_v22 }
0x16dc   :  { %6697 = vmatprep.subr.bf16.mxu1 %v6696_v44 }
0x16df   :  { %6699 = vmatpush3.bf16.msra.mxu1 %v6696_v44 }
0x16e0   :  { %6700 = vmatprep.subr.bf16.mxu1 %v7818_v0 }
0x1748   :  { %v3022_v11 = vpop.permute.xlu1 %3021 }
0x1749   :  { %5981 = vmatmul.mubr.msk.f32.gmra.mrb[28].mxu0 %vm330_vm10, %v3022_v11 }
0x174a   :  { %3221 = vmatprep.mubr.f32.mxu0 %v7820_v1 }
0x174d   :  { %3222 = vmatmul.mubr.f32.vlgmr.msra.gmra.mrb[14].mxu0 %v7820_v1 }
0x174e   :  { %6575 = vmatpush1.bf16.msra.mxu0 %v9085_v47  ;;  %3321 = vmatprep.mubr.f32.mxu0 %v7820_v1 }
0x174f   :  { %6577 = vmatprep.subr.bf16.mxu0 %v9087_v2 }
0x1752   :  { %6579 = vmatpush1.bf16.msra.mxu0 %v9104_v33 }
0x1753   :  { %6581 = vmatprep.subr.bf16.mxu0 %v9107_v27 }
0x1756   :  { %6583 = vmatpush1.bf16.msra.mxu0 %v9124_v46 }
0x1757   :  { %6585 = vmatprep.subr.bf16.mxu0 %v9127_v16 }
0x175a   :  { %6587 = vmatpush1.bf16.msra.mxu0 %v9137_v12 }
0x175b   :  { %6589 = vmatprep.subr.bf16.mxu0 %v9073_v13 }
0x1820   :  { %v3223_v8 = vpop.f32.mrb[14].mxu0 }
0x1821   :  { %v6783_v60 = vadd.f32 %v3223_v8, %v9173_v29  ;;  %v3225_v26 = vpop.f32.mrb[15].mxu0 }
0x1822   :  { %v6784_v17 = vadd.f32 %v3225_v26, %v9176_v45 }
0x1823   :  { %v5982_v50 = vmul.f32 -1.442695, %v6783_v60 }
0x1824   :  { %v5983_v41 = vmul.f32 -1.442695, %v6784_v17 }
0x1825   :  { %7348 = vpow2.f32 %v5982_v50 }
0x1826   :  { %7350 = vtanh.f32 %v6784_v17 }
0x182f   :  { %v7349_v54 = vpop.eup %7348 }
0x1830   :  { %v3236_v7 = vadd.f32 1.0, %v7349_v54  ;;  %v7351_v24 = vpop.eup %7350 }
0x1832   :  { %7352 = vrcp.f32 %v3236_v7 }
0x1833   :  { %7354 = vpow2.f32 %v5983_v41 }
0x183c   :  { %v7353_v34 = vpop.eup %7352 }
0x183d   :  { %v3244_v30 = vmul.f32 %v7353_v34, %v7351_v24  ;;  %v7355_v61 = vpop.eup %7354  ;;  %v3243_v43 = vmul.f32 0.0, %v7353_v34 }
0x183e   :  { %v3237_v39 = vadd.f32 1.0, %v7355_v61 }
0x183f   :  { %3246 = vrot.lane.b32.xlu0 %v3244_v30, %s7821_s0 }
0x1840   :  { %7356 = vrcp.f32 %v3237_v39 }
0x184a   :  { %v7357_v19 = vpop.eup %7356 }
0x18b1   :  { %v3247_v35 = vpop.permute.xlu0 %3246 }
0x18b2   :  { %v3249_v56 = vadd.f32 %v3247_v35, %v3243_v43 }
0x18b4   :  { %7358 = vtanh.f32 %v3249_v56 }
0x18be   :  { %v7359_v51 = vpop.eup %7358 }
0x18bf   :  { %v3251_v3 = vmul.f32 %v7359_v51, %v7357_v19 }
0x18c1   :  { %3253 = vrot.lane.b32.xlu1 %v3251_v3, %s7821_s0 }
0x1933   :  { %v3254_v31 = vpop.permute.xlu1 %3253 }
0x1934   :  { %5984 = vmatmul.mubr.msk.f32.vlgmr.msra.gmra.mrb[16].mxu0 %vm3154_vm11, %v3254_v31  ;;  %6317 = vmatprep.mubr.msk.f32.mxu1 %vm3154_vm11, %v3254_v31 }
0x1935   :  { %6591 = vmatpush1.bf16.msra.mxu0 %v9085_v47  ;;  %3421 = vmatprep.mubr.f32.mxu0 %v7820_v1 }
0x1936   :  { %6593 = vmatprep.subr.bf16.mxu0 %v9087_v2 }
0x1939   :  { %6595 = vmatpush1.bf16.msra.mxu0 %v9104_v33 }
0x193a   :  { %6597 = vmatprep.subr.bf16.mxu0 %v9107_v27 }
0x193d   :  { %6599 = vmatpush1.bf16.msra.mxu0 %v9124_v46 }
0x193e   :  { %6601 = vmatprep.subr.bf16.mxu0 %v9127_v16 }
0x1941   :  { %6603 = vmatpush1.bf16.msra.mxu0 %v9137_v12 }
0x1942   :  { %6605 = vmatprep.subr.bf16.mxu0 %v9073_v13 }
0x1a07   :  { %v3323_v28 = vpop.f32.mrb[16].mxu0 }
0x1a08   :  { %v6785_v4 = vadd.f32 %v3323_v28, %v9173_v29  ;;  %v3325_v15 = vpop.f32.mrb[17].mxu0 }
0x1a09   :  { %v6786_v20 = vadd.f32 %v3325_v15, %v9176_v45 }
0x1a0a   :  { %v5985_v42 = vmul.f32 -1.442695, %v6785_v4 }
0x1a0b   :  { %v5986_v37 = vmul.f32 -1.442695, %v6786_v20 }
0x1a0c   :  { %7360 = vpow2.f32 %v5985_v42 }
0x1a0d   :  { %7362 = vtanh.f32 %v6786_v20 }
0x1a16   :  { %v7361_v32 = vpop.eup %7360 }
0x1a17   :  { %v3336_v36 = vadd.f32 1.0, %v7361_v32  ;;  %v7363_v23 = vpop.eup %7362 }
0x1a19   :  { %7364 = vrcp.f32 %v3336_v36 }
0x1a1a   :  { %7366 = vpow2.f32 %v5986_v37 }
0x1a23   :  { %v7365_v6 = vpop.eup %7364 }
0x1a24   :  { %v3344_v55 = vmul.f32 %v7365_v6, %v7363_v23  ;;  %v7367_v63 = vpop.eup %7366  ;;  %v3343_v49 = vmul.f32 %v7365_v6, %v3249_v56 }
0x1a25   :  { %v3337_v5 = vadd.f32 1.0, %v7367_v63 }
0x1a26   :  { %3346 = vrot.lane.b32.xlu0 %v3344_v55, %s7821_s0 }
0x1a27   :  { %7368 = vrcp.f32 %v3337_v5 }
0x1a31   :  { %v7369_v57 = vpop.eup %7368 }
0x1a98   :  { %v3347_v11 = vpop.permute.xlu0 %3346 }
0x1a99   :  { %v3349_v62 = vadd.f32 %v3347_v11, %v3343_v49 }
0x1a9b   :  { %7370 = vtanh.f32 %v3349_v62 }
0x1aa5   :  { %v7371_v38 = vpop.eup %7370 }
0x1aa6   :  { %v3351_v52 = vmul.f32 %v7371_v38, %v7369_v57 }
0x1aa8   :  { %3353 = vrot.lane.b32.xlu1 %v3351_v52, %s7821_s0 }
0x1b1a   :  { %v3354_v8 = vpop.permute.xlu1 %3353 }
0x1b1b   :  { %5987 = vmatmul.mubr.msk.f32.vlgmr.msra.gmra.mrb[18].mxu0 %vm3154_vm11, %v3354_v8  ;;  %6318 = vmatmul.mubr.msk.f32.vlgmr.msra.gmra.mrb[10].mxu1 %vm3154_vm11, %v3354_v8 }
0x1b1c   :  { %6607 = vmatpush1.bf16.msra.mxu0 %v9085_v47  ;;  %3521 = vmatprep.mubr.f32.mxu0 %v7820_v1 }
0x1b1d   :  { %6609 = vmatprep.subr.bf16.mxu0 %v9087_v2 }
0x1b20   :  { %6611 = vmatpush1.bf16.msra.mxu0 %v9104_v33 }
0x1b21   :  { %6613 = vmatprep.subr.bf16.mxu0 %v9107_v27 }
0x1b24   :  { %6615 = vmatpush1.bf16.msra.mxu0 %v9124_v46 }
0x1b25   :  { %6617 = vmatprep.subr.bf16.mxu0 %v9127_v16 }
0x1b28   :  { %6619 = vmatpush1.bf16.msra.mxu0 %v9137_v12 }
0x1b29   :  { %6621 = vmatprep.subr.bf16.mxu0 %v9073_v13 }
0x1bee   :  { %v3423_v60 = vpop.f32.mrb[18].mxu0  ;;  %v9208_v26 = vpop.f32.mrb[10].mxu1 }
0x1bef   :  { %v6787_v50 = vadd.f32 %v3423_v60, %v9173_v29  ;;  %v3425_v53 = vpop.f32.mrb[19].mxu0  ;;  %v9211_v17 = vpop.f32.mrb[11].mxu1 }
0x1bf0   :  { %v6788_v7 = vadd.f32 %v3425_v53, %v9176_v45 }
0x1bf1   :  { %v5988_v54 = vmul.f32 -1.442695, %v6787_v50 }
0x1bf2   :  { %v5989_v39 = vmul.f32 -1.442695, %v6788_v7 }
0x1bf3   :  { %7372 = vpow2.f32 %v5988_v54 }
0x1bf4   :  { %7374 = vtanh.f32 %v6788_v7 }
0x1bfd   :  { %v7373_v24 = vpop.eup %7372 }
0x1bfe   :  { %v3436_v34 = vadd.f32 1.0, %v7373_v24  ;;  %v7375_v30 = vpop.eup %7374 }
0x1c00   :  { %7376 = vrcp.f32 %v3436_v34 }
0x1c01   :  { %7378 = vpow2.f32 %v5989_v39 }
0x1c0a   :  { %v7377_v41 = vpop.eup %7376 }
0x1c0b   :  { %v3444_v61 = vmul.f32 %v7377_v41, %v7375_v30  ;;  %v7379_v43 = vpop.eup %7378  ;;  %v3443_v56 = vmul.f32 %v7377_v41, %v3349_v62 }
0x1c0c   :  { %v3437_v35 = vadd.f32 1.0, %v7379_v43 }
0x1c0d   :  { %3446 = vrot.lane.b32.xlu0 %v3444_v61, %s7821_s0 }
0x1c0e   :  { %7380 = vrcp.f32 %v3437_v35 }
0x1c18   :  { %v7381_v3 = vpop.eup %7380 }
0x1c7f   :  { %v3447_v19 = vpop.permute.xlu0 %3446 }
0x1c80   :  { %v3449_v51 = vadd.f32 %v3447_v19, %v3443_v56 }
0x1c82   :  { %7382 = vtanh.f32 %v3449_v51 }
0x1c8c   :  { %v7383_v31 = vpop.eup %7382 }
0x1c8d   :  { %v3451_v28 = vmul.f32 %v7383_v31, %v7381_v3 }
0x1c8f   :  { %3453 = vrot.lane.b32.xlu1 %v3451_v28, %s7821_s0 }
0x1d01   :  { %v3454_v4 = vpop.permute.xlu1 %3453 }
0x1d02   :  { %5990 = vmatmul.mubr.msk.f32.vlgmr.msra.gmra.mrb[20].mxu0 %vm3154_vm11, %v3454_v4  ;;  %6320 = vmatprep.mubr.msk.f32.mxu1 %vm3154_vm11, %v3454_v4 }
0x1d03   :  { %6623 = vmatpush1.bf16.msra.mxu0 %v9085_v47  ;;  %3621 = vmatprep.mubr.f32.mxu0 %v7820_v1 }
0x1d04   :  { %6625 = vmatprep.subr.bf16.mxu0 %v9087_v2 }
0x1d07   :  { %6627 = vmatpush1.bf16.msra.mxu0 %v9104_v33 }
0x1d08   :  { %6629 = vmatprep.subr.bf16.mxu0 %v9107_v27 }
0x1d0b   :  { %6631 = vmatpush1.bf16.msra.mxu0 %v9124_v46 }
0x1d0c   :  { %6633 = vmatprep.subr.bf16.mxu0 %v9127_v16 }
0x1d0f   :  { %6635 = vmatpush1.bf16.msra.mxu0 %v9137_v12 }
0x1d10   :  { %6637 = vmatprep.subr.bf16.mxu0 %v9073_v13 }
0x1dd5   :  { %v3523_v15 = vpop.f32.mrb[20].mxu0 }
0x1dd6   :  { %v6789_v42 = vadd.f32 %v3523_v15, %v9173_v29  ;;  %v3525_v20 = vpop.f32.mrb[21].mxu0 }
0x1dd7   :  { %v6790_v36 = vadd.f32 %v3525_v20, %v9176_v45 }
0x1dd8   :  { %v5991_v32 = vmul.f32 -1.442695, %v6789_v42 }
0x1dd9   :  { %v5992_v58 = vmul.f32 -1.442695, %v6790_v36 }
0x1dda   :  { %7384 = vpow2.f32 %v5991_v32 }
0x1ddb   :  { %7386 = vtanh.f32 %v6790_v36 }
0x1de4   :  { %v7385_v23 = vpop.eup %7384 }
0x1de5   :  { %v3536_v6 = vadd.f32 1.0, %v7385_v23  ;;  %v7387_v55 = vpop.eup %7386 }
0x1de7   :  { %7388 = vrcp.f32 %v3536_v6 }
0x1de8   :  { %7390 = vpow2.f32 %v5992_v58 }
0x1df1   :  { %v7389_v18 = vpop.eup %7388 }
0x1df2   :  { %v3544_v40 = vmul.f32 %v7389_v18, %v7387_v55  ;;  %v7391_v10 = vpop.eup %7390  ;;  %v3543_v14 = vmul.f32 %v7389_v18, %v3449_v51 }
0x1df3   :  { %v3537_v48 = vadd.f32 1.0, %v7391_v10 }
0x1df4   :  { %3546 = vrot.lane.b32.xlu0 %v3544_v40, %s7821_s0 }
0x1df5   :  { %7392 = vrcp.f32 %v3537_v48 }
0x1dff   :  { %v7393_v22 = vpop.eup %7392 }
0x1e66   :  { %v3547_v21 = vpop.permute.xlu0 %3546 }
0x1e67   :  { %v3549_v59 = vadd.f32 %v3547_v21, %v3543_v14 }
0x1e69   :  { %7394 = vtanh.f32 %v3549_v59 }
0x1e73   :  { %v7395_v25 = vpop.eup %7394 }
0x1e74   :  { %v3551_v9 = vmul.f32 %v7395_v25, %v7393_v22 }
0x1e76   :  { %3553 = vrot.lane.b32.xlu1 %v3551_v9, %s7821_s0 }
0x1ee8   :  { %v3554_v44 = vpop.permute.xlu1 %3553 }
0x1ee9   :  { %5993 = vmatmul.mubr.msk.f32.vlgmr.msra.gmra.mrb[22].mxu0 %vm3154_vm11, %v3554_v44  ;;  %6321 = vmatmul.mubr.msk.f32.gmra.mrb[12].mxu1 %vm3154_vm11, %v3554_v44 }
0x1eea   :  { %6639 = vmatpush1.bf16.msra.mxu0 %v9085_v47  ;;  %3721 = vmatprep.mubr.f32.mxu0 %v7820_v1 }
0x1eeb   :  { %6641 = vmatprep.subr.bf16.mxu0 %v9087_v2 }
0x1eee   :  { %6643 = vmatpush1.bf16.msra.mxu0 %v9104_v33 }
0x1eef   :  { %6645 = vmatprep.subr.bf16.mxu0 %v9107_v27 }
0x1ef2   :  { %6647 = vmatpush1.bf16.msra.mxu0 %v9124_v46 }
0x1ef3   :  { %6649 = vmatprep.subr.bf16.mxu0 %v9127_v16 }
0x1ef6   :  { %6651 = vmatpush1.bf16.msra.mxu0 %v9137_v12 }
0x1ef7   :  { %6653 = vmatprep.subr.bf16.mxu0 %v9073_v13 }
0x1fbc   :  { %v3623_v37 = vpop.f32.mrb[22].mxu0  ;;  %v9242_v63 = vpop.f32.mrb[12].mxu1 }
0x1fbd   :  { %v6791_v5 = vadd.f32 %v3623_v37, %v9173_v29  ;;  %v3625_v49 = vpop.f32.mrb[23].mxu0  ;;  %v9245_v11 = vpop.f32.mrb[13].mxu1 }
0x1fbe   :  { %v6792_v57 = vadd.f32 %v3625_v49, %v9176_v45 }
0x1fbf   :  { %v5994_v62 = vmul.f32 -1.442695, %v6791_v5 }
0x1fc0   :  { %v5995_v53 = vmul.f32 -1.442695, %v6792_v57 }
0x1fc1   :  { %7396 = vpow2.f32 %v5994_v62 }
0x1fc2   :  { %7398 = vtanh.f32 %v6792_v57 }
0x1fcb   :  { %v7397_v38 = vpop.eup %7396 }
0x1fcc   :  { %v3636_v52 = vadd.f32 1.0, %v7397_v38  ;;  %v7399_v8 = vpop.eup %7398 }
0x1fce   :  { %7400 = vrcp.f32 %v3636_v52 }
0x1fcf   :  { %7402 = vpow2.f32 %v5995_v53 }
0x1fd8   :  { %v7401_v60 = vpop.eup %7400 }
0x1fd9   :  { %v3644_v50 = vmul.f32 %v7401_v60, %v7399_v8  ;;  %v7403_v54 = vpop.eup %7402  ;;  %v3643_v24 = vmul.f32 %v7401_v60, %v3549_v59 }
0x1fda   :  { %v3637_v7 = vadd.f32 1.0, %v7403_v54 }
0x1fdb   :  { %3646 = vrot.lane.b32.xlu0 %v3644_v50, %s7821_s0 }
0x1fdc   :  { %7404 = vrcp.f32 %v3637_v7 }
0x1fe6   :  { %v7405_v41 = vpop.eup %7404 }
0x204d   :  { %v3647_v34 = vpop.permute.xlu0 %3646 }
0x204e   :  { %v3649_v30 = vadd.f32 %v3647_v34, %v3643_v24 }
0x2050   :  { %7406 = vtanh.f32 %v3649_v30 }
0x205a   :  { %v7407_v61 = vpop.eup %7406 }
0x205b   :  { %v3651_v39 = vmul.f32 %v7407_v61, %v7405_v41  ;;  %v4077_v41 = vld [vmem:[#allocation9] sm:$0xff]  ;;  %v4078_v61 = vld [vmem:[#allocation9 + $0x8] sm:$0xff] }
0x205d   :  { %3653 = vrot.lane.b32.xlu1 %v3651_v39, %s7821_s0  ;;  %v4079_v39 = vld [vmem:[#allocation9 + $0x10] sm:$0xff] }
0x20cf   :  { %v3654_v43 = vpop.permute.xlu1 %3653 }
0x20d0   :  { %5996 = vmatmul.mubr.msk.f32.vlgmr.msra.gmra.mrb[24].mxu0 %vm3154_vm11, %v3654_v43  ;;  %6323 = vmatprep.mubr.msk.f32.mxu1 %vm3154_vm11, %v3654_v43  ;;  %v9288_v43 = vpack.c.bf16 %v4078_v61, %v4077_v41 }
0x20d1   :  { %6655 = vmatpush1.bf16.msra.mxu0 %v9085_v47  ;;  %3821 = vmatprep.mubr.f32.mxu0 %v7820_v1 }
0x20d2   :  { %6657 = vmatprep.subr.bf16.mxu0 %v9087_v2  ;;  %6702 = vmatpush3.bf16.msra.mxu1 %v9288_v43 }
0x20d3   :  { %6703 = vmatprep.subr.bf16.mxu1 %v7818_v0 }
0x20d5   :  { %6659 = vmatpush1.bf16.msra.mxu0 %v9104_v33 }
0x20d6   :  { %6661 = vmatprep.subr.bf16.mxu0 %v9107_v27 }
0x20d9   :  { %6663 = vmatpush1.bf16.msra.mxu0 %v9124_v46 }
0x20da   :  { %6665 = vmatprep.subr.bf16.mxu0 %v9127_v16 }
0x20dd   :  { %6667 = vmatpush1.bf16.msra.mxu0 %v9137_v12 }
0x20de   :  { %6669 = vmatprep.subr.bf16.mxu0 %v9073_v13 }
0x21a3   :  { %v3723_v35 = vpop.f32.mrb[24].mxu0 }
0x21a4   :  { %v6793_v56 = vadd.f32 %v3723_v35, %v9173_v29  ;;  %v3725_v19 = vpop.f32.mrb[25].mxu0 }
0x21a5   :  { %v6794_v3 = vadd.f32 %v3725_v19, %v9176_v45 }
0x21a6   :  { %v5997_v51 = vmul.f32 -1.442695, %v6793_v56 }
0x21a7   :  { %v5998_v20 = vmul.f32 -1.442695, %v6794_v3 }
0x21a8   :  { %7408 = vpow2.f32 %v5997_v51 }
0x21a9   :  { %7410 = vtanh.f32 %v6794_v3 }
0x21b2   :  { %v7409_v31 = vpop.eup %7408 }
0x21b3   :  { %v3736_v28 = vadd.f32 1.0, %v7409_v31  ;;  %v7411_v4 = vpop.eup %7410 }
0x21b5   :  { %7412 = vrcp.f32 %v3736_v28 }
0x21b6   :  { %7414 = vpow2.f32 %v5998_v20  ;;  %v9307_v20 = vld [vmem:[#allocation10] ss:$0 sm:$0xff] }
0x21bf   :  { %v7413_v15 = vpop.eup %7412 }
0x21c0   :  { %v3744_v42 = vmul.f32 %v7413_v15, %v7411_v4  ;;  %v7415_v13 = vpop.eup %7414  ;;  %v3743_v36 = vmul.f32 %v7413_v15, %v3649_v30 }
0x21c1   :  { %v3737_v32 = vadd.f32 1.0, %v7415_v13 }
0x21c2   :  { %3746 = vrot.lane.b32.xlu0 %v3744_v42, %s7821_s0 }
0x21c3   :  { %7416 = vrcp.f32 %v3737_v32 }
0x21cd   :  { %v7417_v55 = vpop.eup %7416 }
0x2234   :  { %v3747_v23 = vpop.permute.xlu0 %3746 }
0x2235   :  { %v3749_v6 = vadd.f32 %v3747_v23, %v3743_v36  ;;  %v4039_v36 = vadd.f32 %v9307_v20, %v9211_v17 }
0x2237   :  { %7418 = vtanh.f32 %v3749_v6 }
0x2241   :  { %v7419_v18 = vpop.eup %7418 }
0x2242   :  { %v3751_v40 = vmul.f32 %v7419_v18, %v7417_v55 }
0x2244   :  { %3753 = vrot.lane.b32.xlu1 %v3751_v40, %s7821_s0 }
0x22b6   :  { %v3754_v58 = vpop.permute.xlu1 %3753 }
0x22b7   :  { %5999 = vmatmul.mubr.msk.f32.vlgmr.msra.gmra.mrb[26].mxu0 %vm3154_vm11, %v3754_v58  ;;  %6324 = vmatmul.mubr.msk.f32.gmra.mrb[14].mxu1 %vm3154_vm11, %v3754_v58 }
0x22b8   :  { %6671 = vmatpush1.bf16.msra.mxu0 %v9085_v47  ;;  %3921 = vmatprep.mubr.f32.mxu0 %v7820_v1 }
0x22b9   :  { %6673 = vmatprep.subr.bf16.mxu0 %v9087_v2 }
0x22bc   :  { %6675 = vmatpush1.bf16.msra.mxu0 %v9104_v33 }
0x22bd   :  { %6677 = vmatprep.subr.bf16.mxu0 %v9107_v27 }
0x22c0   :  { %6679 = vmatpush1.bf16.msra.mxu0 %v9124_v46 }
0x22c1   :  { %6681 = vmatprep.subr.bf16.mxu0 %v9127_v16 }
0x22c4   :  { %6683 = vmatpush1.bf16.msra.mxu0 %v9137_v12 }
0x238a   :  { %v3823_v10 = vpop.f32.mrb[26].mxu0  ;;  %v9275_v48 = vpop.f32.mrb[14].mxu1 }
0x238b   :  { %v6795_v14 = vadd.f32 %v3823_v10, %v9173_v29  ;;  %v3825_v47 = vpop.f32.mrb[27].mxu0  ;;  %v9278_v21 = vpop.f32.mrb[15].mxu1 }
0x238c   :  { %v6796_v2 = vadd.f32 %v3825_v47, %v9176_v45 }
0x238d   :  { %v6000_v59 = vmul.f32 -1.442695, %v6795_v14 }
0x238e   :  { %v6001_v12 = vmul.f32 -1.442695, %v6796_v2 }
0x238f   :  { %7420 = vpow2.f32 %v6000_v59 }
0x2390   :  { %7422 = vtanh.f32 %v6796_v2 }
0x2399   :  { %v7421_v33 = vpop.eup %7420 }
0x239a   :  { %v3836_v27 = vadd.f32 1.0, %v7421_v33  ;;  %v7423_v46 = vpop.eup %7422 }
0x239c   :  { %7424 = vrcp.f32 %v3836_v27 }
0x239d   :  { %7426 = vpow2.f32 %v6001_v12  ;;  %v4044_v12 = vadd.f32 %v9208_v26, %v9307_v20 }
0x23a6   :  { %v7425_v16 = vpop.eup %7424 }
0x23a7   :  { %v3844_v22 = vmul.f32 %v7425_v16, %v7423_v46  ;;  %v7427_v25 = vpop.eup %7426  ;;  %v3843_v44 = vmul.f32 %v7425_v16, %v3749_v6 }
0x23a8   :  { %v3837_v9 = vadd.f32 1.0, %v7427_v25 }
0x23a9   :  { %3846 = vrot.lane.b32.xlu0 %v3844_v22, %s7821_s0 }
0x23aa   :  { %7428 = vrcp.f32 %v3837_v9 }
0x23b4   :  { %v7429_v49 = vpop.eup %7428 }
0x241b   :  { %v3847_v37 = vpop.permute.xlu0 %3846 }
0x241c   :  { %v3849_v5 = vadd.f32 %v3847_v37, %v3843_v44 }
0x241e   :  { %7430 = vtanh.f32 %v3849_v5 }
0x2428   :  { %v7431_v62 = vpop.eup %7430 }
0x2429   :  { %v3851_v57 = vmul.f32 %v7431_v62, %v7429_v49 }
0x242b   :  { %3853 = vrot.lane.b32.xlu1 %v3851_v57, %s7821_s0 }
0x249d   :  { %v3854_v38 = vpop.permute.xlu1 %3853 }
0x249e   :  { %6002 = vmatmul.mubr.msk.f32.vlgmr.msra.gmra.mrb[28].mxu0 %vm3154_vm11, %v3854_v38  ;;  %6326 = vmatprep.mubr.msk.f32.mxu1 %vm3154_vm11, %v3854_v38 }
0x2571   :  { %v3923_v52 = vpop.f32.mrb[28].mxu0 }
0x2572   :  { %v6797_v8 = vadd.f32 %v3923_v52, %v9173_v29  ;;  %v3925_v60 = vpop.f32.mrb[29].mxu0  ;;  %v4080_v29 = vld [vmem:[#allocation9 + $0x18] sm:$0xff] }
0x2573   :  { %v6798_v53 = vadd.f32 %v3925_v60, %v9176_v45  ;;  %v9291_v35 = vpack.c.bf16 %v4080_v29, %v4079_v39 }
0x2574   :  { %v6003_v50 = vmul.f32 -1.442695, %v6797_v8 }
0x2575   :  { %6705 = vmatpush3.bf16.msra.mxu1 %v9291_v35  ;;  %v6004_v45 = vmul.f32 -1.442695, %v6798_v53 }
0x2576   :  { %7432 = vpow2.f32 %v6003_v50  ;;  %6706 = vmatprep.subr.bf16.mxu1 %v7818_v0 }
0x2577   :  { %7434 = vtanh.f32 %v6798_v53 }
0x2580   :  { %v7433_v54 = vpop.eup %7432 }
0x2581   :  { %v3936_v7 = vadd.f32 1.0, %v7433_v54  ;;  %v7435_v24 = vpop.eup %7434 }
0x2583   :  { %7436 = vrcp.f32 %v3936_v7 }
0x2584   :  { %7438 = vpow2.f32 %v6004_v45 }
0x258d   :  { %v7437_v34 = vpop.eup %7436 }
0x258e   :  { %v3944_v30 = vmul.f32 %v7437_v34, %v7435_v24  ;;  %v7439_v56 = vpop.eup %7438  ;;  %v3943_v51 = vmul.f32 %v7437_v34, %v3849_v5  ;;  %v4049_v24 = vadd.f32 %v9307_v20, %v9245_v11 }
0x258f   :  { %v3937_v19 = vadd.f32 1.0, %v7439_v56 }
0x2590   :  { %3946 = vrot.lane.b32.xlu0 %v3944_v30, %s7821_s0 }
0x2591   :  { %7440 = vrcp.f32 %v3937_v19 }
0x259b   :  { %v7441_v28 = vpop.eup %7440 }
0x2602   :  { %v3947_v3 = vpop.permute.xlu0 %3946 }
0x2603   :  { %v3949_v31 = vadd.f32 %v3947_v3, %v3943_v51 }
0x2605   :  { %7442 = vtanh.f32 %v3949_v31 }
0x260f   :  { %v7443_v4 = vpop.eup %7442 }
0x2610   :  { %v3951_v15 = vmul.f32 %v7443_v4, %v7441_v28 }
0x2612   :  { %3968 = vrot.lane.b32.xlu1 %v3951_v15, %s7821_s0 }
0x2684   :  { %v3969_v42 = vpop.permute.xlu1 %3968 }
0x2685   :  { %6327 = vmatmul.mubr.msk.f32.gmra.mrb[16].mxu1 %vm3154_vm11, %v3969_v42 }
0x2686   :  { %6337 = vmatprep.mubr.msk.f32.mxu1 %vm7819_vm0, %v7820_v1 }
0x2689   :  { %6338 = vmatmul.mubr.f32.vlgmr.msra.gmra.mrb[18].mxu1 %v7820_v1 }
0x268a   :  { %6708 = vmatpush3.bf16.msra.mxu1 %v9288_v43  ;;  %6348 = vmatprep.mubr.msk.f32.mxu1 %vm7819_vm0, %v7820_v1 }
0x268b   :  { %6709 = vmatprep.subr.bf16.mxu1 %v7818_v0 }
0x268e   :  { %6711 = vmatpush3.bf16.msra.mxu1 %v9291_v35 }
0x268f   :  { %6712 = vmatprep.subr.bf16.mxu1 %v7818_v0 }
0x2758   :  { %v9309_v13 = vpop.f32.mrb[16].mxu1 }
0x2759   :  { %v9311_v32 = vpop.f32.mrb[17].mxu1 }
0x275c   :  { %v4147_v23 = vpop.f32.mrb[18].mxu1 }
0x275d   :  { %v4151_v6 = vadd.f32 %v4147_v23, %v4039_v36  ;;  %v6339_v55 = vpop.f32.mrb[19].mxu1  ;;  %v4054_v36 = vadd.f32 %v9242_v63, %v9307_v20 }
0x275f   :  { %7444 = vtanh.f32 %v4151_v6  ;;  %v6014_v40 = vmul.f32 -1.442695, %v4151_v6 }
0x2761   :  { %7446 = vpow2.f32 %v6014_v40 }
0x2769   :  { %v7445_v18 = vpop.eup %7444 }
0x276a   :  { %4161 = vrot.lane.b32.xlu0 %v7445_v18, %s7821_s0 }
0x276b   :  { %v7447_v58 = vpop.eup %7446 }
0x276c   :  { %v4155_v10 = vadd.f32 1.0, %v7447_v58 }
0x276e   :  { %7448 = vrcp.f32 %v4155_v10 }
0x2778   :  { %v7449_v14 = vpop.eup %7448 }
0x2779   :  { %v4159_v2 = vmul.f32 0.0, %v7449_v14 }
0x27dc   :  { %v4162_v47 = vpop.permute.xlu0 %4161 }
0x27dd   :  { %v4164_v59 = vmul.f32 %v7449_v14, %v4162_v47 }
0x27df   :  { %4166 = vrot.lane.b32.xlu1 %v4164_v59, %s7822_s16 }
0x2851   :  { %v4167_v33 = vpop.permute.xlu1 %4166 }
0x2852   :  { %v4169_v17 = vadd.f32 %v4167_v33, %v4159_v2 }
0x2854   :  { %7450 = vtanh.f32 %v4169_v17 }
0x285e   :  { %v7451_v27 = vpop.eup %7450 }
0x285f   :  { %4172 = vrot.lane.b32.xlu0 %v7451_v27, %s7821_s0 }
0x28d1   :  { %v4173_v46 = vpop.permute.xlu0 %4172 }
0x28d2   :  { %v4175_v16 = vmul.f32 %v7449_v14, %v4173_v46 }
0x28d4   :  { %4177 = vrot.lane.b32.xlu1 %v4175_v16, %s7822_s16 }
0x2946   :  { %v9319_v22 = vpop.permute.xlu1 %4177 }
0x2947   :  { %6349 = vmatmul.mubr.msk.f32.vlgmr.msra.gmra.mrb[20].mxu1 %vm330_vm10, %v9319_v22 }
0x2948   :  { %6714 = vmatpush3.bf16.msra.mxu1 %v9288_v43  ;;  %6359 = vmatprep.mubr.msk.f32.mxu1 %vm7819_vm0, %v7820_v1 }
0x2949   :  { %6715 = vmatprep.subr.bf16.mxu1 %v7818_v0 }
0x294c   :  { %6717 = vmatpush3.bf16.msra.mxu1 %v9291_v35 }
0x294d   :  { %6718 = vmatprep.subr.bf16.mxu1 %v7818_v0 }
0x2a1a   :  { %v4247_v25 = vpop.f32.mrb[20].mxu1 }
0x2a1b   :  { %v4251_v9 = vadd.f32 %v4247_v25, %v4044_v12  ;;  %v6350_v44 = vpop.f32.mrb[21].mxu1  ;;  %v4059_v12 = vadd.f32 %v9307_v20, %v9278_v21 }
0x2a1d   :  { %7452 = vtanh.f32 %v4251_v9  ;;  %v6016_v5 = vmul.f32 -1.442695, %v4251_v9 }
0x2a1f   :  { %7454 = vpow2.f32 %v6016_v5 }
0x2a27   :  { %v7453_v37 = vpop.eup %7452 }
0x2a28   :  { %4261 = vrot.lane.b32.xlu0 %v7453_v37, %s7821_s0 }
0x2a29   :  { %v7455_v49 = vpop.eup %7454 }
0x2a2a   :  { %v4255_v62 = vadd.f32 1.0, %v7455_v49 }
0x2a2c   :  { %7456 = vrcp.f32 %v4255_v62 }
0x2a36   :  { %v7457_v57 = vpop.eup %7456 }
0x2a37   :  { %v4259_v8 = vmul.f32 %v7457_v57, %v4169_v17 }
0x2a9a   :  { %v4262_v38 = vpop.permute.xlu0 %4261 }
0x2a9b   :  { %v4264_v52 = vmul.f32 %v7457_v57, %v4262_v38 }
0x2a9d   :  { %4266 = vrot.lane.b32.xlu1 %v4264_v52, %s7822_s16 }
0x2b0f   :  { %v4267_v60 = vpop.permute.xlu1 %4266 }
0x2b10   :  { %v4269_v26 = vadd.f32 %v4267_v60, %v4259_v8 }
0x2b12   :  { %7458 = vtanh.f32 %v4269_v26 }
0x2b1c   :  { %v7459_v50 = vpop.eup %7458 }
0x2b1d   :  { %4272 = vrot.lane.b32.xlu0 %v7459_v50, %s7821_s0 }
0x2b8f   :  { %v4273_v53 = vpop.permute.xlu0 %4272 }
0x2b90   :  { %v4275_v54 = vmul.f32 %v7457_v57, %v4273_v53 }
0x2b92   :  { %4277 = vrot.lane.b32.xlu1 %v4275_v54, %s7822_s16 }
0x2c04   :  { %v9335_v7 = vpop.permute.xlu1 %4277 }
0x2c05   :  { %6360 = vmatmul.mubr.msk.f32.vlgmr.msra.gmra.mrb[22].mxu1 %vm330_vm10, %v9335_v7 }
0x2c06   :  { %6720 = vmatpush3.bf16.msra.mxu1 %v9288_v43  ;;  %6370 = vmatprep.mubr.msk.f32.mxu1 %vm7819_vm0, %v7820_v1 }
0x2c07   :  { %6721 = vmatprep.subr.bf16.mxu1 %v7818_v0 }
0x2c0a   :  { %6723 = vmatpush3.bf16.msra.mxu1 %v9291_v35 }
0x2c0b   :  { %6724 = vmatprep.subr.bf16.mxu1 %v7818_v0 }
0x2cd8   :  { %v4347_v34 = vpop.f32.mrb[22].mxu1 }
0x2cd9   :  { %v4351_v30 = vadd.f32 %v4347_v34, %v4049_v24  ;;  %v6361_v41 = vpop.f32.mrb[23].mxu1  ;;  %v4064_v24 = vadd.f32 %v9275_v48, %v9307_v20 }
0x2cdb   :  { %7460 = vtanh.f32 %v4351_v30  ;;  %v6018_v39 = vmul.f32 -1.442695, %v4351_v30 }
0x2cdd   :  { %7462 = vpow2.f32 %v6018_v39 }
0x2ce5   :  { %v7461_v61 = vpop.eup %7460 }
0x2ce6   :  { %4361 = vrot.lane.b32.xlu0 %v7461_v61, %s7821_s0 }
0x2ce7   :  { %v7463_v29 = vpop.eup %7462 }
0x2ce8   :  { %v4355_v45 = vadd.f32 1.0, %v7463_v29 }
0x2cea   :  { %7464 = vrcp.f32 %v4355_v45 }
0x2cf4   :  { %v7465_v56 = vpop.eup %7464 }
0x2cf5   :  { %v4359_v3 = vmul.f32 %v7465_v56, %v4269_v26 }
0x2d58   :  { %v4362_v19 = vpop.permute.xlu0 %4361 }
0x2d59   :  { %v4364_v51 = vmul.f32 %v7465_v56, %v4362_v19 }
0x2d5b   :  { %4366 = vrot.lane.b32.xlu1 %v4364_v51, %s7822_s16 }
0x2dcd   :  { %v4367_v31 = vpop.permute.xlu1 %4366 }
0x2dce   :  { %v4369_v11 = vadd.f32 %v4367_v31, %v4359_v3 }
0x2dd0   :  { %7466 = vtanh.f32 %v4369_v11 }
0x2dda   :  { %v7467_v28 = vpop.eup %7466 }
0x2ddb   :  { %4372 = vrot.lane.b32.xlu0 %v7467_v28, %s7821_s0 }
0x2e4d   :  { %v4373_v4 = vpop.permute.xlu0 %4372 }
0x2e4e   :  { %v4375_v15 = vmul.f32 %v7465_v56, %v4373_v4 }
0x2e50   :  { %4377 = vrot.lane.b32.xlu1 %v4375_v15, %s7822_s16 }
0x2ec2   :  { %v9351_v42 = vpop.permute.xlu1 %4377 }
0x2ec3   :  { %6371 = vmatmul.mubr.msk.f32.vlgmr.msra.gmra.mrb[24].mxu1 %vm330_vm10, %v9351_v42 }
0x2ec4   :  { %6726 = vmatpush3.bf16.msra.mxu1 %v9288_v43  ;;  %6381 = vmatprep.mubr.msk.f32.mxu1 %vm7819_vm0, %v7820_v1 }
0x2ec5   :  { %6727 = vmatprep.subr.bf16.mxu1 %v7818_v0 }
0x2ec8   :  { %6729 = vmatpush3.bf16.msra.mxu1 %v9291_v35 }
0x2ec9   :  { %6730 = vmatprep.subr.bf16.mxu1 %v7818_v0 }
0x2f96   :  { %v4447_v23 = vpop.f32.mrb[24].mxu1 }
0x2f97   :  { %v4451_v6 = vadd.f32 %v4447_v23, %v4054_v36  ;;  %v6372_v55 = vpop.f32.mrb[25].mxu1  ;;  %v4069_v36 = vadd.f32 %v9307_v20, %v9311_v32 }
0x2f99   :  { %7468 = vtanh.f32 %v4451_v6  ;;  %v6020_v40 = vmul.f32 -1.442695, %v4451_v6 }
0x2f9b   :  { %7470 = vpow2.f32 %v6020_v40 }
0x2fa3   :  { %v7469_v18 = vpop.eup %7468 }
0x2fa4   :  { %4461 = vrot.lane.b32.xlu0 %v7469_v18, %s7821_s0 }
0x2fa5   :  { %v7471_v58 = vpop.eup %7470 }
0x2fa6   :  { %v4455_v10 = vadd.f32 1.0, %v7471_v58 }
0x2fa8   :  { %7472 = vrcp.f32 %v4455_v10 }
0x2fb2   :  { %v7473_v14 = vpop.eup %7472 }
0x2fb3   :  { %v4459_v2 = vmul.f32 %v7473_v14, %v4369_v11 }
0x3016   :  { %v4462_v47 = vpop.permute.xlu0 %4461 }
0x3017   :  { %v4464_v59 = vmul.f32 %v7473_v14, %v4462_v47 }
0x3019   :  { %4466 = vrot.lane.b32.xlu1 %v4464_v59, %s7822_s16 }
0x308b   :  { %v4467_v33 = vpop.permute.xlu1 %4466 }
0x308c   :  { %v4469_v63 = vadd.f32 %v4467_v33, %v4459_v2  ;;  %v4876_v2 = vld [vmem:[#allocation12] sm:$0xff]  ;;  %v4877_v33 = vld [vmem:[#allocation12 + $0x8] sm:$0xff] }
0x308e   :  { %7474 = vtanh.f32 %v4469_v63 }
0x3098   :  { %v7475_v17 = vpop.eup %7474 }
0x3099   :  { %4472 = vrot.lane.b32.xlu0 %v7475_v17, %s7821_s0 }
0x310b   :  { %v4473_v27 = vpop.permute.xlu0 %4472 }
0x310c   :  { %v4475_v46 = vmul.f32 %v7473_v14, %v4473_v27 }
0x310e   :  { %4477 = vrot.lane.b32.xlu1 %v4475_v46, %s7822_s16 }
0x3180   :  { %v9367_v16 = vpop.permute.xlu1 %4477 }
0x3181   :  { %6382 = vmatmul.mubr.msk.f32.vlgmr.msra.gmra.mrb[26].mxu1 %vm330_vm10, %v9367_v16 }
0x3182   :  { %6732 = vmatpush3.bf16.msra.mxu1 %v9288_v43  ;;  %6392 = vmatprep.mubr.msk.f32.mxu1 %vm7819_vm0, %v7820_v1 }
0x3183   :  { %6733 = vmatprep.subr.bf16.mxu1 %v7818_v0 }
0x3186   :  { %6735 = vmatpush3.bf16.msra.mxu1 %v9291_v35 }
0x3187   :  { %6736 = vmatprep.subr.bf16.mxu1 %v7818_v0 }
0x3254   :  { %v4547_v25 = vpop.f32.mrb[26].mxu1 }
0x3255   :  { %v4551_v9 = vadd.f32 %v4547_v25, %v4059_v12  ;;  %v6383_v44 = vpop.f32.mrb[27].mxu1  ;;  %v4878_v12 = vld [vmem:[#allocation12 + $0x10] sm:$0xff]  ;;  %v4879_v25 = vld [vmem:[#allocation12 + $0x18] sm:$0xff] }
0x3257   :  { %7476 = vtanh.f32 %v4551_v9  ;;  %v6022_v5 = vmul.f32 -1.442695, %v4551_v9  ;;  %v6752_v9 = vpack.c.bf16 %v4879_v25, %v4878_v12 }
0x3259   :  { %7478 = vpow2.f32 %v6022_v5 }
0x3261   :  { %v7477_v37 = vpop.eup %7476 }
0x3262   :  { %4561 = vrot.lane.b32.xlu0 %v7477_v37, %s7821_s0 }
0x3263   :  { %v7479_v49 = vpop.eup %7478 }
0x3264   :  { %v4555_v62 = vadd.f32 1.0, %v7479_v49 }
0x3266   :  { %7480 = vrcp.f32 %v4555_v62 }
0x3270   :  { %v7481_v57 = vpop.eup %7480 }
0x3271   :  { %v4559_v8 = vmul.f32 %v7481_v57, %v4469_v63  ;;  %v6748_v63 = vpack.c.bf16 %v4877_v33, %v4876_v2 }
0x32d4   :  { %v4562_v38 = vpop.permute.xlu0 %4561 }
0x32d5   :  { %v4564_v52 = vmul.f32 %v7481_v57, %v4562_v38 }
0x32d7   :  { %4566 = vrot.lane.b32.xlu1 %v4564_v52, %s7822_s16 }
0x3349   :  { %v4567_v60 = vpop.permute.xlu1 %4566 }
0x334a   :  { %v4569_v21 = vadd.f32 %v4567_v60, %v4559_v8 }
0x334c   :  { %7482 = vtanh.f32 %v4569_v21 }
0x3356   :  { %v7483_v26 = vpop.eup %7482 }
0x3357   :  { %4572 = vrot.lane.b32.xlu0 %v7483_v26, %s7821_s0 }
0x33c9   :  { %v4573_v50 = vpop.permute.xlu0 %4572 }
0x33ca   :  { %v4575_v53 = vmul.f32 %v7481_v57, %v4573_v50 }
0x33cc   :  { %4577 = vrot.lane.b32.xlu1 %v4575_v53, %s7822_s16 }
0x343e   :  { %v9383_v54 = vpop.permute.xlu1 %4577 }
0x343f   :  { %6393 = vmatmul.mubr.msk.f32.vlgmr.msra.gmra.mrb[28].mxu1 %vm330_vm10, %v9383_v54 }
0x3440   :  { %6738 = vmatpush3.bf16.msra.mxu1 %v9288_v43  ;;  %6403 = vmatprep.mubr.msk.f32.mxu1 %vm7819_vm0, %v7820_v1 }
0x3441   :  { %6739 = vmatprep.subr.bf16.mxu1 %v7818_v0 }
0x3444   :  { %6741 = vmatpush3.bf16.msra.mxu1 %v9291_v35 }
0x3445   :  { %6742 = vmatprep.subr.bf16.mxu1 %v7818_v0 }
0x3512   :  { %v4647_v34 = vpop.f32.mrb[28].mxu1 }
0x3513   :  { %v4651_v30 = vadd.f32 %v4647_v34, %v4064_v24  ;;  %v6394_v41 = vpop.f32.mrb[29].mxu1  ;;  %v4997_v24 = vld [vmem:[#allocation13] sm:$0xff]  ;;  %v4998_v34 = vld [vmem:[#allocation13 + $0x8] sm:$0xff] }
0x3515   :  { %7484 = vtanh.f32 %v4651_v30  ;;  %v6024_v39 = vmul.f32 -1.442695, %v4651_v30  ;;  %v9439_v30 = vpack.c.bf16 %v4998_v34, %v4997_v24 }
0x3517   :  { %7486 = vpow2.f32 %v6024_v39 }
0x351f   :  { %v7485_v61 = vpop.eup %7484 }
0x3520   :  { %4661 = vrot.lane.b32.xlu0 %v7485_v61, %s7821_s0 }
0x3521   :  { %v7487_v29 = vpop.eup %7486 }
0x3522   :  { %v4655_v45 = vadd.f32 1.0, %v7487_v29 }
0x3524   :  { %7488 = vrcp.f32 %v4655_v45  ;;  %v9453_v45 = vld [vmem:[#allocation15] ss:$0 sm:$0xff] }
0x352e   :  { %v7489_v56 = vpop.eup %7488 }
0x352f   :  { %v4659_v3 = vmul.f32 %v7489_v56, %v4569_v21 }
0x3592   :  { %v4662_v19 = vpop.permute.xlu0 %4661 }
0x3593   :  { %v4664_v51 = vmul.f32 %v7489_v56, %v4662_v19 }
0x3595   :  { %4666 = vrot.lane.b32.xlu1 %v4664_v51, %s7822_s16 }
0x3607   :  { %v4667_v31 = vpop.permute.xlu1 %4666 }
0x3608   :  { %v4669_v48 = vadd.f32 %v4667_v31, %v4659_v3 }
0x360a   :  { %7490 = vtanh.f32 %v4669_v48 }
0x3614   :  { %v7491_v11 = vpop.eup %7490 }
0x3615   :  { %4672 = vrot.lane.b32.xlu0 %v7491_v11, %s7821_s0 }
0x3687   :  { %v4673_v28 = vpop.permute.xlu0 %4672 }
0x3688   :  { %v4675_v4 = vmul.f32 %v7489_v56, %v4673_v28 }
0x368a   :  { %4677 = vrot.lane.b32.xlu1 %v4675_v4, %s7822_s16 }
0x36fc   :  { %v4678_v15 = vpop.permute.xlu1 %4677 }
0x36fd   :  { %6404 = vmatmul.mubr.msk.f32.vlgmr.msra.gmra.mrb[30].mxu1 %vm330_vm10, %v4678_v15 }
0x36fe   :  { %6744 = vmatpush3.bf16.msra.mxu1 %v9288_v43  ;;  %6414 = vmatprep.mubr.msk.f32.mxu1 %vm7819_vm0, %v7820_v1 }
0x36ff   :  { %6745 = vmatprep.subr.bf16.mxu1 %v7818_v0 }
0x3702   :  { %6747 = vmatpush3.bf16.msra.mxu1 %v9291_v35 }
0x3703   :  { %6749 = vmatprep.subr.bf16.mxu1 %v6748_v63 }
0x37d0   :  { %v4747_v23 = vpop.f32.mrb[30].mxu1 }
0x37d1   :  { %v4751_v6 = vadd.f32 %v4747_v23, %v4069_v36  ;;  %v6405_v55 = vpop.f32.mrb[31].mxu1 }
0x37d3   :  { %7492 = vtanh.f32 %v4751_v6  ;;  %v6026_v40 = vmul.f32 -1.442695, %v4751_v6 }
0x37d5   :  { %7494 = vpow2.f32 %v6026_v40 }
0x37dd   :  { %v7493_v18 = vpop.eup %7492 }
0x37de   :  { %4761 = vrot.lane.b32.xlu0 %v7493_v18, %s7821_s0 }
0x37df   :  { %v7495_v43 = vpop.eup %7494 }
0x37e0   :  { %v4755_v58 = vadd.f32 1.0, %v7495_v43 }
0x37e2   :  { %7496 = vrcp.f32 %v4755_v58 }
0x37ec   :  { %v7497_v10 = vpop.eup %7496 }
0x37ed   :  { %v4759_v35 = vmul.f32 %v7497_v10, %v4669_v48 }
0x3850   :  { %v4762_v14 = vpop.permute.xlu0 %4761 }
0x3851   :  { %v4764_v47 = vmul.f32 %v7497_v10, %v4762_v14 }
0x3853   :  { %4766 = vrot.lane.b32.xlu1 %v4764_v47, %s7822_s16 }
0x38c5   :  { %v4767_v59 = vpop.permute.xlu1 %4766 }
0x38c6   :  { %v4769_v32 = vadd.f32 %v4767_v59, %v4759_v35 }
0x38c8   :  { %7498 = vtanh.f32 %v4769_v32 }
0x38d2   :  { %v7499_v17 = vpop.eup %7498 }
0x38d3   :  { %4772 = vrot.lane.b32.xlu0 %v7499_v17, %s7821_s0 }
0x3945   :  { %v4773_v27 = vpop.permute.xlu0 %4772 }
0x3946   :  { %v4775_v46 = vmul.f32 %v7497_v10, %v4773_v27 }
0x3948   :  { %4777 = vrot.lane.b32.xlu1 %v4775_v46, %s7822_s16 }
0x39ba   :  { %v4778_v44 = vpop.permute.xlu1 %4777 }
0x39bb   :  { %6415 = vmatmul.mubr.msk.f32.vlgmr.msra.gmra.mrb[32].mxu1 %vm330_vm10, %v4778_v44 }
0x39bc   :  { %6751 = vmatpush3.bf16.msra.mxu1 %v6748_v63  ;;  %6425 = vmatprep.mubr.msk.f32.mxu1 %vm330_vm10, %v9319_v22  ;;  %v4074_v22 = vadd.f32 %v9309_v13, %v9307_v20 }
0x39bd   :  { %6753 = vmatprep.subr.bf16.mxu1 %v6752_v9 }
0x39c0   :  { %6755 = vmatpush3.bf16.msra.mxu1 %v6752_v9 }
0x39c1   :  { %6756 = vmatprep.subr.bf16.mxu1 %v7818_v0 }
0x39c3   :  { %6426 = vmatmul.mubr.msk.f32.vlgmr.msra.gmra.mrb[34].mxu1 %vm330_vm10, %v9335_v7 }
0x39c4   :  { %6428 = vmatprep.mubr.msk.f32.mxu1 %vm330_vm10, %v9351_v42  ;;  %6758 = vmatpush3.bf16.msra.mxu1 %v9439_v30 }
0x39c5   :  { %6759 = vmatprep.subr.bf16.mxu1 %v7818_v0 }
0x39c7   :  { %6429 = vmatmul.mubr.msk.f32.gmra.mrb[36].mxu1 %vm330_vm10, %v9367_v16 }
0x39c8   :  { %6431 = vmatprep.mubr.msk.f32.mxu1 %vm330_vm10, %v9383_v54 }
0x39cb   :  { %6432 = vmatmul.mubr.msk.f32.gmra.mrb[38].mxu1 %vm330_vm10, %v4678_v15 }
0x39cc   :  { %6434 = vmatprep.mubr.msk.f32.mxu1 %vm330_vm10, %v4778_v44 }
0x3a8e   :  { %v4847_v37 = vpop.f32.mrb[32].mxu1 }
0x3a8f   :  { %v4851_v5 = vadd.f32 %v4847_v37, %v4074_v22  ;;  %v6416_v49 = vpop.f32.mrb[33].mxu1 }
0x3a91   :  { %7500 = vtanh.f32 %v4851_v5  ;;  %v6028_v8 = vmul.f32 -1.442695, %v4851_v5 }
0x3a93   :  { %7502 = vpow2.f32 %v6028_v8 }
0x3a96   :  { %v9427_v7 = vpop.f32.mrb[34].mxu1 }
0x3a97   :  { %v4958_v42 = vpop.f32.mrb[35].mxu1  ;;  %v4964_v47 = vadd.f32 %v9427_v7, %v9453_v45 }
0x3a98   :  { %v4959_v51 = vadd.f32 %v9453_v45, %v4958_v42 }
0x3a9a   :  { %v9429_v62 = vpop.f32.mrb[36].mxu1 }
0x3a9b   :  { %v7501_v16 = vpop.eup %7500  ;;  %v9431_v57 = vpop.f32.mrb[37].mxu1 }
0x3a9c   :  { %4861 = vrot.lane.b32.xlu0 %v7501_v16, %s7821_s0  ;;  %v4969_v7 = vadd.f32 %v9453_v45, %v9431_v57 }
0x3a9d   :  { %v7503_v20 = vpop.eup %7502 }
0x3a9e   :  { %v9434_v38 = vpop.f32.mrb[38].mxu1  ;;  %v4855_v13 = vadd.f32 1.0, %v7503_v20 }
0x3a9f   :  { %v9436_v52 = vpop.f32.mrb[39].mxu1 }
0x3aa0   :  { %7504 = vrcp.f32 %v4855_v13 }
0x3aaa   :  { %v7505_v60 = vpop.eup %7504 }
0x3aab   :  { %v4859_v50 = vmul.f32 %v7505_v60, %v4769_v32 }
0x3b0e   :  { %v4862_v21 = vpop.permute.xlu0 %4861 }
0x3b0f   :  { %v4864_v26 = vmul.f32 %v7505_v60, %v4862_v21 }
0x3b11   :  { %4866 = vrot.lane.b32.xlu1 %v4864_v26, %s7822_s16 }
0x3b83   :  { %v4867_v53 = vpop.permute.xlu1 %4866 }
0x3b84   :  { %v4869_v54 = vadd.f32 %v4867_v53, %v4859_v50 }
0x3b86   :  { %7506 = vtanh.f32 %v4869_v54 }
0x3b90   :  { %v7507_v41 = vpop.eup %7506 }
0x3b91   :  { %4872 = vrot.lane.b32.xlu0 %v7507_v41, %s7821_s0  ;;  %s7824_s0 = smov 80  }
0x3c03   :  { %v4873_v61 = vpop.permute.xlu0 %4872 }
0x3c04   :  { %v4875_v39 = vmul.f32 %v7505_v60, %v4873_v61 }
0x3c06   :  { %4888 = vrot.lane.b32.xlu1 %v4875_v39, %s7822_s16 }
0x3c78   :  { %v4889_v29 = vpop.permute.xlu1 %4888 }
0x3c79   :  { %6435 = vmatmul.mubr.msk.f32.gmra.mrb[40].mxu1 %vm330_vm10, %v4889_v29  ;;  %v4974_v29 = vadd.f32 %v9429_v62, %v9453_v45 }
0x3c7a   :  { %6441 = vmatprep.mubr.msk.f32.mxu1 %vm7819_vm0, %v7820_v1 }
0x3c7d   :  { %6442 = vmatmul.mubr.f32.vlgmr.msra.gmra.mrb[42].mxu1 %v7820_v1 }
0x3c7e   :  { %6761 = vmatpush3.bf16.msra.mxu1 %v9439_v30  ;;  %6448 = vmatprep.mubr.msk.f32.mxu1 %vm7819_vm0, %v7820_v1 }
0x3c7f   :  { %6762 = vmatprep.subr.bf16.mxu1 %v7818_v0 }
0x3d4c   :  { %v9455_v56 = vpop.f32.mrb[40].mxu1 }
0x3d4d   :  { %v9457_v19 = vpop.f32.mrb[41].mxu1 }
0x3d50   :  { %v5068_v3 = vpop.f32.mrb[42].mxu1 }
0x3d51   :  { %v5072_v31 = vadd.f32 %v5068_v3, %v4959_v51  ;;  %v6443_v48 = vpop.f32.mrb[43].mxu1 }
0x3d53   :  { %7508 = vtanh.f32 %v5072_v31  ;;  %v6038_v28 = vmul.f32 -1.442695, %v5072_v31 }
0x3d55   :  { %7510 = vpow2.f32 %v6038_v28 }
0x3d5d   :  { %v7509_v11 = vpop.eup %7508 }
0x3d5e   :  { %5082 = vrot.lane.b32.xlu0 %v7509_v11, %s7823_s6 }
0x3d5f   :  { %v7511_v4 = vpop.eup %7510 }
0x3d60   :  { %v5076_v15 = vadd.f32 1.0, %v7511_v4 }
0x3d62   :  { %7512 = vrcp.f32 %v5076_v15 }
0x3d6c   :  { %v7513_v36 = vpop.eup %7512 }
0x3d6d   :  { %v5080_v55 = vmul.f32 0.0, %v7513_v36 }
0x3dd0   :  { %v5083_v23 = vpop.permute.xlu0 %5082 }
0x3dd1   :  { %v5085_v6 = vmul.f32 %v7513_v36, %v5083_v23 }
0x3dd3   :  { %5087 = vrot.lane.b32.xlu1 %v5085_v6, %s7813_s7 }
0x3e45   :  { %v5088_v18 = vpop.permute.xlu1 %5087 }
0x3e46   :  { %v5090_v40 = vadd.f32 %v5088_v18, %v5080_v55 }
0x3e48   :  { %7514 = vtanh.f32 %v5090_v40 }
0x3e52   :  { %v7515_v43 = vpop.eup %7514 }
0x3e53   :  { %5093 = vrot.lane.b32.xlu0 %v7515_v43, %s7822_s16 }
0x3ec5   :  { %v5094_v58 = vpop.permute.xlu0 %5093 }
0x3ec6   :  { %v5096_v10 = vmul.f32 %v7513_v36, %v5094_v58 }
0x3ec8   :  { %5098 = vrot.lane.b32.xlu1 %v5096_v10, %s7824_s0  ;;  %v4979_v10 = vadd.f32 %v9453_v45, %v9436_v52 }
0x3f3a   :  { %v5099_v14 = vpop.permute.xlu1 %5098 }
0x3f3b   :  { %6449 = vmatmul.mubr.msk.f32.vlgmr.msra.gmra.mrb[44].mxu1 %vm4999_vm12, %v5099_v14 }
0x3f3c   :  { %6764 = vmatpush3.bf16.msra.mxu1 %v9439_v30  ;;  %6455 = vmatprep.mubr.msk.f32.mxu1 %vm7819_vm0, %v7820_v1 }
0x3f3d   :  { %6765 = vmatprep.subr.bf16.mxu1 %v7818_v0 }
0x400e   :  { %v5168_v35 = vpop.f32.mrb[44].mxu1 }
0x400f   :  { %v5172_v59 = vadd.f32 %v5168_v35, %v4964_v47  ;;  %v6450_v32 = vpop.f32.mrb[45].mxu1 }
0x4011   :  { %7516 = vtanh.f32 %v5172_v59  ;;  %v6040_v33 = vmul.f32 -1.442695, %v5172_v59 }
0x4013   :  { %7518 = vpow2.f32 %v6040_v33 }
0x401b   :  { %v7517_v2 = vpop.eup %7516 }
0x401c   :  { %5182 = vrot.lane.b32.xlu0 %v7517_v2, %s7823_s6 }
0x401d   :  { %v7519_v63 = vpop.eup %7518 }
0x401e   :  { %v5176_v17 = vadd.f32 1.0, %v7519_v63 }
0x4020   :  { %7520 = vrcp.f32 %v5176_v17 }
0x402a   :  { %v7521_v27 = vpop.eup %7520 }
0x402b   :  { %v5180_v25 = vmul.f32 %v7521_v27, %v5090_v40 }
0x408e   :  { %v5183_v46 = vpop.permute.xlu0 %5182 }
0x408f   :  { %v5185_v12 = vmul.f32 %v7521_v27, %v5183_v46 }
0x4091   :  { %5187 = vrot.lane.b32.xlu1 %v5185_v12, %s7813_s7 }
0x4103   :  { %v5188_v9 = vpop.permute.xlu1 %5187 }
0x4104   :  { %v5190_v44 = vadd.f32 %v5188_v9, %v5180_v25 }
0x4106   :  { %7522 = vtanh.f32 %v5190_v44 }
0x4110   :  { %v7523_v22 = vpop.eup %7522 }
0x4111   :  { %5193 = vrot.lane.b32.xlu0 %v7523_v22, %s7822_s16 }
0x4183   :  { %v5194_v37 = vpop.permute.xlu0 %5193 }
0x4184   :  { %v5196_v5 = vmul.f32 %v7521_v27, %v5194_v37  ;;  %v4984_v37 = vadd.f32 %v9434_v38, %v9453_v45 }
0x4186   :  { %5198 = vrot.lane.b32.xlu1 %v5196_v5, %s7824_s0 }
0x41f8   :  { %v5199_v49 = vpop.permute.xlu1 %5198 }
0x41f9   :  { %6456 = vmatmul.mubr.msk.f32.vlgmr.msra.gmra.mrb[46].mxu1 %vm4999_vm12, %v5199_v49 }
0x41fa   :  { %6767 = vmatpush3.bf16.msra.mxu1 %v9439_v30  ;;  %6462 = vmatprep.mubr.msk.f32.mxu1 %vm7819_vm0, %v7820_v1 }
0x41fb   :  { %6768 = vmatprep.subr.bf16.mxu1 %v7818_v0 }
0x42cc   :  { %v5268_v42 = vpop.f32.mrb[46].mxu1 }
0x42cd   :  { %v5272_v16 = vadd.f32 %v5268_v42, %v4969_v7  ;;  %v6457_v8 = vpop.f32.mrb[47].mxu1 }
0x42cf   :  { %7524 = vtanh.f32 %v5272_v16  ;;  %v6042_v13 = vmul.f32 -1.442695, %v5272_v16 }
0x42d1   :  { %7526 = vpow2.f32 %v6042_v13 }
0x42d9   :  { %v7525_v20 = vpop.eup %7524 }
0x42da   :  { %5282 = vrot.lane.b32.xlu0 %v7525_v20, %s7823_s6 }
0x42db   :  { %v7527_v60 = vpop.eup %7526 }
0x42dc   :  { %v5276_v21 = vadd.f32 1.0, %v7527_v60 }
0x42de   :  { %7528 = vrcp.f32 %v5276_v21 }
0x42e8   :  { %v7529_v26 = vpop.eup %7528 }
0x42e9   :  { %v5280_v54 = vmul.f32 %v7529_v26, %v5190_v44 }
0x434c   :  { %v5283_v50 = vpop.permute.xlu0 %5282 }
0x434d   :  { %v5285_v53 = vmul.f32 %v7529_v26, %v5283_v50 }
0x434f   :  { %5287 = vrot.lane.b32.xlu1 %v5285_v53, %s7813_s7 }
0x43c1   :  { %v5288_v24 = vpop.permute.xlu1 %5287 }
0x43c2   :  { %v5290_v57 = vadd.f32 %v5288_v24, %v5280_v54 }
0x43c4   :  { %7530 = vtanh.f32 %v5290_v57 }
0x43ce   :  { %v7531_v34 = vpop.eup %7530 }
0x43cf   :  { %5293 = vrot.lane.b32.xlu0 %v7531_v34, %s7822_s16  ;;  %v4989_v34 = vadd.f32 %v9453_v45, %v9457_v19 }
0x4441   :  { %v5294_v41 = vpop.permute.xlu0 %5293 }
0x4442   :  { %v5296_v61 = vmul.f32 %v7529_v26, %v5294_v41 }
0x4444   :  { %5298 = vrot.lane.b32.xlu1 %v5296_v61, %s7824_s0 }
0x44b6   :  { %v5299_v39 = vpop.permute.xlu1 %5298 }
0x44b7   :  { %6463 = vmatmul.mubr.msk.f32.vlgmr.msra.gmra.mrb[48].mxu1 %vm4999_vm12, %v5299_v39 }
0x44b8   :  { %6770 = vmatpush3.bf16.msra.mxu1 %v9439_v30  ;;  %6469 = vmatprep.mubr.msk.f32.mxu1 %vm7819_vm0, %v7820_v1 }
0x44b9   :  { %6771 = vmatprep.subr.bf16.mxu1 %v7818_v0 }
0x458a   :  { %v5368_v51 = vpop.f32.mrb[48].mxu1 }
0x458b   :  { %v5372_v3 = vadd.f32 %v5368_v51, %v4974_v29  ;;  %v6464_v31 = vpop.f32.mrb[49].mxu1 }
0x458d   :  { %7532 = vtanh.f32 %v5372_v3  ;;  %v6044_v11 = vmul.f32 -1.442695, %v5372_v3 }
0x458f   :  { %7534 = vpow2.f32 %v6044_v11 }
0x4597   :  { %v7533_v48 = vpop.eup %7532 }
0x4598   :  { %5382 = vrot.lane.b32.xlu0 %v7533_v48, %s7823_s6 }
0x4599   :  { %v7535_v28 = vpop.eup %7534 }
0x459a   :  { %v5376_v4 = vadd.f32 1.0, %v7535_v28 }
0x459c   :  { %7536 = vrcp.f32 %v5376_v4 }
0x45a6   :  { %v7537_v15 = vpop.eup %7536 }
0x45a7   :  { %v5380_v6 = vmul.f32 %v7537_v15, %v5290_v57 }
0x460a   :  { %v5383_v36 = vpop.permute.xlu0 %5382 }
0x460b   :  { %v5385_v23 = vmul.f32 %v7537_v15, %v5383_v36 }
0x460d   :  { %5387 = vrot.lane.b32.xlu1 %v5385_v23, %s7813_s7 }
0x467f   :  { %v5388_v55 = vpop.permute.xlu1 %5387 }
0x4680   :  { %v5390_v62 = vadd.f32 %v5388_v55, %v5380_v6  ;;  %v4994_v6 = vadd.f32 %v9455_v56, %v9453_v45  ;;  %v5798_v56 = vld [vmem:[%s9563_s13] sm:$0xff] }
0x4682   :  { %7538 = vtanh.f32 %v5390_v62 }
0x468c   :  { %v7539_v18 = vpop.eup %7538 }
0x468d   :  { %5393 = vrot.lane.b32.xlu0 %v7539_v18, %s7822_s16 }
0x46ff   :  { %v5394_v40 = vpop.permute.xlu0 %5393 }
0x4700   :  { %v5396_v43 = vmul.f32 %v7537_v15, %v5394_v40 }
0x4702   :  { %5398 = vrot.lane.b32.xlu1 %v5396_v43, %s7824_s0 }
0x4774   :  { %v5399_v58 = vpop.permute.xlu1 %5398 }
0x4775   :  { %6470 = vmatmul.mubr.msk.f32.vlgmr.msra.gmra.mrb[50].mxu1 %vm4999_vm12, %v5399_v58 }
0x4776   :  { %6773 = vmatpush3.bf16.msra.mxu1 %v9439_v30  ;;  %6476 = vmatprep.mubr.msk.f32.mxu1 %vm7819_vm0, %v7820_v1 }
0x4777   :  { %6774 = vmatprep.subr.bf16.mxu1 %v7818_v0 }
0x4848   :  { %v5468_v14 = vpop.f32.mrb[50].mxu1 }
0x4849   :  { %v5472_v47 = vadd.f32 %v5468_v14, %v4979_v10  ;;  %v6471_v35 = vpop.f32.mrb[51].mxu1 }
0x484b   :  { %7540 = vtanh.f32 %v5472_v47  ;;  %v6046_v32 = vmul.f32 -1.442695, %v5472_v47 }
0x484d   :  { %7542 = vpow2.f32 %v6046_v32  ;;  %v5799_v32 = vld [vmem:[%s9563_s13 + $0x8] sm:$0xff] }
0x4855   :  { %v7541_v59 = vpop.eup %7540 }
0x4856   :  { %5482 = vrot.lane.b32.xlu0 %v7541_v59, %s7823_s6 }
0x4857   :  { %v7543_v2 = vpop.eup %7542 }
0x4858   :  { %v5476_v33 = vadd.f32 1.0, %v7543_v2  ;;  %v6781_v2 = vpack.c.bf16 %v5799_v32, %v5798_v56 }
0x485a   :  { %7544 = vrcp.f32 %v5476_v33 }
0x4864   :  { %v7545_v63 = vpop.eup %7544 }
0x4865   :  { %v5480_v46 = vmul.f32 %v7545_v63, %v5390_v62 }
0x48c8   :  { %v5483_v17 = vpop.permute.xlu0 %5482 }
0x48c9   :  { %v5485_v27 = vmul.f32 %v7545_v63, %v5483_v17 }
0x48cb   :  { %5487 = vrot.lane.b32.xlu1 %v5485_v27, %s7813_s7 }
0x493d   :  { %v5488_v12 = vpop.permute.xlu1 %5487 }
0x493e   :  { %v5490_v52 = vadd.f32 %v5488_v12, %v5480_v46  ;;  %v6053_v12 = vld [vmem:[#allocation16] ss:$0 sm:$0xff] }
0x4940   :  { %7546 = vtanh.f32 %v5490_v52 }
0x494a   :  { %v7547_v25 = vpop.eup %7546 }
0x494b   :  { %5493 = vrot.lane.b32.xlu0 %v7547_v25, %s7822_s16 }
0x49bd   :  { %v5494_v9 = vpop.permute.xlu0 %5493 }
0x49be   :  { %v5496_v44 = vmul.f32 %v7545_v63, %v5494_v9 }
0x49c0   :  { %5498 = vrot.lane.b32.xlu1 %v5496_v44, %s7824_s0 }
0x4a32   :  { %v5499_v22 = vpop.permute.xlu1 %5498 }
0x4a33   :  { %6477 = vmatmul.mubr.msk.f32.vlgmr.msra.gmra.mrb[52].mxu1 %vm4999_vm12, %v5499_v22 }
0x4a34   :  { %6776 = vmatpush3.bf16.msra.mxu1 %v9439_v30  ;;  %6483 = vmatprep.mubr.msk.f32.mxu1 %vm7819_vm0, %v7820_v1 }
0x4a35   :  { %6777 = vmatprep.subr.bf16.mxu1 %v7818_v0 }
0x4b06   :  { %v5568_v5 = vpop.f32.mrb[52].mxu1 }
0x4b07   :  { %v5572_v49 = vadd.f32 %v5568_v5, %v4984_v37  ;;  %v6478_v7 = vpop.f32.mrb[53].mxu1 }
0x4b09   :  { %7548 = vtanh.f32 %v5572_v49  ;;  %v6048_v16 = vmul.f32 -1.442695, %v5572_v49 }
0x4b0b   :  { %7550 = vpow2.f32 %v6048_v16 }
0x4b13   :  { %v7549_v42 = vpop.eup %7548 }
0x4b14   :  { %5582 = vrot.lane.b32.xlu0 %v7549_v42, %s7823_s6 }
0x4b15   :  { %v7551_v8 = vpop.eup %7550 }
0x4b16   :  { %v5576_v20 = vadd.f32 1.0, %v7551_v8 }
0x4b18   :  { %7552 = vrcp.f32 %v5576_v20 }
0x4b22   :  { %v7553_v13 = vpop.eup %7552 }
0x4b23   :  { %v5580_v26 = vmul.f32 %v7553_v13, %v5490_v52 }
0x4b86   :  { %v5583_v60 = vpop.permute.xlu0 %5582 }
0x4b87   :  { %v5585_v21 = vmul.f32 %v7553_v13, %v5583_v60 }
0x4b89   :  { %5587 = vrot.lane.b32.xlu1 %v5585_v21, %s7813_s7 }
0x4bfb   :  { %v5588_v50 = vpop.permute.xlu1 %5587 }
0x4bfc   :  { %v5590_v38 = vadd.f32 %v5588_v50, %v5580_v26 }
0x4bfe   :  { %7554 = vtanh.f32 %v5590_v38 }
0x4c08   :  { %v7555_v53 = vpop.eup %7554 }
0x4c09   :  { %5593 = vrot.lane.b32.xlu0 %v7555_v53, %s7822_s16 }
0x4c7b   :  { %v5594_v54 = vpop.permute.xlu0 %5593 }
0x4c7c   :  { %v5596_v24 = vmul.f32 %v7553_v13, %v5594_v54 }
0x4c7e   :  { %5598 = vrot.lane.b32.xlu1 %v5596_v24, %s7824_s0 }
0x4cf0   :  { %v5599_v57 = vpop.permute.xlu1 %5598 }
0x4cf1   :  { %6484 = vmatmul.mubr.msk.f32.vlgmr.msra.gmra.mrb[54].mxu1 %vm4999_vm12, %v5599_v57 }
0x4cf2   :  { %6779 = vmatpush3.bf16.msra.mxu1 %v9439_v30  ;;  %6490 = vmatprep.mubr.msk.f32.mxu1 %vm7819_vm0, %v7820_v1 }
0x4cf3   :  { %6780 = vmatprep.subr.bf16.mxu1 %v7818_v0 }
0x4dc4   :  { %v5668_v41 = vpop.f32.mrb[54].mxu1 }
0x4dc5   :  { %v5672_v61 = vadd.f32 %v5668_v41, %v4989_v34  ;;  %v6485_v39 = vpop.f32.mrb[55].mxu1 }
0x4dc7   :  { %7556 = vtanh.f32 %v5672_v61  ;;  %v6050_v51 = vmul.f32 -1.442695, %v5672_v61 }
0x4dc9   :  { %7558 = vpow2.f32 %v6050_v51 }
0x4dd1   :  { %v7557_v29 = vpop.eup %7556 }
0x4dd2   :  { %5682 = vrot.lane.b32.xlu0 %v7557_v29, %s7823_s6 }
0x4dd3   :  { %v7559_v3 = vpop.eup %7558 }
0x4dd4   :  { %v5676_v31 = vadd.f32 1.0, %v7559_v3 }
0x4dd6   :  { %7560 = vrcp.f32 %v5676_v31 }
0x4de0   :  { %v7561_v30 = vpop.eup %7560 }
0x4de1   :  { %v5680_v0 = vmul.f32 %v7561_v30, %v5590_v38 }
0x4e44   :  { %v5683_v48 = vpop.permute.xlu0 %5682 }
0x4e45   :  { %v5685_v11 = vmul.f32 %v7561_v30, %v5683_v48 }
0x4e47   :  { %5687 = vrot.lane.b32.xlu1 %v5685_v11, %s7813_s7 }
0x4eb9   :  { %v5688_v28 = vpop.permute.xlu1 %5687 }
0x4eba   :  { %v5690_v19 = vadd.f32 %v5688_v28, %v5680_v0 }
0x4ebc   :  { %7562 = vtanh.f32 %v5690_v19 }
0x4ec6   :  { %v7563_v4 = vpop.eup %7562 }
0x4ec7   :  { %5693 = vrot.lane.b32.xlu0 %v7563_v4, %s7822_s16 }
0x4f39   :  { %v5694_v15 = vpop.permute.xlu0 %5693 }
0x4f3a   :  { %v5696_v36 = vmul.f32 %v7561_v30, %v5694_v15 }
0x4f3c   :  { %5698 = vrot.lane.b32.xlu1 %v5696_v36, %s7824_s0 }
0x4fae   :  { %v5699_v23 = vpop.permute.xlu1 %5698 }
0x4faf   :  { %6491 = vmatmul.mubr.msk.f32.vlgmr.msra.gmra.mrb[56].mxu1 %vm4999_vm12, %v5699_v23 }
0x4fb0   :  { %6497 = vmatprep.mubr.msk.f32.mxu1 %vm7819_vm0, %v7820_v1  ;;  %6782 = vmatpush3.bf16.msra.mxu1 %v6781_v2 }
0x5082   :  { %v5768_v55 = vpop.f32.mrb[56].mxu1 }
0x5083   :  { %v5772_v62 = vadd.f32 %v5768_v55, %v4994_v6  ;;  %v6492_v18 = vpop.f32.mrb[57].mxu1 }
0x5085   :  { %7564 = vtanh.f32 %v5772_v62  ;;  %v6052_v43 = vmul.f32 -1.442695, %v5772_v62 }
0x5087   :  { %7566 = vpow2.f32 %v6052_v43 }
0x508f   :  { %v7565_v40 = vpop.eup %7564 }
0x5090   :  { %5782 = vrot.lane.b32.xlu0 %v7565_v40, %s7823_s6 }
0x5091   :  { %v7567_v58 = vpop.eup %7566 }
0x5092   :  { %v5776_v10 = vadd.f32 1.0, %v7567_v58 }
0x5094   :  { %7568 = vrcp.f32 %v5776_v10 }
0x509e   :  { %v7569_v14 = vpop.eup %7568 }
0x509f   :  { %v5780_v1 = vmul.f32 %v7569_v14, %v5690_v19 }
0x5102   :  { %v5783_v47 = vpop.permute.xlu0 %5782 }
0x5103   :  { %v5785_v35 = vmul.f32 %v7569_v14, %v5783_v47 }
0x5105   :  { %5787 = vrot.lane.b32.xlu1 %v5785_v35, %s7813_s7 }
0x5177   :  { %v5788_v59 = vpop.permute.xlu1 %5787 }
0x5178   :  { %v5790_v45 = vadd.f32 %v5788_v59, %v5780_v1 }
0x517a   :  { %7570 = vtanh.f32 %v5790_v45 }
0x5184   :  { %v7571_v33 = vpop.eup %7570 }
0x5185   :  { %5793 = vrot.lane.b32.xlu0 %v7571_v33, %s7822_s16 }
0x51f7   :  { %v5794_v63 = vpop.permute.xlu0 %5793 }
0x51f8   :  { %v5796_v17 = vmul.f32 %v7569_v14, %v5794_v63 }
0x51fa   :  { %v5797_v27 = vmax.f32 %v5796_v17, 0.0 }
0x51fc   :  { %5808 = vrot.lane.b32.xlu1 %v5797_v27, %s7824_s0 }
0x526e   :  { %v5809_v46 = vpop.permute.xlu1 %5808 }
0x526f   :  { %6498 = vmatmul.mubr.msk.f32.vlgmr.msra.gmra.mrb[58].mxu1 %vm4999_vm12, %v5809_v46 }
0x5342   :  { %v5878_v52 = vpop.f32.mrb[58].mxu1 }
0x5343   :  { %v5879_v25 = vadd.f32 %v6053_v12, %v5878_v52  ;;  %v6499_v9 = vpop.f32.mrb[59].mxu1 }
0x5345   :  { %5882 = vst.msk [vmem:[%s9565_s15] sm:$0xff] %vm192_vm2, %v5879_v25 }
0x5346   :  { %5887 = vsyncpa [#allocation3], 1 }
0x5347   :  { %5888 = vsyncpa [#allocation5], 1 }
0x5348   :  { %5889 = vsyncpa [#allocation8], 1 }
0x5349   :  { %5890 = vsyncpa [#allocation11], 1 }
0x534a   :  { %5891 = vsyncpa [#allocation14], 1 }
0x534b   :  { %5892 = vsyncpa [#allocation17], 1 }

</bundles_post_ra>
